<compile_context>
chip_gen: v7x
topology: tpu7x:2x2x1
jax: 0.10.0
libtpu: 0.0.40
codegen_flags: <defaults>
</compile_context>

<pallas_src>
import math
from functools import partial

import jax
import jax.numpy as jnp
import numpy as np
from jax.experimental import pallas as pl
from jax.experimental.pallas import tpu as pltpu


def _round_up(n, m):
    return (n + m - 1) // m * m


# ----------------------------- Pallas kernel ------------------------------ #

def _wavenet_kernel(tpos_ref, x_ref, init_w_ref, init_b_ref,
                    blk_w_ref, blk_b_ref, sf_w_ref, sf_b_ref, o_ref,
                    *, stacks, layers, seq_len):
    """One grid block = `bt` whole sequences; rows = (b, t), lanes = channels."""
    M, Cp = x_ref.shape
    f32 = jnp.float32

    # Activations in f32 inside the kernel (safe sublane rolls / VPU math on all
    # chip generations); cast to bf16 only at the MXU boundary.
    x = x_ref[...].astype(f32)

    tpos = tpos_ref[...]                       # (M, 1) int32: time pos of each row
    mask_cache = {}                            # one (M,1) f32 mask per distinct shift

    def causal_shift(a, s):
        # out[b, t] = a[b, t - s], zero for t < s.  Rows are (b, t) flattened and
        # every block holds whole sequences, so the roll's wrap-around only lands
        # in rows the mask zeroes anyway.
        if s == 0:
            return a
        if s >= seq_len:
            return jnp.zeros_like(a)
        m = mask_cache.get(s)
        if m is None:
            m = (tpos >= s).astype(f32)        # (M, 1), broadcast by multiply
            mask_cache[s] = m
        return pltpu.roll(a, shift=s, axis=0) * m      # XLU sublane rotate

    def mm(a, w):                              # (M,K) f32 x (K,N) bf16 -> (M,N) f32
        return jnp.dot(a.astype(jnp.bfloat16), w, preferred_element_type=f32)

    def gate(z):                               # tanh(z)*sigmoid(z) == (1-v)/(1+v^2)
        # clamp: for z < -30 the exact value is ~-1e-13; clamping keeps v*v finite.
        v = jnp.exp(-jnp.maximum(z, -30.0))
        return (1.0 - v) / (1.0 + v * v)       # exact division (no approx drift)

    # init causal conv (k=3, dilation=1): three accumulated taps, no concat temp.
    y = (mm(x, init_w_ref[0])
         + mm(causal_shift(x, 1), init_w_ref[1])
         + mm(causal_shift(x, 2), init_w_ref[2])
         + init_b_ref[...])

    chains = [y] * layers
    for s in range(stacks):
        new_chains = []
        for l in range(layers):
            d = 2 ** l
            idx = s * layers + l
            a = chains[l]
            # Fused N=2Cp output: cols [0:Cp] = dilated conv, cols [Cp:2Cp] = 1x1
            # residual conv (taps 1/2 hold zeros there).  Three accumulated dots.
            hr = (mm(a, blk_w_ref[idx, 0])
                  + mm(causal_shift(a, d), blk_w_ref[idx, 1])
                  + mm(causal_shift(a, 2 * d), blk_w_ref[idx, 2])
                  + blk_b_ref[idx])
            new_chains.append(gate(hr[:, :Cp]) + hr[:, Cp:])
        chains = new_chains

    # skip 1x1 convs + sum over layers + final 1x1 conv, pre-composed on the host
    # into sf_w (layers, Cp, Cp): accumulate per-layer dots (no h_cat concat).
    out = sf_b_ref[...]
    for l in range(layers):
        out = out + mm(chains[l], sf_w_ref[l])
    o_ref[...] = out.astype(o_ref.dtype)


# --------------------- One-time host-side weight prep ---------------------- #

def prepare_wavenet_params(params, *, stacks, layers):
    """Transpose / fuse / lane-pad weights once (outside the hot path)."""
    C = params["init_b"].shape[0]
    Cp = _round_up(max(C, 128), 128)
    f32, bf16 = jnp.float32, jnp.bfloat16

    # Causal conv taps: out[t] = w[:,:,2]x[t] + w[:,:,1]x[t-d] + w[:,:,0]x[t-2d]
    iw = params["init_w"]                                   # (C, C, 3)
    assert iw.shape[-1] == 3, "kernel assumes init_conv_kernel == 3"
    W_init = jnp.zeros((3, Cp, Cp), f32)
    for t in range(3):
        W_init = W_init.at[t, :C, :C].set(iw[:, :, 2 - t].T)
    b_init = jnp.zeros((1, Cp), f32).at[0, :C].set(params["init_b"])

    # per-block per-tap weight: dilated conv (+ residual 1x1 on tap 0), N = 2*Cp
    nblk = stacks * layers
    W_blk = jnp.zeros((nblk, 3, Cp, 2 * Cp), f32)
    b_blk = jnp.zeros((nblk, 1, 2 * Cp), f32)
    for s in range(stacks):
        for l in range(layers):
            i = s * layers + l
            cw = params["conv_w"][s, l]                     # (C, C, 3)
            rw = params["res_w"][s, l][:, :, 0]             # (C, C)
            for t in range(3):
                W_blk = W_blk.at[i, t, :C, :C].set(cw[:, :, 2 - t].T)
            W_blk = W_blk.at[i, 0, :C, Cp:Cp + C].set(rw.T)
            b_blk = b_blk.at[i, 0, :C].set(params["conv_b"][s, l])
            b_blk = b_blk.at[i, 0, Cp:Cp + C].set(params["res_b"][s, l])

    # Compose skip 1x1 convs with the final 1x1 conv (no nonlinearity between the
    # skip sum and final_conv in the reference, so this is exact; done in f32).
    fw = params["final_w"][:, :, 0]                         # (C, C)
    W_sf = jnp.zeros((layers, Cp, Cp), f32)
    for l in range(layers):
        sw = params["skip_w"][l][:, :, 0]                   # (C, C)
        W_sf = W_sf.at[l, :C, :C].set((fw @ sw).T)
    b_sf_c = params["skip_b"].sum(0) @ fw.T + params["final_b"]
    b_sf = jnp.zeros((1, Cp), f32).at[0, :C].set(b_sf_c)

    return dict(
        dim=C, dim_padded=Cp, stacks=stacks, layers=layers,
        init_w=W_init.astype(bf16), init_b=b_init,
        blk_w=W_blk.astype(bf16), blk_b=b_blk,
        sf_w=W_sf.astype(bf16), sf_b=b_sf,
    )


# ------------------------------ Wrapper ----------------------------------- #

def wavenet_pallas(x, prepped):
    """x: (B, dim, T) float32. Returns (B, dim, T) float32."""
    B, C, T = x.shape
    assert C == prepped["dim"]
    Cp = prepped["dim_padded"]
    stacks, layers = prepped["stacks"], prepped["layers"]

    Tp = _round_up(T, 16)                       # sublane-friendly time pad

    # --- VMEM budget -> row tile (v5e/v6e: 128 MiB physical, v7x: 64 MiB) -------
    try:
        vmem_cap = int(pltpu.get_tpu_info().vmem_capacity_bytes)
    except Exception:
        vmem_cap = 64 * 1024 * 1024
    vmem_limit = min(100 * 1024 * 1024, (vmem_cap * 3) // 4)

    weight_keys = ("init_w", "init_b", "blk_w", "blk_b", "sf_w", "sf_b")
    weight_bytes = 2 * sum(int(prepped[k].size) * prepped[k].dtype.itemsize
                           for k in weight_keys)    # x2: pipeline double-buffers
    act_budget = max(vmem_limit - weight_bytes, 2 * 1024 * 1024) // 2
    per_row_bytes = (layers + 8) * Cp * 4           # chains + temps, f32
    target_rows = int(min(2048, max(Tp, act_budget // per_row_bytes)))

    bt = max(1, min(B, target_rows // Tp))
    if B >= 2:                                  # >=2 grid blocks so both v7x TCs work
        bt = min(bt, (B + 1) // 2)
    Bp = _round_up(B, bt)
    rows = bt * Tp

    # (B, C, T) -> (Bp*Tp, Cp): time on sublanes, channels lane-dense, bf16 stream.
    x_btc = jnp.transpose(x, (0, 2, 1))
    x_btc = jnp.pad(x_btc, ((0, Bp - B), (0, Tp - T), (0, Cp - C)))
    x_flat = x_btc.reshape(Bp * Tp, Cp).astype(jnp.bfloat16)

    # Time position of each row within a block (same for every block: whole seqs).
    tpos = jnp.tile(jnp.arange(Tp, dtype=jnp.int32)[:, None], (bt, 1))   # (rows, 1)

    def _const_spec(a):
        nd = a.ndim
        return pl.BlockSpec(a.shape, lambda i, _nd=nd: (0,) * _nd)

    kernel = partial(_wavenet_kernel, stacks=stacks, layers=layers, seq_len=Tp)

    out_flat = pl.pallas_call(
        kernel,
        out_shape=jax.ShapeDtypeStruct((Bp * Tp, Cp), jnp.float32),
        grid=(Bp // bt,),
        in_specs=[
            _const_spec(tpos),
            pl.BlockSpec((rows, Cp), lambda i: (i, 0)),
            _const_spec(prepped["init_w"]), _const_spec(prepped["init_b"]),
            _const_spec(prepped["blk_w"]), _const_spec(prepped["blk_b"]),
            _const_spec(prepped["sf_w"]), _const_spec(prepped["sf_b"]),
        ],
        out_specs=pl.BlockSpec((rows, Cp), lambda i: (i, 0)),
        compiler_params=pltpu.CompilerParams(
            dimension_semantics=("parallel",),
            vmem_limit_bytes=int(vmem_limit)),
    )(tpos, x_flat,
      prepped["init_w"], prepped["init_b"],
      prepped["blk_w"], prepped["blk_b"],
      prepped["sf_w"], prepped["sf_b"])

    out = out_flat.reshape(Bp, Tp, Cp)[:B, :T, :C]
    return jnp.transpose(out, (0, 2, 1))        # back to (B, C, T)


# ------------------------- Pure-JAX reference ------------------------------ #

def _causal_conv1d_ref(x, w, b, dilation):
    # x: (B, Cin, T), w: (Cout, Cin, K), b: (Cout,)
    K = w.shape[-1]
    pad = dilation * (K - 1)
    out = jax.lax.conv_general_dilated(
        x, w, window_strides=(1,), padding=[(pad, 0)],
        rhs_dilation=(dilation,),
        dimension_numbers=("NCH", "OIH", "NCH"))
    return out + b[None, :, None]


def wavenet_ref(x, params, *, stacks, layers):
    y = _causal_conv1d_ref(x, params["init_w"], params["init_b"], 1)
    chains = [y] * layers
    skips = []
    for s in range(stacks):
        new_chains = []
        for l in range(layers):
            d = 2 ** l
            a = chains[l]
            res = _causal_conv1d_ref(a, params["res_w"][s, l],
                                     params["res_b"][s, l], 1)
            h = _causal_conv1d_ref(a, params["conv_w"][s, l],
                                   params["conv_b"][s, l], d)
            h = jnp.tanh(h) * jax.nn.sigmoid(h)
            h = h + res
            new_chains.append(h)
            if s == stacks - 1:
                skips.append(_causal_conv1d_ref(h, params["skip_w"][l],
                                                params["skip_b"][l], 1))
        chains = new_chains
    summed = skips[0]
    for sk in skips[1:]:
        summed = summed + sk
    return _causal_conv1d_ref(summed, params["final_w"], params["final_b"], 1)


# ------------------------- Deterministic params ---------------------------- #

def _conv_param(key, cout, cin, ksize):
    k1, k2 = jax.random.split(key)
    bound = 1.0 / math.sqrt(cin * ksize)
    w = jax.random.uniform(k1, (cout, cin, ksize), jnp.float32, -bound, bound)
    b = jax.random.uniform(k2, (cout,), jnp.float32, -bound, bound)
    return w, b


def make_params(key, dim, *, stacks, layers, init_conv_kernel=3):
    cnt = iter(range(10_000))

    def nk():
        return jax.random.fold_in(key, next(cnt))

    init_w, init_b = _conv_param(nk(), dim, dim, init_conv_kernel)

    cw, cb, rw, rb = [], [], [], []
    for _s in range(stacks):
        cw_r, cb_r, rw_r, rb_r = [], [], [], []
        for _l in range(layers):
            w, b = _conv_param(nk(), dim, dim, 3)
            cw_r.append(w); cb_r.append(b)
            w, b = _conv_param(nk(), dim, dim, 1)
            rw_r.append(w); rb_r.append(b)
        cw.append(jnp.stack(cw_r)); cb.append(jnp.stack(cb_r))
        rw.append(jnp.stack(rw_r)); rb.append(jnp.stack(rb_r))

    sw, sb = [], []
    for _l in range(layers):
        w, b = _conv_param(nk(), dim, dim, 1)
        sw.append(w); sb.append(b)

    final_w, final_b = _conv_param(nk(), dim, dim, 1)

    return dict(
        init_w=init_w, init_b=init_b,
        conv_w=jnp.stack(cw), conv_b=jnp.stack(cb),
        res_w=jnp.stack(rw), res_b=jnp.stack(rb),
        skip_w=jnp.stack(sw), skip_b=jnp.stack(sb),
        final_w=final_w, final_b=final_b,
    )


# --------------------------------- Main ------------------------------------ #

if __name__ == "__main__":
    dim, T, B = 32, 16, 2
    stacks, layers = 2, 3

    key = jax.random.PRNGKey(0)
    kp, kx = jax.random.split(key)
    params = make_params(kp, dim, stacks=stacks, layers=layers)
    x = jax.random.normal(kx, (B, dim, T), jnp.float32)

    prepped = prepare_wavenet_params(params, stacks=stacks, layers=layers)

    out = wavenet_pallas(x, prepped)
    out = jax.block_until_ready(out)
    assert out.shape == (B, dim, T)

    ref = wavenet_ref(x, params, stacks=stacks, layers=layers)
    # bf16 matmuls (f32 accumulation) -> loosened tolerance.
    np.testing.assert_allclose(np.asarray(out), np.asarray(ref),
                               rtol=3e-2, atol=3e-2)
    print("KERNEL_OK")
</pallas_src>

<mosaic_0001>
module attributes {stable_mosaic.version = 11 : i64} {
  func.func @_wavenet_kernel(%arg0: i32, %arg1: memref<16x1xi32, #tpu.memory_space<vmem>>, %arg2: memref<16x128xbf16, #tpu.memory_space<vmem>>, %arg3: memref<3x128x128xbf16, #tpu.memory_space<vmem>>, %arg4: memref<1x128xf32, #tpu.memory_space<vmem>>, %arg5: memref<6x3x128x256xbf16, #tpu.memory_space<vmem>>, %arg6: memref<6x1x256xf32, #tpu.memory_space<vmem>>, %arg7: memref<3x128x128xbf16, #tpu.memory_space<vmem>>, %arg8: memref<1x128xf32, #tpu.memory_space<vmem>>, %arg9: memref<16x128xf32, #tpu.memory_space<vmem>>) attributes {dimension_semantics = [#tpu.dimension_semantics<parallel>], iteration_bounds = array<i64: 2>, scalar_prefetch = 0 : i64, scratch_operands = 0 : i64, tpu.core_type = #tpu.core_type<tc>, window_params = [{pipeline_mode = #tpu.pipeline_mode<synchronous>, transform_indices = @transform_0, window_bounds = array<i64: 16, 1>}, {transform_indices = @transform_1, window_bounds = array<i64: 16, 128>}, {pipeline_mode = #tpu.pipeline_mode<synchronous>, transform_indices = @transform_2, window_bounds = array<i64: 3, 128, 128>}, {pipeline_mode = #tpu.pipeline_mode<synchronous>, transform_indices = @transform_3, window_bounds = array<i64: 1, 128>}, {pipeline_mode = #tpu.pipeline_mode<synchronous>, transform_indices = @transform_4, window_bounds = array<i64: 6, 3, 128, 256>}, {pipeline_mode = #tpu.pipeline_mode<synchronous>, transform_indices = @transform_5, window_bounds = array<i64: 6, 1, 256>}, {pipeline_mode = #tpu.pipeline_mode<synchronous>, transform_indices = @transform_6, window_bounds = array<i64: 3, 128, 128>}, {pipeline_mode = #tpu.pipeline_mode<synchronous>, transform_indices = @transform_7, window_bounds = array<i64: 1, 128>}, {transform_indices = @transform_8, window_bounds = array<i64: 16, 128>}]} {
    %c0 = arith.constant 0 : index
    %c0_0 = arith.constant 0 : index
    %0 = vector.load %arg2[%c0, %c0_0] : memref<16x128xbf16, #tpu.memory_space<vmem>>, vector<16x128xbf16>
    %1 = arith.extf %0 : vector<16x128xbf16> to vector<16x128xf32>
    %c0_1 = arith.constant 0 : index
    %c0_2 = arith.constant 0 : index
    %2 = vector.load %arg1[%c0_1, %c0_2] : memref<16x1xi32, #tpu.memory_space<vmem>>, vector<16x1xi32>
    %c0_3 = arith.constant 0 : index
    %c0_4 = arith.constant 0 : index
    %c0_5 = arith.constant 0 : index
    %3 = vector.load %arg3[%c0_3, %c0_4, %c0_5] : memref<3x128x128xbf16, #tpu.memory_space<vmem>>, vector<1x128x128xbf16>
    %4 = vector.shape_cast %3 : vector<1x128x128xbf16> to vector<128x128xbf16>
    %5 = arith.truncf %1 : vector<16x128xf32> to vector<16x128xbf16>
    %cst = arith.constant dense<0.000000e+00> : vector<16x128xf32>
    %6 = tpu.matmul %5, %4, %cst {dimension_numbers = #tpu.dot_dimension_numbers<[1], [0], [0], [1], [0, 0, 1, 1], [], []>} : vector<16x128xbf16>, vector<128x128xbf16>, vector<16x128xf32> -> vector<16x128xf32>
    %c1_i32 = arith.constant 1 : i32
    %7 = vector.broadcast %c1_i32 : i32 to vector<16x1xi32>
    %8 = arith.cmpi sge, %2, %7 : vector<16x1xi32>
    %9 = arith.extui %8 : vector<16x1xi1> to vector<16x1xi32>
    %10 = arith.sitofp %9 : vector<16x1xi32> to vector<16x1xf32>
    %c1_i32_6 = arith.constant 1 : i32
    %11 = tpu.dynamic_rotate %1 by %c1_i32_6 dim 0 : vector<16x128xf32>, i32 -> vector<16x128xf32>
    %12 = vector.broadcast %10 : vector<16x1xf32> to vector<16x128xf32>
    %13 = arith.mulf %11, %12 : vector<16x128xf32>
    %c1 = arith.constant 1 : index
    %c0_7 = arith.constant 0 : index
    %c0_8 = arith.constant 0 : index
    %14 = vector.load %arg3[%c1, %c0_7, %c0_8] : memref<3x128x128xbf16, #tpu.memory_space<vmem>>, vector<1x128x128xbf16>
    %15 = vector.shape_cast %14 : vector<1x128x128xbf16> to vector<128x128xbf16>
    %16 = arith.truncf %13 : vector<16x128xf32> to vector<16x128xbf16>
    %cst_9 = arith.constant dense<0.000000e+00> : vector<16x128xf32>
    %17 = tpu.matmul %16, %15, %cst_9 {dimension_numbers = #tpu.dot_dimension_numbers<[1], [0], [0], [1], [0, 0, 1, 1], [], []>} : vector<16x128xbf16>, vector<128x128xbf16>, vector<16x128xf32> -> vector<16x128xf32>
    %18 = arith.addf %6, %17 : vector<16x128xf32>
    %c2_i32 = arith.constant 2 : i32
    %19 = vector.broadcast %c2_i32 : i32 to vector<16x1xi32>
    %20 = arith.cmpi sge, %2, %19 : vector<16x1xi32>
    %21 = arith.extui %20 : vector<16x1xi1> to vector<16x1xi32>
    %22 = arith.sitofp %21 : vector<16x1xi32> to vector<16x1xf32>
    %c2_i32_10 = arith.constant 2 : i32
    %23 = tpu.dynamic_rotate %1 by %c2_i32_10 dim 0 : vector<16x128xf32>, i32 -> vector<16x128xf32>
    %24 = vector.broadcast %22 : vector<16x1xf32> to vector<16x128xf32>
    %25 = arith.mulf %23, %24 : vector<16x128xf32>
    %c2 = arith.constant 2 : index
    %c0_11 = arith.constant 0 : index
    %c0_12 = arith.constant 0 : index
    %26 = vector.load %arg3[%c2, %c0_11, %c0_12] : memref<3x128x128xbf16, #tpu.memory_space<vmem>>, vector<1x128x128xbf16>
    %27 = vector.shape_cast %26 : vector<1x128x128xbf16> to vector<128x128xbf16>
    %28 = arith.truncf %25 : vector<16x128xf32> to vector<16x128xbf16>
    %cst_13 = arith.constant dense<0.000000e+00> : vector<16x128xf32>
    %29 = tpu.matmul %28, %27, %cst_13 {dimension_numbers = #tpu.dot_dimension_numbers<[1], [0], [0], [1], [0, 0, 1, 1], [], []>} : vector<16x128xbf16>, vector<128x128xbf16>, vector<16x128xf32> -> vector<16x128xf32>
    %30 = arith.addf %18, %29 : vector<16x128xf32>
    %c0_14 = arith.constant 0 : index
    %c0_15 = arith.constant 0 : index
    %31 = vector.load %arg4[%c0_14, %c0_15] : memref<1x128xf32, #tpu.memory_space<vmem>>, vector<1x128xf32>
    %32 = vector.broadcast %31 : vector<1x128xf32> to vector<16x128xf32>
    %33 = arith.addf %30, %32 : vector<16x128xf32>
    %c0_16 = arith.constant 0 : index
    %c0_17 = arith.constant 0 : index
    %c0_18 = arith.constant 0 : index
    %c0_19 = arith.constant 0 : index
    %34 = vector.load %arg5[%c0_16, %c0_17, %c0_18, %c0_19] : memref<6x3x128x256xbf16, #tpu.memory_space<vmem>>, vector<1x1x128x256xbf16>
    %35 = vector.shape_cast %34 : vector<1x1x128x256xbf16> to vector<128x256xbf16>
    %36 = arith.truncf %33 : vector<16x128xf32> to vector<16x128xbf16>
    %cst_20 = arith.constant dense<0.000000e+00> : vector<16x256xf32>
    %37 = tpu.matmul %36, %35, %cst_20 {dimension_numbers = #tpu.dot_dimension_numbers<[1], [0], [0], [1], [0, 0, 1, 1], [], []>} : vector<16x128xbf16>, vector<128x256xbf16>, vector<16x256xf32> -> vector<16x256xf32>
    %c1_i32_21 = arith.constant 1 : i32
    %38 = tpu.dynamic_rotate %33 by %c1_i32_21 dim 0 : vector<16x128xf32>, i32 -> vector<16x128xf32>
    %39 = vector.broadcast %10 : vector<16x1xf32> to vector<16x128xf32>
    %40 = arith.mulf %38, %39 : vector<16x128xf32>
    %c0_22 = arith.constant 0 : index
    %c1_23 = arith.constant 1 : index
    %c0_24 = arith.constant 0 : index
    %c0_25 = arith.constant 0 : index
    %41 = vector.load %arg5[%c0_22, %c1_23, %c0_24, %c0_25] : memref<6x3x128x256xbf16, #tpu.memory_space<vmem>>, vector<1x1x128x256xbf16>
    %42 = vector.shape_cast %41 : vector<1x1x128x256xbf16> to vector<128x256xbf16>
    %43 = arith.truncf %40 : vector<16x128xf32> to vector<16x128xbf16>
    %cst_26 = arith.constant dense<0.000000e+00> : vector<16x256xf32>
    %44 = tpu.matmul %43, %42, %cst_26 {dimension_numbers = #tpu.dot_dimension_numbers<[1], [0], [0], [1], [0, 0, 1, 1], [], []>} : vector<16x128xbf16>, vector<128x256xbf16>, vector<16x256xf32> -> vector<16x256xf32>
    %45 = arith.addf %37, %44 : vector<16x256xf32>
    %c2_i32_27 = arith.constant 2 : i32
    %46 = tpu.dynamic_rotate %33 by %c2_i32_27 dim 0 : vector<16x128xf32>, i32 -> vector<16x128xf32>
    %47 = vector.broadcast %22 : vector<16x1xf32> to vector<16x128xf32>
    %48 = arith.mulf %46, %47 : vector<16x128xf32>
    %c0_28 = arith.constant 0 : index
    %c2_29 = arith.constant 2 : index
    %c0_30 = arith.constant 0 : index
    %c0_31 = arith.constant 0 : index
    %49 = vector.load %arg5[%c0_28, %c2_29, %c0_30, %c0_31] : memref<6x3x128x256xbf16, #tpu.memory_space<vmem>>, vector<1x1x128x256xbf16>
    %50 = vector.shape_cast %49 : vector<1x1x128x256xbf16> to vector<128x256xbf16>
    %51 = arith.truncf %48 : vector<16x128xf32> to vector<16x128xbf16>
    %cst_32 = arith.constant dense<0.000000e+00> : vector<16x256xf32>
    %52 = tpu.matmul %51, %50, %cst_32 {dimension_numbers = #tpu.dot_dimension_numbers<[1], [0], [0], [1], [0, 0, 1, 1], [], []>} : vector<16x128xbf16>, vector<128x256xbf16>, vector<16x256xf32> -> vector<16x256xf32>
    %53 = arith.addf %45, %52 : vector<16x256xf32>
    %c0_33 = arith.constant 0 : index
    %c0_34 = arith.constant 0 : index
    %c0_35 = arith.constant 0 : index
    %54 = vector.load %arg6[%c0_33, %c0_34, %c0_35] : memref<6x1x256xf32, #tpu.memory_space<vmem>>, vector<1x1x256xf32>
    %55 = vector.shape_cast %54 : vector<1x1x256xf32> to vector<1x256xf32>
    %56 = vector.broadcast %55 : vector<1x256xf32> to vector<16x256xf32>
    %57 = arith.addf %53, %56 : vector<16x256xf32>
    %58 = vector.extract_strided_slice %57 {offsets = [0, 0], sizes = [16, 128], strides = [1, 1]} : vector<16x256xf32> to vector<16x128xf32>
    %cst_36 = arith.constant -3.000000e+01 : f32
    %59 = vector.broadcast %cst_36 : f32 to vector<16x128xf32>
    %60 = arith.maximumf %58, %59 : vector<16x128xf32>
    %cst_37 = arith.constant 0.000000e+00 : f32
    %61 = vector.broadcast %cst_37 : f32 to vector<16x128xf32>
    %62 = arith.subf %61, %60 : vector<16x128xf32>
    %63 = math.exp %62 : vector<16x128xf32>
    %cst_38 = arith.constant 1.000000e+00 : f32
    %64 = vector.broadcast %cst_38 : f32 to vector<16x128xf32>
    %65 = arith.subf %64, %63 : vector<16x128xf32>
    %66 = arith.mulf %63, %63 : vector<16x128xf32>
    %cst_39 = arith.constant 1.000000e+00 : f32
    %67 = vector.broadcast %cst_39 : f32 to vector<16x128xf32>
    %68 = arith.addf %67, %66 : vector<16x128xf32>
    %69 = arith.divf %65, %68 : vector<16x128xf32>
    %70 = vector.extract_strided_slice %57 {offsets = [0, 128], sizes = [16, 128], strides = [1, 1]} : vector<16x256xf32> to vector<16x128xf32>
    %71 = arith.addf %69, %70 : vector<16x128xf32>
    %c1_40 = arith.constant 1 : index
    %c0_41 = arith.constant 0 : index
    %c0_42 = arith.constant 0 : index
    %c0_43 = arith.constant 0 : index
    %72 = vector.load %arg5[%c1_40, %c0_41, %c0_42, %c0_43] : memref<6x3x128x256xbf16, #tpu.memory_space<vmem>>, vector<1x1x128x256xbf16>
    %73 = vector.shape_cast %72 : vector<1x1x128x256xbf16> to vector<128x256xbf16>
    %74 = arith.truncf %33 : vector<16x128xf32> to vector<16x128xbf16>
    %cst_44 = arith.constant dense<0.000000e+00> : vector<16x256xf32>
    %75 = tpu.matmul %74, %73, %cst_44 {dimension_numbers = #tpu.dot_dimension_numbers<[1], [0], [0], [1], [0, 0, 1, 1], [], []>} : vector<16x128xbf16>, vector<128x256xbf16>, vector<16x256xf32> -> vector<16x256xf32>
    %c2_i32_45 = arith.constant 2 : i32
    %76 = tpu.dynamic_rotate %33 by %c2_i32_45 dim 0 : vector<16x128xf32>, i32 -> vector<16x128xf32>
    %77 = vector.broadcast %22 : vector<16x1xf32> to vector<16x128xf32>
    %78 = arith.mulf %76, %77 : vector<16x128xf32>
    %c1_46 = arith.constant 1 : index
    %c1_47 = arith.constant 1 : index
    %c0_48 = arith.constant 0 : index
    %c0_49 = arith.constant 0 : index
    %79 = vector.load %arg5[%c1_46, %c1_47, %c0_48, %c0_49] : memref<6x3x128x256xbf16, #tpu.memory_space<vmem>>, vector<1x1x128x256xbf16>
    %80 = vector.shape_cast %79 : vector<1x1x128x256xbf16> to vector<128x256xbf16>
    %81 = arith.truncf %78 : vector<16x128xf32> to vector<16x128xbf16>
    %cst_50 = arith.constant dense<0.000000e+00> : vector<16x256xf32>
    %82 = tpu.matmul %81, %80, %cst_50 {dimension_numbers = #tpu.dot_dimension_numbers<[1], [0], [0], [1], [0, 0, 1, 1], [], []>} : vector<16x128xbf16>, vector<128x256xbf16>, vector<16x256xf32> -> vector<16x256xf32>
    %83 = arith.addf %75, %82 : vector<16x256xf32>
    %c4_i32 = arith.constant 4 : i32
    %84 = vector.broadcast %c4_i32 : i32 to vector<16x1xi32>
    %85 = arith.cmpi sge, %2, %84 : vector<16x1xi32>
    %86 = arith.extui %85 : vector<16x1xi1> to vector<16x1xi32>
    %87 = arith.sitofp %86 : vector<16x1xi32> to vector<16x1xf32>
    %c4_i32_51 = arith.constant 4 : i32
    %88 = tpu.dynamic_rotate %33 by %c4_i32_51 dim 0 : vector<16x128xf32>, i32 -> vector<16x128xf32>
    %89 = vector.broadcast %87 : vector<16x1xf32> to vector<16x128xf32>
    %90 = arith.mulf %88, %89 : vector<16x128xf32>
    %c1_52 = arith.constant 1 : index
    %c2_53 = arith.constant 2 : index
    %c0_54 = arith.constant 0 : index
    %c0_55 = arith.constant 0 : index
    %91 = vector.load %arg5[%c1_52, %c2_53, %c0_54, %c0_55] : memref<6x3x128x256xbf16, #tpu.memory_space<vmem>>, vector<1x1x128x256xbf16>
    %92 = vector.shape_cast %91 : vector<1x1x128x256xbf16> to vector<128x256xbf16>
    %93 = arith.truncf %90 : vector<16x128xf32> to vector<16x128xbf16>
    %cst_56 = arith.constant dense<0.000000e+00> : vector<16x256xf32>
    %94 = tpu.matmul %93, %92, %cst_56 {dimension_numbers = #tpu.dot_dimension_numbers<[1], [0], [0], [1], [0, 0, 1, 1], [], []>} : vector<16x128xbf16>, vector<128x256xbf16>, vector<16x256xf32> -> vector<16x256xf32>
    %95 = arith.addf %83, %94 : vector<16x256xf32>
    %c1_57 = arith.constant 1 : index
    %c0_58 = arith.constant 0 : index
    %c0_59 = arith.constant 0 : index
    %96 = vector.load %arg6[%c1_57, %c0_58, %c0_59] : memref<6x1x256xf32, #tpu.memory_space<vmem>>, vector<1x1x256xf32>
    %97 = vector.shape_cast %96 : vector<1x1x256xf32> to vector<1x256xf32>
    %98 = vector.broadcast %97 : vector<1x256xf32> to vector<16x256xf32>
    %99 = arith.addf %95, %98 : vector<16x256xf32>
    %100 = vector.extract_strided_slice %99 {offsets = [0, 0], sizes = [16, 128], strides = [1, 1]} : vector<16x256xf32> to vector<16x128xf32>
    %cst_60 = arith.constant -3.000000e+01 : f32
    %101 = vector.broadcast %cst_60 : f32 to vector<16x128xf32>
    %102 = arith.maximumf %100, %101 : vector<16x128xf32>
    %cst_61 = arith.constant 0.000000e+00 : f32
    %103 = vector.broadcast %cst_61 : f32 to vector<16x128xf32>
    %104 = arith.subf %103, %102 : vector<16x128xf32>
    %105 = math.exp %104 : vector<16x128xf32>
    %cst_62 = arith.constant 1.000000e+00 : f32
    %106 = vector.broadcast %cst_62 : f32 to vector<16x128xf32>
    %107 = arith.subf %106, %105 : vector<16x128xf32>
    %108 = arith.mulf %105, %105 : vector<16x128xf32>
    %cst_63 = arith.constant 1.000000e+00 : f32
    %109 = vector.broadcast %cst_63 : f32 to vector<16x128xf32>
    %110 = arith.addf %109, %108 : vector<16x128xf32>
    %111 = arith.divf %107, %110 : vector<16x128xf32>
    %112 = vector.extract_strided_slice %99 {offsets = [0, 128], sizes = [16, 128], strides = [1, 1]} : vector<16x256xf32> to vector<16x128xf32>
    %113 = arith.addf %111, %112 : vector<16x128xf32>
    %c2_64 = arith.constant 2 : index
    %c0_65 = arith.constant 0 : index
    %c0_66 = arith.constant 0 : index
    %c0_67 = arith.constant 0 : index
    %114 = vector.load %arg5[%c2_64, %c0_65, %c0_66, %c0_67] : memref<6x3x128x256xbf16, #tpu.memory_space<vmem>>, vector<1x1x128x256xbf16>
    %115 = vector.shape_cast %114 : vector<1x1x128x256xbf16> to vector<128x256xbf16>
    %116 = arith.truncf %33 : vector<16x128xf32> to vector<16x128xbf16>
    %cst_68 = arith.constant dense<0.000000e+00> : vector<16x256xf32>
    %117 = tpu.matmul %116, %115, %cst_68 {dimension_numbers = #tpu.dot_dimension_numbers<[1], [0], [0], [1], [0, 0, 1, 1], [], []>} : vector<16x128xbf16>, vector<128x256xbf16>, vector<16x256xf32> -> vector<16x256xf32>
    %c4_i32_69 = arith.constant 4 : i32
    %118 = tpu.dynamic_rotate %33 by %c4_i32_69 dim 0 : vector<16x128xf32>, i32 -> vector<16x128xf32>
    %119 = vector.broadcast %87 : vector<16x1xf32> to vector<16x128xf32>
    %120 = arith.mulf %118, %119 : vector<16x128xf32>
    %c2_70 = arith.constant 2 : index
    %c1_71 = arith.constant 1 : index
    %c0_72 = arith.constant 0 : index
    %c0_73 = arith.constant 0 : index
    %121 = vector.load %arg5[%c2_70, %c1_71, %c0_72, %c0_73] : memref<6x3x128x256xbf16, #tpu.memory_space<vmem>>, vector<1x1x128x256xbf16>
    %122 = vector.shape_cast %121 : vector<1x1x128x256xbf16> to vector<128x256xbf16>
    %123 = arith.truncf %120 : vector<16x128xf32> to vector<16x128xbf16>
    %cst_74 = arith.constant dense<0.000000e+00> : vector<16x256xf32>
    %124 = tpu.matmul %123, %122, %cst_74 {dimension_numbers = #tpu.dot_dimension_numbers<[1], [0], [0], [1], [0, 0, 1, 1], [], []>} : vector<16x128xbf16>, vector<128x256xbf16>, vector<16x256xf32> -> vector<16x256xf32>
    %125 = arith.addf %117, %124 : vector<16x256xf32>
    %c8_i32 = arith.constant 8 : i32
    %126 = vector.broadcast %c8_i32 : i32 to vector<16x1xi32>
    %127 = arith.cmpi sge, %2, %126 : vector<16x1xi32>
    %128 = arith.extui %127 : vector<16x1xi1> to vector<16x1xi32>
    %129 = arith.sitofp %128 : vector<16x1xi32> to vector<16x1xf32>
    %c8_i32_75 = arith.constant 8 : i32
    %130 = tpu.dynamic_rotate %33 by %c8_i32_75 dim 0 : vector<16x128xf32>, i32 -> vector<16x128xf32>
    %131 = vector.broadcast %129 : vector<16x1xf32> to vector<16x128xf32>
    %132 = arith.mulf %130, %131 : vector<16x128xf32>
    %c2_76 = arith.constant 2 : index
    %c2_77 = arith.constant 2 : index
    %c0_78 = arith.constant 0 : index
    %c0_79 = arith.constant 0 : index
    %133 = vector.load %arg5[%c2_76, %c2_77, %c0_78, %c0_79] : memref<6x3x128x256xbf16, #tpu.memory_space<vmem>>, vector<1x1x128x256xbf16>
    %134 = vector.shape_cast %133 : vector<1x1x128x256xbf16> to vector<128x256xbf16>
    %135 = arith.truncf %132 : vector<16x128xf32> to vector<16x128xbf16>
    %cst_80 = arith.constant dense<0.000000e+00> : vector<16x256xf32>
    %136 = tpu.matmul %135, %134, %cst_80 {dimension_numbers = #tpu.dot_dimension_numbers<[1], [0], [0], [1], [0, 0, 1, 1], [], []>} : vector<16x128xbf16>, vector<128x256xbf16>, vector<16x256xf32> -> vector<16x256xf32>
    %137 = arith.addf %125, %136 : vector<16x256xf32>
    %c2_81 = arith.constant 2 : index
    %c0_82 = arith.constant 0 : index
    %c0_83 = arith.constant 0 : index
    %138 = vector.load %arg6[%c2_81, %c0_82, %c0_83] : memref<6x1x256xf32, #tpu.memory_space<vmem>>, vector<1x1x256xf32>
    %139 = vector.shape_cast %138 : vector<1x1x256xf32> to vector<1x256xf32>
    %140 = vector.broadcast %139 : vector<1x256xf32> to vector<16x256xf32>
    %141 = arith.addf %137, %140 : vector<16x256xf32>
    %142 = vector.extract_strided_slice %141 {offsets = [0, 0], sizes = [16, 128], strides = [1, 1]} : vector<16x256xf32> to vector<16x128xf32>
    %cst_84 = arith.constant -3.000000e+01 : f32
    %143 = vector.broadcast %cst_84 : f32 to vector<16x128xf32>
    %144 = arith.maximumf %142, %143 : vector<16x128xf32>
    %cst_85 = arith.constant 0.000000e+00 : f32
    %145 = vector.broadcast %cst_85 : f32 to vector<16x128xf32>
    %146 = arith.subf %145, %144 : vector<16x128xf32>
    %147 = math.exp %146 : vector<16x128xf32>
    %cst_86 = arith.constant 1.000000e+00 : f32
    %148 = vector.broadcast %cst_86 : f32 to vector<16x128xf32>
    %149 = arith.subf %148, %147 : vector<16x128xf32>
    %150 = arith.mulf %147, %147 : vector<16x128xf32>
    %cst_87 = arith.constant 1.000000e+00 : f32
    %151 = vector.broadcast %cst_87 : f32 to vector<16x128xf32>
    %152 = arith.addf %151, %150 : vector<16x128xf32>
    %153 = arith.divf %149, %152 : vector<16x128xf32>
    %154 = vector.extract_strided_slice %141 {offsets = [0, 128], sizes = [16, 128], strides = [1, 1]} : vector<16x256xf32> to vector<16x128xf32>
    %155 = arith.addf %153, %154 : vector<16x128xf32>
    %c3 = arith.constant 3 : index
    %c0_88 = arith.constant 0 : index
    %c0_89 = arith.constant 0 : index
    %c0_90 = arith.constant 0 : index
    %156 = vector.load %arg5[%c3, %c0_88, %c0_89, %c0_90] : memref<6x3x128x256xbf16, #tpu.memory_space<vmem>>, vector<1x1x128x256xbf16>
    %157 = vector.shape_cast %156 : vector<1x1x128x256xbf16> to vector<128x256xbf16>
    %158 = arith.truncf %71 : vector<16x128xf32> to vector<16x128xbf16>
    %cst_91 = arith.constant dense<0.000000e+00> : vector<16x256xf32>
    %159 = tpu.matmul %158, %157, %cst_91 {dimension_numbers = #tpu.dot_dimension_numbers<[1], [0], [0], [1], [0, 0, 1, 1], [], []>} : vector<16x128xbf16>, vector<128x256xbf16>, vector<16x256xf32> -> vector<16x256xf32>
    %c1_i32_92 = arith.constant 1 : i32
    %160 = tpu.dynamic_rotate %71 by %c1_i32_92 dim 0 : vector<16x128xf32>, i32 -> vector<16x128xf32>
    %161 = vector.broadcast %10 : vector<16x1xf32> to vector<16x128xf32>
    %162 = arith.mulf %160, %161 : vector<16x128xf32>
    %c3_93 = arith.constant 3 : index
    %c1_94 = arith.constant 1 : index
    %c0_95 = arith.constant 0 : index
    %c0_96 = arith.constant 0 : index
    %163 = vector.load %arg5[%c3_93, %c1_94, %c0_95, %c0_96] : memref<6x3x128x256xbf16, #tpu.memory_space<vmem>>, vector<1x1x128x256xbf16>
    %164 = vector.shape_cast %163 : vector<1x1x128x256xbf16> to vector<128x256xbf16>
    %165 = arith.truncf %162 : vector<16x128xf32> to vector<16x128xbf16>
    %cst_97 = arith.constant dense<0.000000e+00> : vector<16x256xf32>
    %166 = tpu.matmul %165, %164, %cst_97 {dimension_numbers = #tpu.dot_dimension_numbers<[1], [0], [0], [1], [0, 0, 1, 1], [], []>} : vector<16x128xbf16>, vector<128x256xbf16>, vector<16x256xf32> -> vector<16x256xf32>
    %167 = arith.addf %159, %166 : vector<16x256xf32>
    %c2_i32_98 = arith.constant 2 : i32
    %168 = tpu.dynamic_rotate %71 by %c2_i32_98 dim 0 : vector<16x128xf32>, i32 -> vector<16x128xf32>
    %169 = vector.broadcast %22 : vector<16x1xf32> to vector<16x128xf32>
    %170 = arith.mulf %168, %169 : vector<16x128xf32>
    %c3_99 = arith.constant 3 : index
    %c2_100 = arith.constant 2 : index
    %c0_101 = arith.constant 0 : index
    %c0_102 = arith.constant 0 : index
    %171 = vector.load %arg5[%c3_99, %c2_100, %c0_101, %c0_102] : memref<6x3x128x256xbf16, #tpu.memory_space<vmem>>, vector<1x1x128x256xbf16>
    %172 = vector.shape_cast %171 : vector<1x1x128x256xbf16> to vector<128x256xbf16>
    %173 = arith.truncf %170 : vector<16x128xf32> to vector<16x128xbf16>
    %cst_103 = arith.constant dense<0.000000e+00> : vector<16x256xf32>
    %174 = tpu.matmul %173, %172, %cst_103 {dimension_numbers = #tpu.dot_dimension_numbers<[1], [0], [0], [1], [0, 0, 1, 1], [], []>} : vector<16x128xbf16>, vector<128x256xbf16>, vector<16x256xf32> -> vector<16x256xf32>
    %175 = arith.addf %167, %174 : vector<16x256xf32>
    %c3_104 = arith.constant 3 : index
    %c0_105 = arith.constant 0 : index
    %c0_106 = arith.constant 0 : index
    %176 = vector.load %arg6[%c3_104, %c0_105, %c0_106] : memref<6x1x256xf32, #tpu.memory_space<vmem>>, vector<1x1x256xf32>
    %177 = vector.shape_cast %176 : vector<1x1x256xf32> to vector<1x256xf32>
    %178 = vector.broadcast %177 : vector<1x256xf32> to vector<16x256xf32>
    %179 = arith.addf %175, %178 : vector<16x256xf32>
    %180 = vector.extract_strided_slice %179 {offsets = [0, 0], sizes = [16, 128], strides = [1, 1]} : vector<16x256xf32> to vector<16x128xf32>
    %cst_107 = arith.constant -3.000000e+01 : f32
    %181 = vector.broadcast %cst_107 : f32 to vector<16x128xf32>
    %182 = arith.maximumf %180, %181 : vector<16x128xf32>
    %cst_108 = arith.constant 0.000000e+00 : f32
    %183 = vector.broadcast %cst_108 : f32 to vector<16x128xf32>
    %184 = arith.subf %183, %182 : vector<16x128xf32>
    %185 = math.exp %184 : vector<16x128xf32>
    %cst_109 = arith.constant 1.000000e+00 : f32
    %186 = vector.broadcast %cst_109 : f32 to vector<16x128xf32>
    %187 = arith.subf %186, %185 : vector<16x128xf32>
    %188 = arith.mulf %185, %185 : vector<16x128xf32>
    %cst_110 = arith.constant 1.000000e+00 : f32
    %189 = vector.broadcast %cst_110 : f32 to vector<16x128xf32>
    %190 = arith.addf %189, %188 : vector<16x128xf32>
    %191 = arith.divf %187, %190 : vector<16x128xf32>
    %192 = vector.extract_strided_slice %179 {offsets = [0, 128], sizes = [16, 128], strides = [1, 1]} : vector<16x256xf32> to vector<16x128xf32>
    %193 = arith.addf %191, %192 : vector<16x128xf32>
    %c4 = arith.constant 4 : index
    %c0_111 = arith.constant 0 : index
    %c0_112 = arith.constant 0 : index
    %c0_113 = arith.constant 0 : index
    %194 = vector.load %arg5[%c4, %c0_111, %c0_112, %c0_113] : memref<6x3x128x256xbf16, #tpu.memory_space<vmem>>, vector<1x1x128x256xbf16>
    %195 = vector.shape_cast %194 : vector<1x1x128x256xbf16> to vector<128x256xbf16>
    %196 = arith.truncf %113 : vector<16x128xf32> to vector<16x128xbf16>
    %cst_114 = arith.constant dense<0.000000e+00> : vector<16x256xf32>
    %197 = tpu.matmul %196, %195, %cst_114 {dimension_numbers = #tpu.dot_dimension_numbers<[1], [0], [0], [1], [0, 0, 1, 1], [], []>} : vector<16x128xbf16>, vector<128x256xbf16>, vector<16x256xf32> -> vector<16x256xf32>
    %c2_i32_115 = arith.constant 2 : i32
    %198 = tpu.dynamic_rotate %113 by %c2_i32_115 dim 0 : vector<16x128xf32>, i32 -> vector<16x128xf32>
    %199 = vector.broadcast %22 : vector<16x1xf32> to vector<16x128xf32>
    %200 = arith.mulf %198, %199 : vector<16x128xf32>
    %c4_116 = arith.constant 4 : index
    %c1_117 = arith.constant 1 : index
    %c0_118 = arith.constant 0 : index
    %c0_119 = arith.constant 0 : index
    %201 = vector.load %arg5[%c4_116, %c1_117, %c0_118, %c0_119] : memref<6x3x128x256xbf16, #tpu.memory_space<vmem>>, vector<1x1x128x256xbf16>
    %202 = vector.shape_cast %201 : vector<1x1x128x256xbf16> to vector<128x256xbf16>
    %203 = arith.truncf %200 : vector<16x128xf32> to vector<16x128xbf16>
    %cst_120 = arith.constant dense<0.000000e+00> : vector<16x256xf32>
    %204 = tpu.matmul %203, %202, %cst_120 {dimension_numbers = #tpu.dot_dimension_numbers<[1], [0], [0], [1], [0, 0, 1, 1], [], []>} : vector<16x128xbf16>, vector<128x256xbf16>, vector<16x256xf32> -> vector<16x256xf32>
    %205 = arith.addf %197, %204 : vector<16x256xf32>
    %c4_i32_121 = arith.constant 4 : i32
    %206 = tpu.dynamic_rotate %113 by %c4_i32_121 dim 0 : vector<16x128xf32>, i32 -> vector<16x128xf32>
    %207 = vector.broadcast %87 : vector<16x1xf32> to vector<16x128xf32>
    %208 = arith.mulf %206, %207 : vector<16x128xf32>
    %c4_122 = arith.constant 4 : index
    %c2_123 = arith.constant 2 : index
    %c0_124 = arith.constant 0 : index
    %c0_125 = arith.constant 0 : index
    %209 = vector.load %arg5[%c4_122, %c2_123, %c0_124, %c0_125] : memref<6x3x128x256xbf16, #tpu.memory_space<vmem>>, vector<1x1x128x256xbf16>
    %210 = vector.shape_cast %209 : vector<1x1x128x256xbf16> to vector<128x256xbf16>
    %211 = arith.truncf %208 : vector<16x128xf32> to vector<16x128xbf16>
    %cst_126 = arith.constant dense<0.000000e+00> : vector<16x256xf32>
    %212 = tpu.matmul %211, %210, %cst_126 {dimension_numbers = #tpu.dot_dimension_numbers<[1], [0], [0], [1], [0, 0, 1, 1], [], []>} : vector<16x128xbf16>, vector<128x256xbf16>, vector<16x256xf32> -> vector<16x256xf32>
    %213 = arith.addf %205, %212 : vector<16x256xf32>
    %c4_127 = arith.constant 4 : index
    %c0_128 = arith.constant 0 : index
    %c0_129 = arith.constant 0 : index
    %214 = vector.load %arg6[%c4_127, %c0_128, %c0_129] : memref<6x1x256xf32, #tpu.memory_space<vmem>>, vector<1x1x256xf32>
    %215 = vector.shape_cast %214 : vector<1x1x256xf32> to vector<1x256xf32>
    %216 = vector.broadcast %215 : vector<1x256xf32> to vector<16x256xf32>
    %217 = arith.addf %213, %216 : vector<16x256xf32>
    %218 = vector.extract_strided_slice %217 {offsets = [0, 0], sizes = [16, 128], strides = [1, 1]} : vector<16x256xf32> to vector<16x128xf32>
    %cst_130 = arith.constant -3.000000e+01 : f32
    %219 = vector.broadcast %cst_130 : f32 to vector<16x128xf32>
    %220 = arith.maximumf %218, %219 : vector<16x128xf32>
    %cst_131 = arith.constant 0.000000e+00 : f32
    %221 = vector.broadcast %cst_131 : f32 to vector<16x128xf32>
    %222 = arith.subf %221, %220 : vector<16x128xf32>
    %223 = math.exp %222 : vector<16x128xf32>
    %cst_132 = arith.constant 1.000000e+00 : f32
    %224 = vector.broadcast %cst_132 : f32 to vector<16x128xf32>
    %225 = arith.subf %224, %223 : vector<16x128xf32>
    %226 = arith.mulf %223, %223 : vector<16x128xf32>
    %cst_133 = arith.constant 1.000000e+00 : f32
    %227 = vector.broadcast %cst_133 : f32 to vector<16x128xf32>
    %228 = arith.addf %227, %226 : vector<16x128xf32>
    %229 = arith.divf %225, %228 : vector<16x128xf32>
    %230 = vector.extract_strided_slice %217 {offsets = [0, 128], sizes = [16, 128], strides = [1, 1]} : vector<16x256xf32> to vector<16x128xf32>
    %231 = arith.addf %229, %230 : vector<16x128xf32>
    %c5 = arith.constant 5 : index
    %c0_134 = arith.constant 0 : index
    %c0_135 = arith.constant 0 : index
    %c0_136 = arith.constant 0 : index
    %232 = vector.load %arg5[%c5, %c0_134, %c0_135, %c0_136] : memref<6x3x128x256xbf16, #tpu.memory_space<vmem>>, vector<1x1x128x256xbf16>
    %233 = vector.shape_cast %232 : vector<1x1x128x256xbf16> to vector<128x256xbf16>
    %234 = arith.truncf %155 : vector<16x128xf32> to vector<16x128xbf16>
    %cst_137 = arith.constant dense<0.000000e+00> : vector<16x256xf32>
    %235 = tpu.matmul %234, %233, %cst_137 {dimension_numbers = #tpu.dot_dimension_numbers<[1], [0], [0], [1], [0, 0, 1, 1], [], []>} : vector<16x128xbf16>, vector<128x256xbf16>, vector<16x256xf32> -> vector<16x256xf32>
    %c4_i32_138 = arith.constant 4 : i32
    %236 = tpu.dynamic_rotate %155 by %c4_i32_138 dim 0 : vector<16x128xf32>, i32 -> vector<16x128xf32>
    %237 = vector.broadcast %87 : vector<16x1xf32> to vector<16x128xf32>
    %238 = arith.mulf %236, %237 : vector<16x128xf32>
    %c5_139 = arith.constant 5 : index
    %c1_140 = arith.constant 1 : index
    %c0_141 = arith.constant 0 : index
    %c0_142 = arith.constant 0 : index
    %239 = vector.load %arg5[%c5_139, %c1_140, %c0_141, %c0_142] : memref<6x3x128x256xbf16, #tpu.memory_space<vmem>>, vector<1x1x128x256xbf16>
    %240 = vector.shape_cast %239 : vector<1x1x128x256xbf16> to vector<128x256xbf16>
    %241 = arith.truncf %238 : vector<16x128xf32> to vector<16x128xbf16>
    %cst_143 = arith.constant dense<0.000000e+00> : vector<16x256xf32>
    %242 = tpu.matmul %241, %240, %cst_143 {dimension_numbers = #tpu.dot_dimension_numbers<[1], [0], [0], [1], [0, 0, 1, 1], [], []>} : vector<16x128xbf16>, vector<128x256xbf16>, vector<16x256xf32> -> vector<16x256xf32>
    %243 = arith.addf %235, %242 : vector<16x256xf32>
    %c8_i32_144 = arith.constant 8 : i32
    %244 = tpu.dynamic_rotate %155 by %c8_i32_144 dim 0 : vector<16x128xf32>, i32 -> vector<16x128xf32>
    %245 = vector.broadcast %129 : vector<16x1xf32> to vector<16x128xf32>
    %246 = arith.mulf %244, %245 : vector<16x128xf32>
    %c5_145 = arith.constant 5 : index
    %c2_146 = arith.constant 2 : index
    %c0_147 = arith.constant 0 : index
    %c0_148 = arith.constant 0 : index
    %247 = vector.load %arg5[%c5_145, %c2_146, %c0_147, %c0_148] : memref<6x3x128x256xbf16, #tpu.memory_space<vmem>>, vector<1x1x128x256xbf16>
    %248 = vector.shape_cast %247 : vector<1x1x128x256xbf16> to vector<128x256xbf16>
    %249 = arith.truncf %246 : vector<16x128xf32> to vector<16x128xbf16>
    %cst_149 = arith.constant dense<0.000000e+00> : vector<16x256xf32>
    %250 = tpu.matmul %249, %248, %cst_149 {dimension_numbers = #tpu.dot_dimension_numbers<[1], [0], [0], [1], [0, 0, 1, 1], [], []>} : vector<16x128xbf16>, vector<128x256xbf16>, vector<16x256xf32> -> vector<16x256xf32>
    %251 = arith.addf %243, %250 : vector<16x256xf32>
    %c5_150 = arith.constant 5 : index
    %c0_151 = arith.constant 0 : index
    %c0_152 = arith.constant 0 : index
    %252 = vector.load %arg6[%c5_150, %c0_151, %c0_152] : memref<6x1x256xf32, #tpu.memory_space<vmem>>, vector<1x1x256xf32>
    %253 = vector.shape_cast %252 : vector<1x1x256xf32> to vector<1x256xf32>
    %254 = vector.broadcast %253 : vector<1x256xf32> to vector<16x256xf32>
    %255 = arith.addf %251, %254 : vector<16x256xf32>
    %256 = vector.extract_strided_slice %255 {offsets = [0, 0], sizes = [16, 128], strides = [1, 1]} : vector<16x256xf32> to vector<16x128xf32>
    %cst_153 = arith.constant -3.000000e+01 : f32
    %257 = vector.broadcast %cst_153 : f32 to vector<16x128xf32>
    %258 = arith.maximumf %256, %257 : vector<16x128xf32>
    %cst_154 = arith.constant 0.000000e+00 : f32
    %259 = vector.broadcast %cst_154 : f32 to vector<16x128xf32>
    %260 = arith.subf %259, %258 : vector<16x128xf32>
    %261 = math.exp %260 : vector<16x128xf32>
    %cst_155 = arith.constant 1.000000e+00 : f32
    %262 = vector.broadcast %cst_155 : f32 to vector<16x128xf32>
    %263 = arith.subf %262, %261 : vector<16x128xf32>
    %264 = arith.mulf %261, %261 : vector<16x128xf32>
    %cst_156 = arith.constant 1.000000e+00 : f32
    %265 = vector.broadcast %cst_156 : f32 to vector<16x128xf32>
    %266 = arith.addf %265, %264 : vector<16x128xf32>
    %267 = arith.divf %263, %266 : vector<16x128xf32>
    %268 = vector.extract_strided_slice %255 {offsets = [0, 128], sizes = [16, 128], strides = [1, 1]} : vector<16x256xf32> to vector<16x128xf32>
    %269 = arith.addf %267, %268 : vector<16x128xf32>
    %c0_157 = arith.constant 0 : index
    %c0_158 = arith.constant 0 : index
    %270 = vector.load %arg8[%c0_157, %c0_158] : memref<1x128xf32, #tpu.memory_space<vmem>>, vector<1x128xf32>
    %c0_159 = arith.constant 0 : index
    %c0_160 = arith.constant 0 : index
    %c0_161 = arith.constant 0 : index
    %271 = vector.load %arg7[%c0_159, %c0_160, %c0_161] : memref<3x128x128xbf16, #tpu.memory_space<vmem>>, vector<1x128x128xbf16>
    %272 = vector.shape_cast %271 : vector<1x128x128xbf16> to vector<128x128xbf16>
    %273 = arith.truncf %193 : vector<16x128xf32> to vector<16x128xbf16>
    %cst_162 = arith.constant dense<0.000000e+00> : vector<16x128xf32>
    %274 = tpu.matmul %273, %272, %cst_162 {dimension_numbers = #tpu.dot_dimension_numbers<[1], [0], [0], [1], [0, 0, 1, 1], [], []>} : vector<16x128xbf16>, vector<128x128xbf16>, vector<16x128xf32> -> vector<16x128xf32>
    %275 = vector.broadcast %270 : vector<1x128xf32> to vector<16x128xf32>
    %276 = arith.addf %275, %274 : vector<16x128xf32>
    %c1_163 = arith.constant 1 : index
    %c0_164 = arith.constant 0 : index
    %c0_165 = arith.constant 0 : index
    %277 = vector.load %arg7[%c1_163, %c0_164, %c0_165] : memref<3x128x128xbf16, #tpu.memory_space<vmem>>, vector<1x128x128xbf16>
    %278 = vector.shape_cast %277 : vector<1x128x128xbf16> to vector<128x128xbf16>
    %279 = arith.truncf %231 : vector<16x128xf32> to vector<16x128xbf16>
    %cst_166 = arith.constant dense<0.000000e+00> : vector<16x128xf32>
    %280 = tpu.matmul %279, %278, %cst_166 {dimension_numbers = #tpu.dot_dimension_numbers<[1], [0], [0], [1], [0, 0, 1, 1], [], []>} : vector<16x128xbf16>, vector<128x128xbf16>, vector<16x128xf32> -> vector<16x128xf32>
    %281 = arith.addf %276, %280 : vector<16x128xf32>
    %c2_167 = arith.constant 2 : index
    %c0_168 = arith.constant 0 : index
    %c0_169 = arith.constant 0 : index
    %282 = vector.load %arg7[%c2_167, %c0_168, %c0_169] : memref<3x128x128xbf16, #tpu.memory_space<vmem>>, vector<1x128x128xbf16>
    %283 = vector.shape_cast %282 : vector<1x128x128xbf16> to vector<128x128xbf16>
    %284 = arith.truncf %269 : vector<16x128xf32> to vector<16x128xbf16>
    %cst_170 = arith.constant dense<0.000000e+00> : vector<16x128xf32>
    %285 = tpu.matmul %284, %283, %cst_170 {dimension_numbers = #tpu.dot_dimension_numbers<[1], [0], [0], [1], [0, 0, 1, 1], [], []>} : vector<16x128xbf16>, vector<128x128xbf16>, vector<16x128xf32> -> vector<16x128xf32>
    %286 = arith.addf %281, %285 : vector<16x128xf32>
    %c0_171 = arith.constant 0 : index
    %c0_172 = arith.constant 0 : index
    %287 = vector.load %arg9[%c0_171, %c0_172] : memref<16x128xf32, #tpu.memory_space<vmem>>, vector<16x128xf32>
    tpu.vector_store %arg9[%c0_171, %c0_172], %286 {strides = array<i32>} : memref<16x128xf32, #tpu.memory_space<vmem>>, vector<16x128xf32>,
    return
  }
  func.func @transform_0(%arg0: i32) -> (i32, i32) {
    %c0_i32 = arith.constant 0 : i32
    %c0_i32_0 = arith.constant 0 : i32
    %c0_i32_1 = arith.constant 0 : i32
    return %c0_i32, %c0_i32_0 : i32, i32
  }
  func.func @transform_1(%arg0: i32) -> (i32, i32) {
    %c0_i32 = arith.constant 0 : i32
    %c0_i32_0 = arith.constant 0 : i32
    return %arg0, %c0_i32 : i32, i32
  }
  func.func @transform_2(%arg0: i32) -> (i32, i32, i32) {
    %c0_i32 = arith.constant 0 : i32
    %c0_i32_0 = arith.constant 0 : i32
    %c0_i32_1 = arith.constant 0 : i32
    %c0_i32_2 = arith.constant 0 : i32
    return %c0_i32, %c0_i32_0, %c0_i32_1 : i32, i32, i32
  }
  func.func @transform_3(%arg0: i32) -> (i32, i32) {
    %c0_i32 = arith.constant 0 : i32
    %c0_i32_0 = arith.constant 0 : i32
    %c0_i32_1 = arith.constant 0 : i32
    return %c0_i32, %c0_i32_0 : i32, i32
  }
  func.func @transform_4(%arg0: i32) -> (i32, i32, i32, i32) {
    %c0_i32 = arith.constant 0 : i32
    %c0_i32_0 = arith.constant 0 : i32
    %c0_i32_1 = arith.constant 0 : i32
    %c0_i32_2 = arith.constant 0 : i32
    %c0_i32_3 = arith.constant 0 : i32
    return %c0_i32, %c0_i32_0, %c0_i32_1, %c0_i32_2 : i32, i32, i32, i32
  }
  func.func @transform_5(%arg0: i32) -> (i32, i32, i32) {
    %c0_i32 = arith.constant 0 : i32
    %c0_i32_0 = arith.constant 0 : i32
    %c0_i32_1 = arith.constant 0 : i32
    %c0_i32_2 = arith.constant 0 : i32
    return %c0_i32, %c0_i32_0, %c0_i32_1 : i32, i32, i32
  }
  func.func @transform_6(%arg0: i32) -> (i32, i32, i32) {
    %c0_i32 = arith.constant 0 : i32
    %c0_i32_0 = arith.constant 0 : i32
    %c0_i32_1 = arith.constant 0 : i32
    %c0_i32_2 = arith.constant 0 : i32
    return %c0_i32, %c0_i32_0, %c0_i32_1 : i32, i32, i32
  }
  func.func @transform_7(%arg0: i32) -> (i32, i32) {
    %c0_i32 = arith.constant 0 : i32
    %c0_i32_0 = arith.constant 0 : i32
    %c0_i32_1 = arith.constant 0 : i32
    return %c0_i32, %c0_i32_0 : i32, i32
  }
  func.func @transform_8(%arg0: i32) -> (i32, i32) {
    %c0_i32 = arith.constant 0 : i32
    %c0_i32_0 = arith.constant 0 : i32
    return %arg0, %c0_i32 : i32, i32
  }
}

</mosaic_0001>

<bundles_post_ra>
// kernel: tpu_custom_call.1
= control target key start
LH: loop header
LB: loop body
LE: loop exit
PB: predicated region body
PF: predicated region fallthrough
CT: control target
= control target key end

     0   :  { %s6386_s0 = inlined_call_operand.vmem [shape: s32[16,1], index: 0, kind: input, shape index: {}]   ;;  %s6387_s1 = inlined_call_operand.hbm [shape: bf16[32,128], index: 1, kind: input, shape index: {}]   ;;  %s6388_s2 = inlined_call_operand.hbm [shape: bf16[3,128,128], index: 2, kind: input, shape index: {}]   ;;  %s6389_s3 = inlined_call_operand.hbm [shape: f32[1,128], index: 3, kind: input, shape index: {}]   ;;  %s6390_s4 = inlined_call_operand.hbm [shape: bf16[6,3,128,256], index: 4, kind: input, shape index: {}]   ;;  %s6391_s5 = inlined_call_operand.hbm [shape: f32[6,1,256], index: 5, kind: input, shape index: {}]   ;;  %s6392_s6 = inlined_call_operand.hbm [shape: bf16[3,128,128], index: 6, kind: input, shape index: {}]   ;;  %s6393_s7 = inlined_call_operand.hbm [shape: f32[1,128], index: 7, kind: input, shape index: {}]   ;;  %s6394_s8 = inlined_call_operand.hbm [shape: f32[32,128], index: 8, kind: output, shape index: {}]  }
   0x1   :  { %6401 = sst [smem:[#allocation20_spill]] %s6388_s2 }
   0x2   :  { %13 = vsyncpa [#allocation3], 0 }
   0x3   :  { %15 = vsyncpa [#allocation3 + $0x1], 0 }
   0x4   :  { %16 = vsyncpa [#allocation6], 0 }
   0x5   :  { %17 = vsyncpa [#allocation9], 0 }
   0x6   :  { %18 = vsyncpa [#allocation12], 0 }
   0x7   :  { %19 = vsyncpa [#allocation4], 0 }
   0x8   :  { %21 = vsyncpa [#allocation4 + $0x1], 0  ;;  %s5761_s27 = smov 0   ;;  %s5763_s28 = smov 0  }
   0x9   :  { %s5765_s29 = smov 0   ;;  %s5767_s30 = smov 0  }
   0xa LB: > { %s5697_s9 = smov [#allocation5]   ;;  %s5782_s11 = sadd.s32 4294967295, %s5695_s30   ;;  %s5695_s30 = sphi %s5767_s30, %s6427_s30   ;;  %s5691_s29 = sphi %s5765_s29, %s6426_s29   ;;  %s5687_s28 = sphi %s5763_s28, %s6425_s28   ;;  %s5683_s27 = sphi %s5761_s27, %s6424_s27  }
   0xb   : > { %s246_s10 = sshll.u32 %s5697_s9, 4  ;;  %p4143_p0 = scmp.ge.s32.totalorder %s5695_s30, 1  ;;  %s5787_s10 = int_to_ptr.vmem [resolvable:$true] %s246_s10 }
   0xc   : > { %p6397_p1 = scmp.eq.s32.totalorder %s5782_s11, 0  ;;  %p231_p2 = scmp.lt.s32.totalorder %s5695_s30, 3 }
   0xd   : > { %s5698_s13 = smov [#allocation8]   ;;  %s5699_s16 = smov [#allocation11]  }
   0xe   : > { %p5789_p3 = pnand %p4143_p0, %p231_p2  ;;  %s270_s14 = sshll.u32 %s5698_s13, 4  ;;  %s5802_s14 = int_to_ptr.vmem [resolvable:$true] %s270_s14 }
   0xf   : > { %s5804_s17 = sshll.u32 %s5699_s16, 4  ;;  %s6404_s2 = sld [smem:[#allocation20_spill]]  ;;  %s297_s17 = int_to_ptr.vmem [resolvable:$true] %s5804_s17 }
  0x10   : > { %s6402_s12 = scalar_select %p5789_p3, 1, 0 }
  0x11   : > { %p4777_p5 = pneg %p5789_p3 }
  0x13   : > { %p5798_p6 = pnand %p4777_p5, %p6397_p1 }
  0x15   : > { %s5419_s20 = scalar_lea.hbm %s6404_s2, 3072  ;;  %p5814_p8 = pneg %p5798_p6 }
  0x16   : > { %p5420_p7 = scmp.ne.s32.totalorder %s6404_s2, %s5419_s20  ;;  %p5426_p11 = scmp.lt.u32.totalorder %s5419_s20, %s6404_s2 }
  0x18   : > { %p5422_p9 = pnand %p5814_p8, %p5420_p7 }
  0x1a   : > { %p5423_p10 = pneg %p5422_p9 }
  0x1c   : > { %p5428_p12 = pnand %p5426_p11, %p5423_p10 }
  0x1e   : > { %5431 = shalt.err (!%p5428_p12)
}
  0x1f   : > { %s5432_s26 = scalar_lea.vmem %s5787_s10, 3072  ;;  %p5440_p5 = scmp.lt.s32.totalorder %s5787_s10, %s5787_s10 }
  0x20   : > { %p5433_p13 = scmp.ne.s32.totalorder %s5787_s10, %s5432_s26  ;;  %p5441_p4 = scmp.lt.s32.totalorder %s5432_s26, %s5432_s26 }
  0x22   : > { %p5435_p0 = pnand %p5433_p13, %p5814_p8  ;;  %p5442_p7 = por %p5441_p4, %p5440_p5 }
  0x24   : > { %p5436_p2 = pneg %p5435_p0 }
  0x26   : > { %p5443_p9 = pnand %p5442_p7, %p5436_p2 }
  0x28   : > { %5446 = shalt.err (!%p5443_p9)
}
  0x29   : > { %s6395_s9 = smov 64   ;;  %s6399_s13 = smov 4  }
  0x2a   : > { %4780 = dma.hbm_to_vmem [thread:$0]  (!%p5798_p6), %s6404_s2, 3072, %s5787_s10, [#allocation6], %s6395_s9, %s6395_s9, %s6399_s13  }
  0x2b   : > { %s5447_s21 = scalar_lea.hbm %s6390_s4, 36864 }
  0x2c   : > { %p5448_p4 = scmp.ne.s32.totalorder %s6390_s4, %s5447_s21  ;;  %p5454_p12 = scmp.lt.u32.totalorder %s5447_s21, %s6390_s4 }
  0x2e   : > { %p5450_p10 = pnand %p5448_p4, %p5814_p8 }
  0x30   : > { %p5451_p11 = pneg %p5450_p10 }
  0x32   : > { %p5456_p13 = pnand %p5454_p12, %p5451_p11 }
  0x34   : > { %5459 = shalt.err (!%p5456_p13)
}
  0x35   : > { %s5460_s10 = scalar_lea.vmem %s5802_s14, 36864  ;;  %p5468_p7 = scmp.lt.s32.totalorder %s5802_s14, %s5802_s14 }
  0x36   : > { %p5461_p0 = scmp.ne.s32.totalorder %s5802_s14, %s5460_s10  ;;  %p5469_p9 = scmp.lt.s32.totalorder %s5460_s10, %s5460_s10 }
  0x38   : > { %p5463_p2 = pnand %p5461_p0, %p5814_p8  ;;  %p5470_p4 = por %p5469_p9, %p5468_p7 }
  0x3a   : > { %p5464_p5 = pneg %p5463_p2 }
  0x3c   : > { %p5471_p10 = pnand %p5470_p4, %p5464_p5 }
  0x3e   : > { %5474 = shalt.err (!%p5471_p10)
}
  0x3f   : > { %s5702_s16 = smov 128   ;;  %s5703_s18 = smov 8  }
  0x40   : > { %4786 = dma.hbm_to_vmem [thread:$0]  (!%p5798_p6), %s6390_s4, 36864, %s5802_s14, [#allocation9], %s5702_s16, %s5702_s16, %s5703_s18  }
  0x41   : > { %s5475_s24 = scalar_lea.hbm %s6392_s6, 3072 }
  0x42   : > { %p5476_p11 = scmp.ne.s32.totalorder %s6392_s6, %s5475_s24  ;;  %p5482_p0 = scmp.lt.u32.totalorder %s5475_s24, %s6392_s6 }
  0x44   : > { %p5478_p12 = pnand %p5476_p11, %p5814_p8 }
  0x46   : > { %p5479_p13 = pneg %p5478_p12 }
  0x48   : > { %p5484_p2 = pnand %p5482_p0, %p5479_p13 }
  0x4a   : > { %5487 = shalt.err (!%p5484_p2)
}
  0x4b   : > { %s5488_s19 = scalar_lea.vmem %s297_s17, 3072  ;;  %p5496_p4 = scmp.lt.s32.totalorder %s297_s17, %s297_s17 }
  0x4c   : > { %p5489_p5 = scmp.ne.s32.totalorder %s297_s17, %s5488_s19  ;;  %p5497_p10 = scmp.lt.s32.totalorder %s5488_s19, %s5488_s19 }
  0x4e   : > { %p5491_p7 = pnand %p5489_p5, %p5814_p8  ;;  %p5498_p1 = por %p5497_p10, %p5496_p4 }
  0x50   : > { %p5492_p9 = pneg %p5491_p7 }
  0x52   : > { %p5499_p3 = pnand %p5498_p1, %p5492_p9 }
  0x54   : > { %5502 = shalt.err (!%p5499_p3)
}
  0x55   : > { %s6406_s14 = smov 64   ;;  %s5704_s18 = smov [#allocation7]  }
  0x56   : > { %4792 = dma.hbm_to_vmem [thread:$0]  (!%p5798_p6), %s6392_s6, 3072, %s297_s17, [#allocation12], %s6406_s14, %s6406_s14, %s6399_s13  }
  0x57   : > { %s260_s20 = sshll.u32 %s5704_s18, 4  ;;  %s5705_s21 = smov [#allocation10]   ;;  %s261_s20 = int_to_ptr.vmem [resolvable:$true] %s260_s20 }
  0x58   : > { %s283_s22 = sshll.u32 %s5705_s21, 4  ;;  %s5503_s26 = scalar_lea.hbm %s6389_s3, 16  ;;  %s284_s22 = int_to_ptr.vmem [resolvable:$true] %s283_s22 }
  0x59   : > { %p5504_p1 = scmp.ne.s32.totalorder %s6389_s3, %s5503_s26  ;;  %p5510_p12 = scmp.lt.u32.totalorder %s5503_s26, %s6389_s3 }
  0x5b   : > { %p5506_p3 = pnand %p5504_p1, %p5814_p8 }
  0x5d   : > { %p5507_p11 = pneg %p5506_p3 }
  0x5f   : > { %p5512_p13 = pnand %p5510_p12, %p5507_p11 }
  0x61   : > { %5515 = shalt.err (!%p5512_p13)
}
  0x62   : > { %s5516_s17 = scalar_lea.vmem %s261_s20, 16  ;;  %s5523_s16 = scalar_lea.vmem %s261_s20, 32 }
  0x63   : > { %p5517_p0 = scmp.ne.s32.totalorder %s261_s20, %s5516_s17  ;;  %p5524_p7 = scmp.lt.s32.totalorder %s261_s20, %s261_s20 }
  0x64   : > { %p5525_p9 = scmp.lt.s32.totalorder %s5523_s16, %s5516_s17 }
  0x65   : > { %p5519_p2 = pnand %p5517_p0, %p5814_p8 }
  0x66   : > { %p5526_p4 = por %p5525_p9, %p5524_p7 }
  0x67   : > { %p5520_p5 = pneg %p5519_p2 }
  0x69   : > { %p5527_p10 = pnand %p5526_p4, %p5520_p5 }
  0x6b   : > { %5530 = shalt.err (!%p5527_p10)
}
  0x6c   : > { %4783 = dma.hbm_to_vmem [thread:$0]  (!%p5798_p6), %s6389_s3, 16, %s261_s20, [#allocation6]  }
  0x6d   : > { %s5531_s25 = scalar_lea.hbm %s6391_s5, 192 }
  0x6e   : > { %p5532_p1 = scmp.ne.s32.totalorder %s6391_s5, %s5531_s25  ;;  %p5538_p12 = scmp.lt.u32.totalorder %s5531_s25, %s6391_s5 }
  0x70   : > { %p5534_p3 = pnand %p5532_p1, %p5814_p8 }
  0x72   : > { %p5535_p11 = pneg %p5534_p3 }
  0x74   : > { %p5540_p13 = pnand %p5538_p12, %p5535_p11 }
  0x76   : > { %5543 = shalt.err (!%p5540_p13)
}
  0x77   : > { %s5544_s17 = scalar_lea.vmem %s284_s22, 192  ;;  %p5552_p7 = scmp.lt.s32.totalorder %s284_s22, %s284_s22 }
  0x78   : > { %p5545_p0 = scmp.ne.s32.totalorder %s284_s22, %s5544_s17  ;;  %p5553_p9 = scmp.lt.s32.totalorder %s5544_s17, %s5544_s17 }
  0x7a   : > { %p5547_p2 = pnand %p5545_p0, %p5814_p8  ;;  %p5554_p4 = por %p5553_p9, %p5552_p7 }
  0x7c   : > { %p5548_p5 = pneg %p5547_p2 }
  0x7e   : > { %p5555_p10 = pnand %p5554_p4, %p5548_p5 }
  0x80   : > { %5558 = shalt.err (!%p5555_p10)
}
  0x81   : > { %s5706_s20 = smov 32   ;;  %s5707_s16 = smov 2  }
  0x82   : > { %4789 = dma.hbm_to_vmem [thread:$0]  (!%p5798_p6), %s6391_s5, 192, %s284_s22, [#allocation9], %s5706_s20, %s5706_s20, %s5707_s16  }
  0x83   : > { %s5708_s2 = smov [#allocation13]   ;;  %s5559_s10 = scalar_lea.hbm %s6393_s7, 16 }
  0x84   : > { %s310_s24 = sshll.u32 %s5708_s2, 4  ;;  %p5560_p1 = scmp.ne.s32.totalorder %s6393_s7, %s5559_s10  ;;  %s311_s24 = int_to_ptr.vmem [resolvable:$true] %s310_s24 }
  0x85   : > { %p5566_p12 = scmp.lt.u32.totalorder %s5559_s10, %s6393_s7 }
  0x86   : > { %p5562_p3 = pnand %p5560_p1, %p5814_p8 }
  0x88   : > { %p5563_p11 = pneg %p5562_p3 }
  0x8a   : > { %p5568_p13 = pnand %p5566_p12, %p5563_p11 }
  0x8c   : > { %5571 = shalt.err (!%p5568_p13)
}
  0x8d   : > { %s5572_s22 = scalar_lea.vmem %s311_s24, 16  ;;  %s5579_s20 = scalar_lea.vmem %s311_s24, 32 }
  0x8e   : > { %p5573_p0 = scmp.ne.s32.totalorder %s311_s24, %s5572_s22  ;;  %p5580_p7 = scmp.lt.s32.totalorder %s311_s24, %s311_s24 }
  0x8f   : > { %p5581_p9 = scmp.lt.s32.totalorder %s5579_s20, %s5572_s22 }
  0x90   : > { %p5575_p2 = pnand %p5573_p0, %p5814_p8 }
  0x91   : > { %p5582_p4 = por %p5581_p9, %p5580_p7 }
  0x92   : > { %p5576_p5 = pneg %p5575_p2 }
  0x94   : > { %p5583_p10 = pnand %p5582_p4, %p5576_p5 }
  0x96   : > { %5586 = shalt.err (!%p5583_p10)
}
  0x97   : > { %4795 = dma.hbm_to_vmem [thread:$0]  (!%p5798_p6), %s6393_s7, 16, %s311_s24, [#allocation12]  }
  0x98   : > { %s4142_s23 = sadd.s32 4294967294, %s5695_s30   ;;  %s5939_s15 = sadd.s32 1, %s5695_s30  }
  0x99   : > { %s52_s13 = ssub.s32 %s5695_s30, %s5939_s15  ;;  %s55_s21 = sadd.s32 1, %s5691_s29 }
  0x9a   : > { %p53_p8 = scmp.eq.s32.totalorder %s52_s13, 0  ;;  %p62_p1 = scmp.ne.s32.totalorder %s5691_s29, %s5687_s28 }
  0x9b   : > { %p63_p3 = scmp.eq.s32.totalorder %s5695_s30, 0  ;;  %p68_p11 = scmp.ne.s32.totalorder %s5687_s28, %s5683_s27 }
  0x9c   : > { %s5950_s2 = scalar_select %p53_p8, %s5691_s29, %s55_s21  }
  0x9d   : > { %p5952_p12 = por %p63_p3, %p62_p1  ;;  %p6408_p13 = scmp.eq.s32.totalorder %s5782_s11, 0 }
  0x9e   : > { %p218_p0 = scmp.eq.s32.totalorder %s5782_s11, 1  ;;  %p224_p2 = scmp.eq.s32.totalorder %s4142_s23, 1 }
  0x9f   : > { %p5958_p6 = por %p6408_p13, %p68_p11  ;;  %p4810_p5 = scmp.lt.s32.totalorder %s5695_s30, 2 }
  0xa0   : > { %s321_s26 = sand.u32 1, %s5691_s29   ;;  %p5965_p7 = por %p218_p0, %p62_p1 }
  0xa1   : > { %p5969_p9 = por %p224_p2, %p68_p11  ;;  %s4151_s9 = sshll.u32 %s321_s26, 3 }
  0xa2   : > { %s6410_s10 = scalar_select %p5965_p7, 1, 0 }
  0xa3   : > { %s6411_s19 = scalar_select %p5969_p9, 1, 0 }
  0xa4   : > { %s4515_s17 = sshll.u32 %s5695_s30, 7  ;;  %s325_s18 = scalar_lea.vmem [#allocation2], %s4151_s9 }
  0xa5   : > { %s5977_s16 = scalar_lea.hbm %s6387_s1, %s4515_s17  ;;  %s332_s23 = sshll.u32 %s325_s18, 4  ;;  %s5979_s23 = int_to_ptr.vmem [resolvable:$true] %s332_s23 }
  0xa6   : > { %p5983_p4 = pnand %p4810_p5, %p5952_p12  ;;  %s5987_s21 = scalar_lea.sflag [#allocation3], %s321_s26 }
  0xa7   : > { %s5587_s22 = scalar_lea.hbm %s5977_s16, 128  ;;  %s5592_s25 = scalar_lea.hbm %s6387_s1, 256 }
  0xa8   : > { %p5588_p10 = scmp.ne.s32.totalorder %s5977_s16, %s5587_s22  ;;  %p5589_p8 = pneg %p5983_p4 }
  0xa9   : > { %p5593_p11 = scmp.lt.u32.totalorder %s5977_s16, %s6387_s1  ;;  %p5594_p12 = scmp.lt.u32.totalorder %s5592_s25, %s5587_s22 }
  0xaa   : > { %p5590_p1 = pnand %p5589_p8, %p5588_p10  ;;  %p5596_p0 = scmp.lt.u32.totalorder %s5587_s22, %s5977_s16 }
  0xab   : > { %p5595_p13 = por %p5594_p12, %p5593_p11 }
  0xac   : > { %p5591_p3 = pneg %p5590_p1 }
  0xad   : > { %p5597_p2 = por %p5596_p0, %p5595_p13 }
  0xaf   : > { %p5598_p5 = pnand %p5597_p2, %p5591_p3 }
  0xb1   : > { %5601 = shalt.err (!%p5598_p5)
}
  0xb2   : > { %s5602_s26 = scalar_lea.vmem %s5979_s23, 128  ;;  %s5709_s9 = smov [#allocation2]  }
  0xb3   : > { %p5603_p10 = scmp.ne.s32.totalorder %s5979_s23, %s5602_s26  ;;  %s5607_s17 = sshll.u32 %s5709_s9, 4  ;;  %s5608_s17 = int_to_ptr.vmem [resolvable:$false] %s5607_s17 }
  0xb4   : > { %s5609_s20 = scalar_lea.vmem %s5608_s17, 256  ;;  %p5610_p7 = scmp.lt.s32.totalorder %s5979_s23, %s5608_s17 }
  0xb5   : > { %p5605_p1 = pnand %p5603_p10, %p5589_p8  ;;  %p5611_p11 = scmp.lt.s32.totalorder %s5609_s20, %s5602_s26 }
  0xb7   : > { %p5606_p9 = pneg %p5605_p1  ;;  %p5612_p12 = por %p5611_p11, %p5610_p7 }
  0xb9   : > { %p5613_p13 = pnand %p5612_p12, %p5606_p9 }
  0xbb   : > { %5616 = shalt.err (!%p5613_p13)
}
  0xbc   : > { %s6413_s22 = smov 4   ;;  %p6414_p8 = scmp.ne.s32.totalorder %s6402_s12, 0 }
  0xbd   : > { %4799 = dma.hbm_to_vmem [thread:$0]  (!%p5983_p4), %s5977_s16, 128, %s5979_s23, %s5987_s21, %s6406_s14, %s6406_s14, %s6413_s22  }
  0xbe   : > { %344 = sbr.rel (%p6414_p8) target bundleno = 1604 (0x644), region = 52  ;;  %s6021_s25 = sand.u32 (!%p6414_p8), 1, %s5687_s28  }
  0xbf   : > { %s4155_s18 = sshll.u32 (!%p6414_p8), %s6021_s25, 3  ;;  %s347_s26 = scalar_lea.sflag (!%p6414_p8), [#allocation3], %s6021_s25 }
  0xc0   : > { %s6025_s9 = scalar_lea.vmem (!%p6414_p8), [#allocation2], %s4155_s18 }
  0xc5   : > { %5662 = dma.done.wait (%p5958_p6), %s347_s26, 128  }
  0xc6   : > { %5664 = vsyncadd (%p5958_p6), %s347_s26, 4294967168  ;;  %p6415_p7 = scmp.eq.s32.totalorder %s5782_s11, 0 }
  0xc8   : > { %5666 = dma.done.wait (%p6415_p7), [#allocation6], 3088   ;;  %p6416_p9 = pmov %p6415_p7 }
  0xc9   : > { %p6417_p4 = pmov %p6415_p7 }
  0xca   : > { %5668 = vsyncadd (%p6416_p9), [#allocation6], 4294964208 }
  0xcb   : > { %5670 = dma.done.wait (%p6417_p4), [#allocation9], 37056   ;;  %p6418_p3 = pmov %p6417_p4 }
  0xcd   : > { %5672 = vsyncadd (%p6418_p3), [#allocation9], 4294930240  ;;  %p6419_p0 = pmov %p6418_p3 }
  0xcf   : > { %5674 = dma.done.wait (%p6419_p0), [#allocation12], 3088   ;;  %p6420_p2 = pmov %p6419_p0 }
  0xd0   : > { %v5710_v0 = vmov 0   ;;  %v5711_v1 = vmov 0.0   ;;  %v414_v2 = vld [vmem:[%s6386_s0] sm:$0xff]  ;;  %v415_v3 = vld [vmem:[%s6386_s0 + $0x8] sm:$0xff]  ;;  %v4889_v8 = vld [vmem:[#allocation5 + $0x40] sm:$0xff]   ;;  %v440_v11 = vlaneseq  ;;  %vm5712_vm5 = vmmov 0  }
  0xd1   : > { %5676 = vsyncadd (%p6420_p2), [#allocation12], 4294964208  ;;  %4867 = vset.pattern.permute.xlu0 %v5710_v0  ;;  %4571 = vmatprep.subr.bf16.mxu0 %v5711_v1  ;;  %vm432_vm0 = vcmp.ge.s32.totalorder %v414_v2, 1  ;;  %vm433_vm1 = vcmp.ge.s32.totalorder %v415_v3, 1  ;;  %vm659_vm2 = vcmp.ge.s32.totalorder %v414_v2, 2  ;;  %vm660_vm3 = vcmp.ge.s32.totalorder %v415_v3, 2 }
  0xd2   : > { %4878 = vset.pattern.permute.xlu1 %v5710_v0  ;;  %953 = vmatprep.mubr.bf16.mxu1 %v5710_v0  ;;  %v4163_v4 = vsel %vm432_vm0, 1.0, %v5711_v1  ;;  %v4164_v5 = vsel %vm433_vm1, 1.0, %v5711_v1  ;;  %v4182_v6 = vsel %vm659_vm2, 1.0, %v5711_v1  ;;  %v4183_v7 = vsel %vm660_vm3, 1.0, %v5711_v1  ;;  %v4890_v10 = vld [vmem:[#allocation5 + $0x48] sm:$0xff]   ;;  %v4891_v13 = vld [vmem:[#allocation5 + $0x50] sm:$0xff]  }
  0xd3   : > { %v4868_v9 = vpack.i.bf16 %v4164_v5, %v4163_v4  ;;  %4572 = vmatpush3.bf16.msra.mxu0 %v4889_v8  ;;  %v4873_v12 = vpack.i.bf16 %v4183_v7, %v4182_v6  ;;  %v6058_v14 = vshrl.u32 %v440_v11, 7  ;;  %v6062_v15 = vld [vmem:[%s6025_s9] sm:$0xff]   ;;  %4587 = vmatprep.mubr.msk.bf16.mxu0 %vm5712_vm5, %v5711_v1  ;;  %v4893_v21 = vld [vmem:[#allocation5 + $0x60] sm:$0xff]   ;;  %v4894_v24 = vld [vmem:[#allocation5 + $0x68] sm:$0xff]   ;;  %vm1554_vm6 = vcmp.ge.s32.totalorder %v414_v2, 4  ;;  %s4162_s23 = sshll.u32 %s6021_s25, 4 }
  0xd4   : > { %4573 = vmatprep.subr.bf16.mxu0 %v5711_v1  ;;  %v412_v16 = vunpack.c.l.bf16 %v6062_v15  ;;  %v413_v17 = vunpack.c.h.bf16 %v6062_v15  ;;  %v4892_v18 = vld [vmem:[#allocation5 + $0x58] sm:$0xff]   ;;  %v4895_v25 = vld [vmem:[#allocation5 + $0x70] sm:$0xff]   ;;  %vm1555_vm7 = vcmp.ge.s32.totalorder %v415_v3, 4  ;;  %vm2039_vm8 = vcmp.ge.s32.totalorder %v414_v2, 8  ;;  %v4897_v40 = vld [vmem:[#allocation5] sm:$0xff]   ;;  %s406_s13 = scalar_lea.vmem [#allocation14], %s4162_s23 }
  0xd5   : > { %4869 = vperm.xlu0 %4867, %v4868_v9   ;;  %vm667_vm4 = vcmp.lt.s32.totalorder %v6058_v14, 2  ;;  %v4896_v26 = vld [vmem:[#allocation5 + $0x78] sm:$0xff]   ;;  %vm2040_vm9 = vcmp.ge.s32.totalorder %v415_v3, 8  ;;  %v4273_v27 = vsel %vm1554_vm6, 1.0, %v5711_v1  ;;  %v4274_v28 = vsel %vm1555_vm7, 1.0, %v5711_v1  ;;  %v4898_v49 = vld [vmem:[#allocation5 + $0x8] sm:$0xff]  }
  0xd6   : > { %v665_v19 = vrot.slane %v412_v16, 6  ;;  %v666_v20 = vrot.slane %v413_v17, 6  ;;  %v4323_v29 = vsel %vm2039_vm8, 1.0, %v5711_v1  ;;  %v4324_v30 = vsel %vm2040_vm9, 1.0, %v5711_v1  ;;  %v4899_v51 = vld [vmem:[#allocation5 + $0x10] sm:$0xff]   ;;  %v4900_v52 = vld [vmem:[#allocation5 + $0x18] sm:$0xff]  }
  0xd7   : > { %4574 = vmatpush3.bf16.msra.mxu0 %v4890_v10  ;;  %v4879_v31 = vpack.i.bf16 %v4274_v28, %v4273_v27  ;;  %v4884_v32 = vpack.i.bf16 %v4324_v30, %v4323_v29  ;;  %v438_v33 = vrot.slane %v412_v16, 7  ;;  %vm442_vm10 = vcmp.lt.s32.totalorder %v6058_v14, 1  ;;  %v4901_v53 = vld [vmem:[#allocation5 + $0x20] sm:$0xff]   ;;  %v4902_v54 = vld [vmem:[#allocation5 + $0x28] sm:$0xff]   ;;  %v4903_v55 = vld [vmem:[#allocation5 + $0x30] sm:$0xff]   ;;  %s4012_s21 = sshll.u32 %s406_s13, 4  ;;  %s6337_s21 = int_to_ptr.vmem [resolvable:$true] %s4012_s21 }
  0xd8   : > { %4575 = vmatprep.subr.bf16.mxu0 %v5711_v1  ;;  %v668_v22 = vsel %vm667_vm4, %v665_v19, %v666_v20  ;;  %v669_v23 = vsel %vm667_vm4, %v666_v20, %v665_v19  ;;  %v439_v34 = vrot.slane %v413_v17, 7  ;;  %v4904_v56 = vld [vmem:[#allocation5 + $0x38] sm:$0xff]   ;;  %v4906_v57 = vld [vmem:[#allocation5 + $0x80] sm:$0xff]   ;;  %v4907_v58 = vld [vmem:[#allocation5 + $0x88] sm:$0xff]   ;;  %vm1562_vm11 = vcmp.lt.s32.totalorder %v6058_v14, 4  ;;  %s4516_s17 = sshll.u32 %s5782_s11, 8 }
  0xd9   : > { %4874 = vperm.xlu0 %4867, %v4873_v12   ;;  %4880 = vperm.xlu1 %4878, %v4879_v31   ;;  %v4908_v59 = vld [vmem:[#allocation5 + $0x90] sm:$0xff]   ;;  %v4909_v60 = vld [vmem:[#allocation5 + $0x98] sm:$0xff]   ;;  %v4910_v61 = vld [vmem:[#allocation5 + $0xa0] sm:$0xff]   ;;  %s6342_s18 = scalar_lea.hbm %s6394_s8, %s4516_s17  ;;  %s3999_s26 = scalar_lea.sflag [#allocation4], %s6021_s25 }
  0xda   : > { %v443_v36 = vsel %vm442_vm10, %v438_v33, %v439_v34  ;;  %v444_v37 = vsel %vm442_vm10, %v439_v34, %v438_v33  ;;  %v4911_v62 = vld [vmem:[#allocation5 + $0xa8] sm:$0xff]   ;;  %v4912_v63 = vld [vmem:[#allocation5 + $0xb0] sm:$0xff]   ;;  %v4913_v2 = vld [vmem:[#allocation5 + $0xb8] sm:$0xff]   ;;  %s5617_s11 = scalar_lea.vmem %s6337_s21, 256  ;;  %p6421_p5 = scmp.ne.s32.totalorder %s6410_s10, 0 }
  0xdb   : > { %4576 = vmatpush3.bf16.msra.mxu0 %v4891_v13  ;;  %v4914_v3 = vld [vmem:[#allocation8 + $0x84] ss:$8 sps:$4 sm:$0xff]   ;;  %v4916_v4 = vld [vmem:[#allocation8 + $0x200] ss:$8 sps:$4 sm:$0xff]   ;;  %v4920_v7 = vld [vmem:[#allocation8 + $0x94] ss:$8 sps:$4 sm:$0xff]   ;;  %p5618_p6 = scmp.ne.s32.totalorder %s6337_s21, %s5617_s11 }
  0xdc   : > { %4577 = vmatprep.subr.bf16.mxu0 %v5711_v1  ;;  %v4918_v5 = vld [vmem:[#allocation8 + $0x204] ss:$8 sps:$4 sm:$0xff]   ;;  %v4919_v6 = vld [vmem:[#allocation8 + $0x80] ss:$8 sps:$4 sm:$0xff]   ;;  %921 = vmatprep.subr.bf16.mxu1 %v4914_v3  ;;  %v4924_v8 = vld [vmem:[#allocation8 + $0x214] ss:$8 sps:$4 sm:$0xff]  }
  0xdd   : > { %4885 = vperm.xlu1 %4878, %v4884_v32   ;;  %922 = vmatpush1.bf16.msra.mxu1 %v4919_v6  ;;  %v4922_v9 = vld [vmem:[#allocation8 + $0x210] ss:$8 sps:$4 sm:$0xff]   ;;  %v4926_v11 = vld [vmem:[#allocation8 + $0xa4] ss:$8 sps:$4 sm:$0xff]   ;;  %v4928_v13 = vld [vmem:[#allocation8 + $0x220] ss:$8 sps:$4 sm:$0xff]   ;;  %p5619_p10 = pnand %p5618_p6, %p6421_p5 }
  0xde   : > { %v4925_v10 = vld [vmem:[#allocation8 + $0x90] ss:$8 sps:$4 sm:$0xff]   ;;  %923 = vmatprep.subr.bf16.mxu1 %v4920_v7  ;;  %v4930_v12 = vld [vmem:[#allocation8 + $0x224] ss:$8 sps:$4 sm:$0xff]   ;;  %v4932_v16 = vld [vmem:[#allocation8 + $0xb4] ss:$8 sps:$4 sm:$0xff]  }
  0xdf   : > { %4578 = vmatpush3.bf16.msra.mxu0 %v4892_v18  ;;  %v4936_v17 = vld [vmem:[#allocation8 + $0x234] ss:$8 sps:$4 sm:$0xff]   ;;  %v4934_v18 = vld [vmem:[#allocation8 + $0x230] ss:$8 sps:$4 sm:$0xff]   ;;  %v4938_v20 = vld [vmem:[#allocation8 + $0xc4] ss:$8 sps:$4 sm:$0xff]   ;;  %p5620_p1 = pneg %p5619_p10 }
  0xe0   : > { %4579 = vmatprep.subr.bf16.mxu0 %v5711_v1  ;;  %v4937_v19 = vld [vmem:[#allocation8 + $0xb0] ss:$8 sps:$4 sm:$0xff]   ;;  %v4950_v28 = vld [vmem:[#allocation8 + $0xe4] ss:$8 sps:$4 sm:$0xff]   ;;  %v4952_v30 = vld [vmem:[#allocation8 + $0x260] ss:$8 sps:$4 sm:$0xff]  }
  0xe1   : > { %924 = vmatpush1.bf16.msra.mxu1 %v4925_v10  ;;  %v4949_v27 = vld [vmem:[#allocation8 + $0xd0] ss:$8 sps:$4 sm:$0xff]   ;;  %v4954_v29 = vld [vmem:[#allocation8 + $0x264] ss:$8 sps:$4 sm:$0xff]   ;;  %v4955_v31 = vld [vmem:[#allocation8 + $0xe0] ss:$8 sps:$4 sm:$0xff]  }
  0xe2   : > { %925 = vmatprep.subr.bf16.mxu1 %v4926_v11  ;;  %v4956_v32 = vld [vmem:[#allocation8 + $0xf4] ss:$8 sps:$4 sm:$0xff]   ;;  %v4958_v34 = vld [vmem:[#allocation8 + $0x270] ss:$8 sps:$4 sm:$0xff]   ;;  %s5713_s9 = smov [#allocation14]  }
  0xe3   : > { %4580 = vmatpush3.bf16.msra.mxu0 %v4893_v21  ;;  %v4942_v21 = vld [vmem:[#allocation8 + $0x244] ss:$8 sps:$4 sm:$0xff]   ;;  %v4960_v33 = vld [vmem:[#allocation8 + $0x274] ss:$8 sps:$4 sm:$0xff]   ;;  %s5621_s12 = sshll.u32 %s5713_s9, 4  ;;  %s5622_s12 = int_to_ptr.vmem [resolvable:$false] %s5621_s12 }
  0xe4   : > { %4581 = vmatprep.subr.bf16.mxu0 %v5711_v1  ;;  %s5623_s14 = scalar_lea.vmem %s5622_s12, 512  ;;  %p5624_p11 = scmp.lt.s32.totalorder %s6337_s21, %s5622_s12 }
  0xe5   : > { %p5625_p12 = scmp.lt.s32.totalorder %s5623_s14, %s5617_s11 }
  0xe7   : > { %4582 = vmatpush3.bf16.msra.mxu0 %v4894_v24  ;;  %v4944_v24 = vld [vmem:[#allocation8 + $0xd4] ss:$8 sps:$4 sm:$0xff]   ;;  %p5626_p13 = por %p5625_p12, %p5624_p11 }
  0xe8   : > { %4583 = vmatprep.subr.bf16.mxu0 %v5711_v1 }
  0xe9   : > { %p5627_p8 = pnand %p5626_p13, %p5620_p1 }
  0xeb   : > { %4584 = vmatpush3.bf16.msra.mxu0 %v4895_v25  ;;  %v4948_v25 = vld [vmem:[#allocation8 + $0x254] ss:$8 sps:$4 sm:$0xff]  }
  0xec   : > { %4585 = vmatprep.subr.bf16.mxu0 %v5711_v1 }
  0xef   : > { %4586 = vmatpush3.bf16.msra.mxu0 %v4896_v26  ;;  %v4946_v26 = vld [vmem:[#allocation8 + $0x250] ss:$8 sps:$4 sm:$0xff]  }
  0xf0   : > { %4591 = vmatprep.subr.bf16.mxu0 %v5711_v1 }
 0x154   : > { %v4870_v35 = vpop.permute.xlu0 %4869 }
 0x155   : > { %v6088_v38 = vunpack.i.h.bf16 %v4870_v35  ;;  %v6090_v39 = vunpack.i.l.bf16 %v4870_v35  ;;  %v4961_v35 = vld [vmem:[#allocation8 + $0xf0] ss:$8 sps:$4 sm:$0xff]  }
 0x157   : > { %v455_v41 = vmul.f32 %v6090_v39, %v444_v37  ;;  %v456_v42 = vmul.f32 %v6088_v38, %v443_v36  ;;  %v4964_v36 = vld [vmem:[#allocation8 + $0x4] ss:$8 sps:$4 sm:$0xff]  }
 0x158   : > { %v4875_v43 = vpop.permute.xlu0 %4874  ;;  %v4967_v37 = vld [vmem:[#allocation8 + $0x184] ss:$8 sps:$4 sm:$0xff]  }
 0x159   : > { %v6094_v44 = vunpack.i.h.bf16 %v4875_v43  ;;  %v6096_v45 = vunpack.i.l.bf16 %v4875_v43  ;;  %v474_v46 = vpack.c.bf16 %v456_v42, %v455_v41 }
 0x15b   : > { %v680_v47 = vmul.f32 %v6096_v45, %v669_v23  ;;  %v681_v48 = vmul.f32 %v6094_v44, %v668_v22  ;;  %4588 = vmatmul.mubr.bf16.vlgmr.msra.gmra.mrb[0].mxu0 %v474_v46  ;;  %v4940_v22 = vld [vmem:[#allocation8 + $0x240] ss:$8 sps:$4 sm:$0xff]  }
 0x15c   : > { %4592 = vmatpush3.bf16.msra.mxu0 %v4897_v40  ;;  %4607 = vmatprep.mubr.msk.bf16.mxu0 %vm5712_vm5, %v5711_v1  ;;  %v4943_v23 = vld [vmem:[#allocation8 + $0xc0] ss:$8 sps:$4 sm:$0xff]  }
 0x15d   : > { %4593 = vmatprep.subr.bf16.mxu0 %v5711_v1  ;;  %v699_v50 = vpack.c.bf16 %v681_v48, %v680_v47 }
 0x160   : > { %4594 = vmatpush3.bf16.msra.mxu0 %v4898_v49 }
 0x161   : > { %4595 = vmatprep.subr.bf16.mxu0 %v5711_v1 }
 0x164   : > { %4596 = vmatpush3.bf16.msra.mxu0 %v4899_v51 }
 0x165   : > { %4597 = vmatprep.subr.bf16.mxu0 %v5711_v1 }
 0x168   : > { %4598 = vmatpush3.bf16.msra.mxu0 %v4900_v52  ;;  %v4881_v52 = vpop.permute.xlu1 %4880 }
 0x169   : > { %4599 = vmatprep.subr.bf16.mxu0 %v5711_v1  ;;  %v6125_v3 = vunpack.i.h.bf16 %v4881_v52 }
 0x16c   : > { %4600 = vmatpush3.bf16.msra.mxu0 %v4901_v53 }
 0x16d   : > { %4601 = vmatprep.subr.bf16.mxu0 %v5711_v1 }
 0x170   : > { %4602 = vmatpush3.bf16.msra.mxu0 %v4902_v54  ;;  %v4192_v54 = vld [vmem:[#allocation7] ss:$0 sm:$0xff] }
 0x171   : > { %4603 = vmatprep.subr.bf16.mxu0 %v5711_v1 }
 0x174   : > { %4604 = vmatpush3.bf16.msra.mxu0 %v4903_v55 }
 0x175   : > { %4605 = vmatprep.subr.bf16.mxu0 %v5711_v1 }
 0x178   : > { %4606 = vmatpush3.bf16.msra.mxu0 %v4904_v56 }
 0x179   : > { %4611 = vmatprep.subr.bf16.mxu0 %v5711_v1 }
 0x17b   : > { %4608 = vmatmul.mubr.bf16.vlgmr.msra.gmra.mrb[4].mxu0 %v6062_v15  ;;  %v4931_v15 = vld [vmem:[#allocation8 + $0xa0] ss:$8 sps:$4 sm:$0xff]  }
 0x17c   : > { %4612 = vmatpush3.bf16.msra.mxu0 %v4906_v57  ;;  %4627 = vmatprep.mubr.msk.bf16.mxu0 %vm5712_vm5, %v5711_v1  ;;  %v6121_v57 = vpop.permute.xlu1 %4885 }
 0x17d   : > { %4613 = vmatprep.subr.bf16.mxu0 %v5711_v1  ;;  %926 = vmatpush1.bf16.msra.mxu1 %v4931_v15 }
 0x17e   : > { %927 = vmatprep.subr.bf16.mxu1 %v4932_v16 }
 0x180   : > { %4614 = vmatpush3.bf16.msra.mxu0 %v4907_v58 }
 0x181   : > { %4615 = vmatprep.subr.bf16.mxu0 %v5711_v1  ;;  %928 = vmatpush1.bf16.msra.mxu1 %v4937_v19 }
 0x182   : > { %929 = vmatprep.subr.bf16.mxu1 %v4938_v20 }
 0x184   : > { %4616 = vmatpush3.bf16.msra.mxu0 %v4908_v59 }
 0x185   : > { %4617 = vmatprep.subr.bf16.mxu0 %v5711_v1  ;;  %930 = vmatpush1.bf16.msra.mxu1 %v4943_v23  ;;  %v4962_v23 = vld [vmem:[#allocation8] ss:$8 sps:$4 sm:$0xff]  }
 0x186   : > { %931 = vmatprep.subr.bf16.mxu1 %v4944_v24  ;;  %v4965_v24 = vld [vmem:[#allocation8 + $0x180] ss:$8 sps:$4 sm:$0xff]  }
 0x188   : > { %4618 = vmatpush3.bf16.msra.mxu0 %v4909_v60 }
 0x189   : > { %4619 = vmatprep.subr.bf16.mxu0 %v5711_v1  ;;  %932 = vmatpush1.bf16.msra.mxu1 %v4949_v27 }
 0x18a   : > { %933 = vmatprep.subr.bf16.mxu1 %v4950_v28 }
 0x18c   : > { %4620 = vmatpush3.bf16.msra.mxu0 %v4910_v61 }
 0x18d   : > { %4621 = vmatprep.subr.bf16.mxu0 %v5711_v1  ;;  %934 = vmatpush1.bf16.msra.mxu1 %v4955_v31  ;;  %v4973_v31 = vld [vmem:[#allocation8 + $0x194] ss:$8 sps:$4 sm:$0xff]  }
 0x18e   : > { %935 = vmatprep.subr.bf16.mxu1 %v4956_v32 }
 0x190   : > { %4622 = vmatpush3.bf16.msra.mxu0 %v4911_v62  ;;  %v4888_v62 = vunpack.i.h.bf16 %v6121_v57 }
 0x191   : > { %4623 = vmatprep.subr.bf16.mxu0 %v5711_v1  ;;  %936 = vmatpush1.bf16.msra.mxu1 %v4961_v35  ;;  %v4968_v35 = vld [vmem:[#allocation8 + $0x10] ss:$8 sps:$4 sm:$0xff]  }
 0x192   : > { %1044 = vmatprep.subr.bf16.mxu1 %v4964_v36  ;;  %v4971_v36 = vld [vmem:[#allocation8 + $0x190] ss:$8 sps:$4 sm:$0xff]  }
 0x194   : > { %4624 = vmatpush3.bf16.msra.mxu0 %v4912_v63  ;;  %v4887_v63 = vunpack.i.l.bf16 %v6121_v57  ;;  %v5298_v57 = vld [vmem:[#allocation8 + $0x780] ss:$8 sps:$4 sm:$0xff]  }
 0x195   : > { %4625 = vmatprep.subr.bf16.mxu0 %v5711_v1 }
 0x198   : > { %4626 = vmatpush3.bf16.msra.mxu0 %v4913_v2 }
 0x199   : > { %1388 = vmatprep.subr.bf16.mxu0 %v4918_v5 }
 0x19b   : > { %4628 = vmatmul.mubr.bf16.vlgmr.msra.gmra.mrb[8].mxu0 %v699_v50 }
 0x19c   : > { %1420 = vmatprep.mubr.bf16.mxu0 %v5710_v0  ;;  %1389 = vmatpush1.bf16.msra.mxu0 %v4916_v4  ;;  %v6127_v4 = vunpack.i.l.bf16 %v4881_v52  ;;  %v4989_v52 = vld [vmem:[#allocation8 + $0x1c0] ss:$8 sps:$4 sm:$0xff]  }
 0x19d   : > { %1390 = vmatprep.subr.bf16.mxu0 %v4924_v8 }
 0x1a0   : > { %1391 = vmatpush1.bf16.msra.mxu0 %v4922_v9 }
 0x1a1   : > { %1392 = vmatprep.subr.bf16.mxu0 %v4930_v12 }
 0x1a4   : > { %1393 = vmatpush1.bf16.msra.mxu0 %v4928_v13 }
 0x1a5   : > { %1394 = vmatprep.subr.bf16.mxu0 %v4936_v17 }
 0x1a8   : > { %1395 = vmatpush1.bf16.msra.mxu0 %v4934_v18 }
 0x1a9   : > { %1396 = vmatprep.subr.bf16.mxu0 %v4942_v21 }
 0x1ac   : > { %1397 = vmatpush1.bf16.msra.mxu0 %v4940_v22 }
 0x1ad   : > { %1398 = vmatprep.subr.bf16.mxu0 %v4948_v25 }
 0x1b0   : > { %1399 = vmatpush1.bf16.msra.mxu0 %v4946_v26 }
 0x1b1   : > { %1400 = vmatprep.subr.bf16.mxu0 %v4954_v29 }
 0x1b4   : > { %1401 = vmatpush1.bf16.msra.mxu0 %v4952_v30  ;;  %v4970_v30 = vld [vmem:[#allocation8 + $0x14] ss:$8 sps:$4 sm:$0xff]  }
 0x1b5   : > { %1402 = vmatprep.subr.bf16.mxu0 %v4960_v33 }
 0x1b8   : > { %1403 = vmatpush1.bf16.msra.mxu0 %v4958_v34 }
 0x1b9   : > { %1511 = vmatprep.subr.bf16.mxu0 %v4967_v37  ;;  %v4976_v37 = vld [vmem:[#allocation8 + $0x24] ss:$8 sps:$4 sm:$0xff]  }
 0x22e   : > { %v557_v40 = vpop.f32.mrb[0].mxu0 }
 0x22f   : > { %v4589_v41 = vpop.f32.mrb[1].mxu0 }
 0x230   : > { %v560_v42 = vpop.f32.mrb[2].mxu0  ;;  %v4974_v41 = vld [vmem:[#allocation8 + $0x20] ss:$8 sps:$4 sm:$0xff]  }
 0x231   : > { %v4590_v43 = vpop.f32.mrb[3].mxu0 }
 0x232   : > { %v4982_v43 = vld [vmem:[#allocation8 + $0x34] ss:$8 sps:$4 sm:$0xff]  }
 0x24e   : > { %v652_v46 = vpop.f32.mrb[4].mxu0 }
 0x24f   : > { %v653_v47 = vadd.f32 %v652_v46, %v557_v40  ;;  %v4609_v48 = vpop.f32.mrb[5].mxu0  ;;  %v4979_v40 = vld [vmem:[#allocation8 + $0x1a4] ss:$8 sps:$4 sm:$0xff]   ;;  %v4985_v46 = vld [vmem:[#allocation8 + $0x1b4] ss:$8 sps:$4 sm:$0xff]  }
 0x250   : > { %v655_v49 = vpop.f32.mrb[6].mxu0  ;;  %v4983_v48 = vld [vmem:[#allocation8 + $0x1b0] ss:$8 sps:$4 sm:$0xff]  }
 0x251   : > { %v656_v50 = vadd.f32 %v655_v49, %v560_v42  ;;  %v4610_v51 = vpop.f32.mrb[7].mxu0  ;;  %v4977_v42 = vld [vmem:[#allocation8 + $0x1a0] ss:$8 sps:$4 sm:$0xff]   ;;  %v4988_v49 = vld [vmem:[#allocation8 + $0x44] ss:$8 sps:$4 sm:$0xff]  }
 0x252   : > { %v4986_v51 = vld [vmem:[#allocation8 + $0x40] ss:$8 sps:$4 sm:$0xff]  }
 0x26e   : > { %v782_v53 = vpop.f32.mrb[8].mxu0 }
 0x26f   : > { %v789_v55 = vadd.f32 %v782_v53, %v653_v47  ;;  %v4629_v56 = vpop.f32.mrb[9].mxu0  ;;  %v4980_v47 = vld [vmem:[#allocation8 + $0x30] ss:$8 sps:$4 sm:$0xff]   ;;  %v4994_v53 = vld [vmem:[#allocation8 + $0x54] ss:$8 sps:$4 sm:$0xff]  }
 0x270   : > { %v785_v58 = vpop.f32.mrb[10].mxu0  ;;  %v4995_v56 = vld [vmem:[#allocation8 + $0x1d0] ss:$8 sps:$4 sm:$0xff]  }
 0x271   : > { %v798_v59 = vadd.f32 %v4192_v54, %v789_v55  ;;  %v790_v60 = vadd.f32 %v785_v58, %v656_v50  ;;  %v4630_v61 = vpop.f32.mrb[11].mxu0  ;;  %v4991_v50 = vld [vmem:[#allocation8 + $0x1c4] ss:$8 sps:$4 sm:$0xff]   ;;  %v4992_v55 = vld [vmem:[#allocation8 + $0x50] ss:$8 sps:$4 sm:$0xff]  }
 0x272   : > { %v5000_v58 = vld [vmem:[#allocation8 + $0x64] ss:$8 sps:$4 sm:$0xff]   ;;  %v5001_v61 = vld [vmem:[#allocation8 + $0x1e0] ss:$8 sps:$4 sm:$0xff]  }
 0x273   : > { %v799_v2 = vadd.f32 %v4192_v54, %v790_v60  ;;  %v817_v5 = vrot.slane %v798_v59, 7  ;;  %v1087_v6 = vrot.slane %v798_v59, 6  ;;  %v6133_v11 = vmul.f32 %v4888_v62, %v798_v59  ;;  %v4997_v54 = vld [vmem:[#allocation8 + $0x1d4] ss:$8 sps:$4 sm:$0xff]   ;;  %v4998_v60 = vld [vmem:[#allocation8 + $0x60] ss:$8 sps:$4 sm:$0xff]  }
 0x274   : > { %v1560_v12 = vrot.slane %v798_v59, 4 }
 0x275   : > { %v818_v7 = vrot.slane %v799_v2, 7  ;;  %v1088_v8 = vrot.slane %v799_v2, 6  ;;  %v6129_v9 = vpack.c.bf16 %v799_v2, %v798_v59  ;;  %v1561_v10 = vrot.slane %v799_v2, 4  ;;  %v5003_v59 = vld [vmem:[#allocation8 + $0x1e4] ss:$8 sps:$4 sm:$0xff]  }
 0x276   : > { %v6138_v13 = vmul.f32 %v4887_v63, %v799_v2  ;;  %v5006_v2 = vld [vmem:[#allocation8 + $0x74] ss:$8 sps:$4 sm:$0xff]  }
 0x277   : > { %v819_v15 = vsel %vm442_vm10, %v817_v5, %v818_v7  ;;  %v820_v16 = vsel %vm442_vm10, %v818_v7, %v817_v5  ;;  %v1089_v17 = vsel %vm667_vm4, %v1087_v6, %v1088_v8  ;;  %v1090_v18 = vsel %vm667_vm4, %v1088_v8, %v1087_v6  ;;  %v5009_v5 = vld [vmem:[#allocation8 + $0x1f4] ss:$8 sps:$4 sm:$0xff]   ;;  %v5004_v6 = vld [vmem:[#allocation8 + $0x70] ss:$8 sps:$4 sm:$0xff]   ;;  %v5012_v8 = vld [vmem:[#allocation8 + $0x104] ss:$8 sps:$4 sm:$0xff]  }
 0x278   : > { %v821_v19 = vmul.f32 %v6090_v39, %v820_v16  ;;  %v822_v20 = vmul.f32 %v6088_v38, %v819_v15  ;;  %v1091_v21 = vmul.f32 %v6096_v45, %v1090_v18  ;;  %v1092_v22 = vmul.f32 %v6094_v44, %v1089_v17  ;;  %v5007_v7 = vld [vmem:[#allocation8 + $0x1f0] ss:$8 sps:$4 sm:$0xff]   ;;  %v5013_v15 = vld [vmem:[#allocation8 + $0x280] ss:$8 sps:$4 sm:$0xff]   ;;  %v5018_v16 = vld [vmem:[#allocation8 + $0x114] ss:$8 sps:$4 sm:$0xff]  }
 0x279   : > { %v1563_v25 = vsel %vm1562_vm11, %v1560_v12, %v1561_v10  ;;  %v1564_v26 = vsel %vm1562_vm11, %v1561_v10, %v1560_v12  ;;  %v2074_v27 = vpack.c.bf16 %v6133_v11, %v6138_v13  ;;  %v5015_v10 = vld [vmem:[#allocation8 + $0x284] ss:$8 sps:$4 sm:$0xff]   ;;  %v5010_v12 = vld [vmem:[#allocation8 + $0x100] ss:$8 sps:$4 sm:$0xff]   ;;  %v5021_v17 = vld [vmem:[#allocation8 + $0x294] ss:$8 sps:$4 sm:$0xff]  }
 0x27a   : > { %v840_v28 = vpack.c.bf16 %v822_v20, %v821_v19  ;;  %v6158_v29 = vpack.c.bf16 %v1092_v22, %v1091_v21  ;;  %v1575_v32 = vmul.f32 %v6127_v4, %v1564_v26  ;;  %v1576_v33 = vmul.f32 %v6125_v3, %v1563_v25  ;;  %v5016_v18 = vld [vmem:[#allocation8 + $0x110] ss:$8 sps:$4 sm:$0xff]   ;;  %v5024_v20 = vld [vmem:[#allocation8 + $0x124] ss:$8 sps:$4 sm:$0xff]   ;;  %v5022_v22 = vld [vmem:[#allocation8 + $0x120] ss:$8 sps:$4 sm:$0xff]  }
 0x27b   : > { %v5019_v19 = vld [vmem:[#allocation8 + $0x290] ss:$8 sps:$4 sm:$0xff]   ;;  %v5027_v21 = vld [vmem:[#allocation8 + $0x2a4] ss:$8 sps:$4 sm:$0xff]   ;;  %v5033_v25 = vld [vmem:[#allocation8 + $0x2b4] ss:$8 sps:$4 sm:$0xff]  }
 0x27c   : > { %954 = vmatmul.mubr.bf16.vlgmr.msra.gmra.mrb[0].mxu1 %v840_v28  ;;  %1421 = vmatmul.mubr.bf16.vlgmr.msra.gmra.mrb[12].mxu0 %v6158_v29  ;;  %v6163_v34 = vpack.c.bf16 %v1576_v33, %v1575_v32  ;;  %v5028_v26 = vld [vmem:[#allocation8 + $0x130] ss:$8 sps:$4 sm:$0xff]   ;;  %v5034_v32 = vld [vmem:[#allocation8 + $0x140] ss:$8 sps:$4 sm:$0xff]   ;;  %v5144_v11 = vld [vmem:[#allocation8 + $0x524] ss:$8 sps:$4 sm:$0xff]  }
 0x27d   : > { %1045 = vmatpush1.bf16.msra.mxu1 %v4962_v23  ;;  %1512 = vmatpush1.bf16.msra.mxu0 %v4965_v24  ;;  %v5025_v23 = vld [vmem:[#allocation8 + $0x2a0] ss:$8 sps:$4 sm:$0xff]   ;;  %v5030_v24 = vld [vmem:[#allocation8 + $0x134] ss:$8 sps:$4 sm:$0xff]   ;;  %v5031_v28 = vld [vmem:[#allocation8 + $0x2b0] ss:$8 sps:$4 sm:$0xff]  }
 0x27e   : > { %1046 = vmatprep.subr.bf16.mxu1 %v4970_v30  ;;  %1513 = vmatprep.subr.bf16.mxu0 %v4973_v31  ;;  %v5036_v30 = vld [vmem:[#allocation8 + $0x144] ss:$8 sps:$4 sm:$0xff]   ;;  %v5037_v33 = vld [vmem:[#allocation8 + $0x2c0] ss:$8 sps:$4 sm:$0xff]  }
 0x27f   : > { %1076 = vmatprep.mubr.bf16.mxu1 %v5710_v0  ;;  %1543 = vmatprep.mubr.bf16.mxu0 %v5710_v0  ;;  %v5039_v31 = vld [vmem:[#allocation8 + $0x2c4] ss:$8 sps:$4 sm:$0xff]  }
 0x280   : > { %v5147_v13 = vld [vmem:[#allocation8 + $0x6a4] ss:$8 sps:$4 sm:$0xff]  }
 0x281   : > { %1047 = vmatpush1.bf16.msra.mxu1 %v4968_v35  ;;  %1514 = vmatpush1.bf16.msra.mxu0 %v4971_v36  ;;  %v5042_v35 = vld [vmem:[#allocation8 + $0x154] ss:$8 sps:$4 sm:$0xff]  }
 0x282   : > { %1048 = vmatprep.subr.bf16.mxu1 %v4976_v37  ;;  %1515 = vmatprep.subr.bf16.mxu0 %v4979_v40  ;;  %v5045_v36 = vld [vmem:[#allocation8 + $0x2d4] ss:$8 sps:$4 sm:$0xff]   ;;  %v5040_v37 = vld [vmem:[#allocation8 + $0x150] ss:$8 sps:$4 sm:$0xff]  }
 0x283   : > { %v5043_v40 = vld [vmem:[#allocation8 + $0x2d0] ss:$8 sps:$4 sm:$0xff]  }
 0x285   : > { %1049 = vmatpush1.bf16.msra.mxu1 %v4974_v41  ;;  %1516 = vmatpush1.bf16.msra.mxu0 %v4977_v42  ;;  %v5048_v41 = vld [vmem:[#allocation8 + $0x164] ss:$8 sps:$4 sm:$0xff]  }
 0x286   : > { %1050 = vmatprep.subr.bf16.mxu1 %v4982_v43  ;;  %1517 = vmatprep.subr.bf16.mxu0 %v4985_v46  ;;  %v5051_v42 = vld [vmem:[#allocation8 + $0x2e4] ss:$8 sps:$4 sm:$0xff]   ;;  %v5046_v43 = vld [vmem:[#allocation8 + $0x160] ss:$8 sps:$4 sm:$0xff]  }
 0x287   : > { %v5049_v46 = vld [vmem:[#allocation8 + $0x2e0] ss:$8 sps:$4 sm:$0xff]  }
 0x289   : > { %1051 = vmatpush1.bf16.msra.mxu1 %v4980_v47  ;;  %1518 = vmatpush1.bf16.msra.mxu0 %v4983_v48  ;;  %v5054_v47 = vld [vmem:[#allocation8 + $0x174] ss:$8 sps:$4 sm:$0xff]  }
 0x28a   : > { %1052 = vmatprep.subr.bf16.mxu1 %v4988_v49  ;;  %1519 = vmatprep.subr.bf16.mxu0 %v4991_v50  ;;  %v5057_v48 = vld [vmem:[#allocation8 + $0x2f4] ss:$8 sps:$4 sm:$0xff]   ;;  %v5052_v49 = vld [vmem:[#allocation8 + $0x170] ss:$8 sps:$4 sm:$0xff]  }
 0x28b   : > { %v5055_v50 = vld [vmem:[#allocation8 + $0x2f0] ss:$8 sps:$4 sm:$0xff]  }
 0x28d   : > { %1053 = vmatpush1.bf16.msra.mxu1 %v4986_v51  ;;  %1520 = vmatpush1.bf16.msra.mxu0 %v4989_v52  ;;  %v5060_v51 = vld [vmem:[#allocation8 + $0x384] ss:$8 sps:$4 sm:$0xff]   ;;  %v5058_v52 = vld [vmem:[#allocation8 + $0x380] ss:$8 sps:$4 sm:$0xff]  }
 0x28e   : > { %1054 = vmatprep.subr.bf16.mxu1 %v4994_v53  ;;  %1521 = vmatprep.subr.bf16.mxu0 %v4997_v54  ;;  %v5063_v53 = vld [vmem:[#allocation8 + $0x394] ss:$8 sps:$4 sm:$0xff]   ;;  %v5061_v54 = vld [vmem:[#allocation8 + $0x390] ss:$8 sps:$4 sm:$0xff]  }
 0x291   : > { %1055 = vmatpush1.bf16.msra.mxu1 %v4992_v55  ;;  %1522 = vmatpush1.bf16.msra.mxu0 %v4995_v56  ;;  %v5066_v55 = vld [vmem:[#allocation8 + $0x3a4] ss:$8 sps:$4 sm:$0xff]   ;;  %v5064_v56 = vld [vmem:[#allocation8 + $0x3a0] ss:$8 sps:$4 sm:$0xff]  }
 0x292   : > { %1056 = vmatprep.subr.bf16.mxu1 %v5000_v58  ;;  %1523 = vmatprep.subr.bf16.mxu0 %v5003_v59  ;;  %v5069_v58 = vld [vmem:[#allocation8 + $0x3b4] ss:$8 sps:$4 sm:$0xff]   ;;  %v5067_v59 = vld [vmem:[#allocation8 + $0x3b0] ss:$8 sps:$4 sm:$0xff]  }
 0x295   : > { %1057 = vmatpush1.bf16.msra.mxu1 %v4998_v60  ;;  %1524 = vmatpush1.bf16.msra.mxu0 %v5001_v61  ;;  %v5072_v60 = vld [vmem:[#allocation8 + $0x3c4] ss:$8 sps:$4 sm:$0xff]   ;;  %v5075_v61 = vld [vmem:[#allocation8 + $0x3d4] ss:$8 sps:$4 sm:$0xff]  }
 0x296   : > { %1058 = vmatprep.subr.bf16.mxu1 %v5006_v2  ;;  %1525 = vmatprep.subr.bf16.mxu0 %v5009_v5  ;;  %v5073_v2 = vld [vmem:[#allocation8 + $0x3d0] ss:$8 sps:$4 sm:$0xff]   ;;  %v5078_v5 = vld [vmem:[#allocation8 + $0x3e4] ss:$8 sps:$4 sm:$0xff]  }
 0x299   : > { %1059 = vmatpush1.bf16.msra.mxu1 %v5004_v6  ;;  %1526 = vmatpush1.bf16.msra.mxu0 %v5007_v7  ;;  %v5076_v6 = vld [vmem:[#allocation8 + $0x3e0] ss:$8 sps:$4 sm:$0xff]   ;;  %v5081_v7 = vld [vmem:[#allocation8 + $0x3f4] ss:$8 sps:$4 sm:$0xff]  }
 0x29a   : > { %1191 = vmatprep.subr.bf16.mxu1 %v5012_v8  ;;  %1675 = vmatprep.subr.bf16.mxu0 %v5015_v10  ;;  %v5079_v8 = vld [vmem:[#allocation8 + $0x3f0] ss:$8 sps:$4 sm:$0xff]   ;;  %v5084_v10 = vld [vmem:[#allocation8 + $0x304] ss:$8 sps:$4 sm:$0xff]  }
 0x29c   : > { %1077 = vmatmul.mubr.bf16.vlgmr.msra.gmra.mrb[0].mxu1 %v6129_v9  ;;  %1544 = vmatmul.mubr.bf16.vlgmr.msra.gmra.mrb[12].mxu0 %v6129_v9 }
 0x29d   : > { %1192 = vmatpush1.bf16.msra.mxu1 %v5010_v12  ;;  %1676 = vmatpush1.bf16.msra.mxu0 %v5013_v15  ;;  %v5082_v12 = vld [vmem:[#allocation8 + $0x300] ss:$8 sps:$4 sm:$0xff]   ;;  %v5087_v15 = vld [vmem:[#allocation8 + $0x314] ss:$8 sps:$4 sm:$0xff]  }
 0x29e   : > { %1193 = vmatprep.subr.bf16.mxu1 %v5018_v16  ;;  %1677 = vmatprep.subr.bf16.mxu0 %v5021_v17  ;;  %v5085_v16 = vld [vmem:[#allocation8 + $0x310] ss:$8 sps:$4 sm:$0xff]   ;;  %v5090_v17 = vld [vmem:[#allocation8 + $0x324] ss:$8 sps:$4 sm:$0xff]  }
 0x29f   : > { %1223 = vmatprep.mubr.bf16.mxu1 %v5710_v0  ;;  %1707 = vmatprep.mubr.bf16.mxu0 %v5710_v0 }
 0x2a1   : > { %1194 = vmatpush1.bf16.msra.mxu1 %v5016_v18  ;;  %1678 = vmatpush1.bf16.msra.mxu0 %v5019_v19  ;;  %v5088_v18 = vld [vmem:[#allocation8 + $0x320] ss:$8 sps:$4 sm:$0xff]   ;;  %v5093_v19 = vld [vmem:[#allocation8 + $0x334] ss:$8 sps:$4 sm:$0xff]  }
 0x2a2   : > { %1195 = vmatprep.subr.bf16.mxu1 %v5024_v20  ;;  %1679 = vmatprep.subr.bf16.mxu0 %v5027_v21  ;;  %v5091_v20 = vld [vmem:[#allocation8 + $0x330] ss:$8 sps:$4 sm:$0xff]   ;;  %v5096_v21 = vld [vmem:[#allocation8 + $0x344] ss:$8 sps:$4 sm:$0xff]  }
 0x2a5   : > { %1196 = vmatpush1.bf16.msra.mxu1 %v5022_v22  ;;  %1680 = vmatpush1.bf16.msra.mxu0 %v5025_v23  ;;  %v5094_v22 = vld [vmem:[#allocation8 + $0x340] ss:$8 sps:$4 sm:$0xff]   ;;  %v5099_v23 = vld [vmem:[#allocation8 + $0x354] ss:$8 sps:$4 sm:$0xff]  }
 0x2a6   : > { %1197 = vmatprep.subr.bf16.mxu1 %v5030_v24  ;;  %1681 = vmatprep.subr.bf16.mxu0 %v5033_v25  ;;  %v5102_v24 = vld [vmem:[#allocation8 + $0x364] ss:$8 sps:$4 sm:$0xff]   ;;  %v5100_v25 = vld [vmem:[#allocation8 + $0x360] ss:$8 sps:$4 sm:$0xff]  }
 0x2a9   : > { %1198 = vmatpush1.bf16.msra.mxu1 %v5028_v26  ;;  %1682 = vmatpush1.bf16.msra.mxu0 %v5031_v28  ;;  %v5105_v26 = vld [vmem:[#allocation8 + $0x374] ss:$8 sps:$4 sm:$0xff]   ;;  %v5103_v28 = vld [vmem:[#allocation8 + $0x370] ss:$8 sps:$4 sm:$0xff]  }
 0x2aa   : > { %1199 = vmatprep.subr.bf16.mxu1 %v5036_v30  ;;  %1683 = vmatprep.subr.bf16.mxu0 %v5039_v31  ;;  %v5108_v30 = vld [vmem:[#allocation8 + $0x404] ss:$8 sps:$4 sm:$0xff]   ;;  %v5106_v31 = vld [vmem:[#allocation8 + $0x400] ss:$8 sps:$4 sm:$0xff]  }
 0x2ad   : > { %1200 = vmatpush1.bf16.msra.mxu1 %v5034_v32  ;;  %1684 = vmatpush1.bf16.msra.mxu0 %v5037_v33  ;;  %v5111_v32 = vld [vmem:[#allocation8 + $0x414] ss:$8 sps:$4 sm:$0xff]   ;;  %v5109_v33 = vld [vmem:[#allocation8 + $0x410] ss:$8 sps:$4 sm:$0xff]  }
 0x2ae   : > { %1201 = vmatprep.subr.bf16.mxu1 %v5042_v35  ;;  %1685 = vmatprep.subr.bf16.mxu0 %v5045_v36  ;;  %v5114_v35 = vld [vmem:[#allocation8 + $0x424] ss:$8 sps:$4 sm:$0xff]   ;;  %v5112_v36 = vld [vmem:[#allocation8 + $0x420] ss:$8 sps:$4 sm:$0xff]  }
 0x2b1   : > { %1202 = vmatpush1.bf16.msra.mxu1 %v5040_v37  ;;  %1686 = vmatpush1.bf16.msra.mxu0 %v5043_v40  ;;  %v5117_v37 = vld [vmem:[#allocation8 + $0x434] ss:$8 sps:$4 sm:$0xff]   ;;  %v5115_v40 = vld [vmem:[#allocation8 + $0x430] ss:$8 sps:$4 sm:$0xff]  }
 0x2b2   : > { %1203 = vmatprep.subr.bf16.mxu1 %v5048_v41  ;;  %1687 = vmatprep.subr.bf16.mxu0 %v5051_v42  ;;  %v5120_v41 = vld [vmem:[#allocation8 + $0x444] ss:$8 sps:$4 sm:$0xff]   ;;  %v5118_v42 = vld [vmem:[#allocation8 + $0x440] ss:$8 sps:$4 sm:$0xff]  }
 0x2b5   : > { %1204 = vmatpush1.bf16.msra.mxu1 %v5046_v43  ;;  %1688 = vmatpush1.bf16.msra.mxu0 %v5049_v46  ;;  %v5123_v43 = vld [vmem:[#allocation8 + $0x454] ss:$8 sps:$4 sm:$0xff]   ;;  %v5126_v46 = vld [vmem:[#allocation8 + $0x464] ss:$8 sps:$4 sm:$0xff]  }
 0x2b6   : > { %1205 = vmatprep.subr.bf16.mxu1 %v5054_v47  ;;  %1689 = vmatprep.subr.bf16.mxu0 %v5057_v48  ;;  %v5124_v47 = vld [vmem:[#allocation8 + $0x460] ss:$8 sps:$4 sm:$0xff]   ;;  %v5129_v48 = vld [vmem:[#allocation8 + $0x474] ss:$8 sps:$4 sm:$0xff]  }
 0x2b9   : > { %1206 = vmatpush1.bf16.msra.mxu1 %v5052_v49  ;;  %1690 = vmatpush1.bf16.msra.mxu0 %v5055_v50  ;;  %v5127_v49 = vld [vmem:[#allocation8 + $0x470] ss:$8 sps:$4 sm:$0xff]   ;;  %v5132_v50 = vld [vmem:[#allocation8 + $0x504] ss:$8 sps:$4 sm:$0xff]  }
 0x2ba   : > { %1873 = vmatprep.subr.bf16.mxu1 %v5060_v51  ;;  %v5135_v51 = vld [vmem:[#allocation8 + $0x684] ss:$8 sps:$4 sm:$0xff]   ;;  %2361 = vmatprep.subr.bf16.mxu0 %v5132_v50 }
 0x2bc   : > { %1224 = vmatmul.mubr.bf16.vlgmr.msra.gmra.mrb[0].mxu1 %v6158_v29  ;;  %1708 = vmatmul.mubr.bf16.vlgmr.msra.gmra.mrb[12].mxu0 %v6163_v34  ;;  %v5070_v29 = vld [vmem:[#allocation8 + $0x3c0] ss:$8 sps:$4 sm:$0xff]  }
 0x2bd   : > { %1874 = vmatpush1.bf16.msra.mxu1 %v5058_v52  ;;  %1905 = vmatprep.mubr.bf16.mxu1 %v5710_v0  ;;  %v5130_v52 = vld [vmem:[#allocation8 + $0x500] ss:$8 sps:$4 sm:$0xff]  }
 0x2be   : > { %1875 = vmatprep.subr.bf16.mxu1 %v5063_v53  ;;  %2393 = vmatprep.mubr.bf16.mxu0 %v5710_v0  ;;  %v5133_v53 = vld [vmem:[#allocation8 + $0x680] ss:$8 sps:$4 sm:$0xff]  }
 0x2bf   : > { %2362 = vmatpush1.bf16.msra.mxu0 %v5130_v52 }
 0x2c1   : > { %1876 = vmatpush1.bf16.msra.mxu1 %v5061_v54  ;;  %v5138_v54 = vld [vmem:[#allocation8 + $0x514] ss:$8 sps:$4 sm:$0xff]  }
 0x2c2   : > { %1877 = vmatprep.subr.bf16.mxu1 %v5066_v55  ;;  %v5141_v55 = vld [vmem:[#allocation8 + $0x694] ss:$8 sps:$4 sm:$0xff]   ;;  %2363 = vmatprep.subr.bf16.mxu0 %v5138_v54 }
 0x2c5   : > { %1878 = vmatpush1.bf16.msra.mxu1 %v5064_v56  ;;  %v5136_v56 = vld [vmem:[#allocation8 + $0x510] ss:$8 sps:$4 sm:$0xff]  }
 0x2c6   : > { %1879 = vmatprep.subr.bf16.mxu1 %v5069_v58  ;;  %v5139_v58 = vld [vmem:[#allocation8 + $0x690] ss:$8 sps:$4 sm:$0xff]   ;;  %2364 = vmatpush1.bf16.msra.mxu0 %v5136_v56 }
 0x2c7   : > { %2365 = vmatprep.subr.bf16.mxu0 %v5144_v11 }
 0x2c9   : > { %1880 = vmatpush1.bf16.msra.mxu1 %v5067_v59  ;;  %v5145_v59 = vld [vmem:[#allocation8 + $0x6a0] ss:$8 sps:$4 sm:$0xff]  }
 0x2ca   : > { %1881 = vmatprep.subr.bf16.mxu1 %v5072_v60  ;;  %v5150_v60 = vld [vmem:[#allocation8 + $0x534] ss:$8 sps:$4 sm:$0xff]  }
 0x2cd   : > { %1882 = vmatpush1.bf16.msra.mxu1 %v5070_v29  ;;  %v5153_v29 = vld [vmem:[#allocation8 + $0x6b4] ss:$8 sps:$4 sm:$0xff]  }
 0x2ce   : > { %1883 = vmatprep.subr.bf16.mxu1 %v5075_v61  ;;  %v5148_v61 = vld [vmem:[#allocation8 + $0x530] ss:$8 sps:$4 sm:$0xff]  }
 0x2d1   : > { %1884 = vmatpush1.bf16.msra.mxu1 %v5073_v2  ;;  %v5151_v2 = vld [vmem:[#allocation8 + $0x6b0] ss:$8 sps:$4 sm:$0xff]  }
 0x2d2   : > { %1885 = vmatprep.subr.bf16.mxu1 %v5078_v5  ;;  %v5156_v5 = vld [vmem:[#allocation8 + $0x544] ss:$8 sps:$4 sm:$0xff]  }
 0x2d5   : > { %1886 = vmatpush1.bf16.msra.mxu1 %v5076_v6  ;;  %v5159_v6 = vld [vmem:[#allocation8 + $0x6c4] ss:$8 sps:$4 sm:$0xff]  }
 0x2d6   : > { %1887 = vmatprep.subr.bf16.mxu1 %v5081_v7  ;;  %v5154_v7 = vld [vmem:[#allocation8 + $0x540] ss:$8 sps:$4 sm:$0xff]  }
 0x2d9   : > { %1888 = vmatpush1.bf16.msra.mxu1 %v5079_v8  ;;  %v5157_v8 = vld [vmem:[#allocation8 + $0x6c0] ss:$8 sps:$4 sm:$0xff]  }
 0x2da   : > { %1996 = vmatprep.subr.bf16.mxu1 %v5084_v10  ;;  %v5162_v10 = vld [vmem:[#allocation8 + $0x554] ss:$8 sps:$4 sm:$0xff]  }
 0x2dc   : > { %1906 = vmatmul.mubr.bf16.vlgmr.msra.gmra.mrb[4].mxu1 %v6163_v34  ;;  %v5097_v34 = vld [vmem:[#allocation8 + $0x350] ss:$8 sps:$4 sm:$0xff]  }
 0x2dd   : > { %1997 = vmatpush1.bf16.msra.mxu1 %v5082_v12  ;;  %2028 = vmatprep.mubr.bf16.mxu1 %v5710_v0  ;;  %v5165_v12 = vld [vmem:[#allocation8 + $0x6d4] ss:$8 sps:$4 sm:$0xff]  }
 0x2de   : > { %1998 = vmatprep.subr.bf16.mxu1 %v5087_v15  ;;  %v5160_v15 = vld [vmem:[#allocation8 + $0x550] ss:$8 sps:$4 sm:$0xff]  }
 0x2e1   : > { %1999 = vmatpush1.bf16.msra.mxu1 %v5085_v16  ;;  %v5163_v16 = vld [vmem:[#allocation8 + $0x6d0] ss:$8 sps:$4 sm:$0xff]  }
 0x2e2   : > { %2000 = vmatprep.subr.bf16.mxu1 %v5090_v17  ;;  %v5168_v17 = vld [vmem:[#allocation8 + $0x564] ss:$8 sps:$4 sm:$0xff]  }
 0x2e5   : > { %2001 = vmatpush1.bf16.msra.mxu1 %v5088_v18  ;;  %v5171_v18 = vld [vmem:[#allocation8 + $0x6e4] ss:$8 sps:$4 sm:$0xff]  }
 0x2e6   : > { %2002 = vmatprep.subr.bf16.mxu1 %v5093_v19  ;;  %v5166_v19 = vld [vmem:[#allocation8 + $0x560] ss:$8 sps:$4 sm:$0xff]  }
 0x2e9   : > { %2003 = vmatpush1.bf16.msra.mxu1 %v5091_v20  ;;  %v5169_v20 = vld [vmem:[#allocation8 + $0x6e0] ss:$8 sps:$4 sm:$0xff]  }
 0x2ea   : > { %2004 = vmatprep.subr.bf16.mxu1 %v5096_v21  ;;  %v5172_v21 = vld [vmem:[#allocation8 + $0x570] ss:$8 sps:$4 sm:$0xff]  }
 0x2ed   : > { %2005 = vmatpush1.bf16.msra.mxu1 %v5094_v22  ;;  %v5174_v22 = vld [vmem:[#allocation8 + $0x574] ss:$8 sps:$4 sm:$0xff]  }
 0x2ee   : > { %2006 = vmatprep.subr.bf16.mxu1 %v5099_v23  ;;  %v5175_v23 = vld [vmem:[#allocation8 + $0x6f0] ss:$8 sps:$4 sm:$0xff]  }
 0x2f1   : > { %2007 = vmatpush1.bf16.msra.mxu1 %v5097_v34  ;;  %v5177_v34 = vld [vmem:[#allocation8 + $0x6f4] ss:$8 sps:$4 sm:$0xff]  }
 0x2f2   : > { %2008 = vmatprep.subr.bf16.mxu1 %v5102_v24  ;;  %v5180_v24 = vld [vmem:[#allocation8 + $0x484] ss:$8 sps:$4 sm:$0xff]  }
 0x2f5   : > { %2009 = vmatpush1.bf16.msra.mxu1 %v5100_v25  ;;  %v5183_v25 = vld [vmem:[#allocation8 + $0x604] ss:$8 sps:$4 sm:$0xff]  }
 0x2f6   : > { %2010 = vmatprep.subr.bf16.mxu1 %v5105_v26  ;;  %v6184_v26 = vsub.s32 0, %v6058_v14 }
 0x2f9   : > { %2011 = vmatpush1.bf16.msra.mxu1 %v5103_v28  ;;  %v1238_v28 = vld [vmem:[#allocation10] sm:$0x3] }
 0x2fa   : > { %2155 = vmatprep.subr.bf16.mxu1 %v5108_v30  ;;  %v1723_v30 = vld [vmem:[#allocation10 + $0x2] sm:$0x3] }
 0x2fc   : > { %2029 = vmatmul.mubr.bf16.vlgmr.msra.gmra.mrb[4].mxu1 %v6129_v9  ;;  %v5121_v9 = vld [vmem:[#allocation8 + $0x450] ss:$8 sps:$4 sm:$0xff]  }
 0x2fd   : > { %2156 = vmatpush1.bf16.msra.mxu1 %v5106_v31  ;;  %2187 = vmatprep.mubr.bf16.mxu1 %v5710_v0  ;;  %v1243_v31 = vrot.slane %v1238_v28, %v6184_v26 }
 0x2fe   : > { %2157 = vmatprep.subr.bf16.mxu1 %v5111_v32  ;;  %v1728_v32 = vrot.slane %v1723_v30, %v6184_v26 }
 0x301   : > { %2158 = vmatpush1.bf16.msra.mxu1 %v5109_v33 }
 0x302   : > { %2159 = vmatprep.subr.bf16.mxu1 %v5114_v35 }
 0x305   : > { %2160 = vmatpush1.bf16.msra.mxu1 %v5112_v36 }
 0x306   : > { %2161 = vmatprep.subr.bf16.mxu1 %v5117_v37 }
 0x309   : > { %2162 = vmatpush1.bf16.msra.mxu1 %v5115_v40 }
 0x30a   : > { %2163 = vmatprep.subr.bf16.mxu1 %v5120_v41 }
 0x30d   : > { %2164 = vmatpush1.bf16.msra.mxu1 %v5118_v42 }
 0x30e   : > { %2165 = vmatprep.subr.bf16.mxu1 %v5123_v43 }
 0x311   : > { %2166 = vmatpush1.bf16.msra.mxu1 %v5121_v9 }
 0x312   : > { %2167 = vmatprep.subr.bf16.mxu1 %v5126_v46 }
 0x315   : > { %2168 = vmatpush1.bf16.msra.mxu1 %v5124_v47 }
 0x316   : > { %2169 = vmatprep.subr.bf16.mxu1 %v5129_v48 }
 0x319   : > { %2170 = vmatpush1.bf16.msra.mxu1 %v5127_v49 }
 0x31a   : > { %2837 = vmatprep.subr.bf16.mxu1 %v5135_v51 }
 0x31c   : > { %2188 = vmatmul.mubr.bf16.vlgmr.msra.gmra.mrb[4].mxu1 %v2074_v27  ;;  %v5142_v27 = vld [vmem:[#allocation8 + $0x520] ss:$8 sps:$4 sm:$0xff]  }
 0x31d   : > { %2869 = vmatprep.mubr.bf16.mxu1 %v5710_v0  ;;  %2838 = vmatpush1.bf16.msra.mxu1 %v5133_v53 }
 0x31e   : > { %2839 = vmatprep.subr.bf16.mxu1 %v5141_v55  ;;  %2366 = vmatpush1.bf16.msra.mxu0 %v5142_v27 }
 0x31f   : > { %2367 = vmatprep.subr.bf16.mxu0 %v5150_v60 }
 0x321   : > { %2840 = vmatpush1.bf16.msra.mxu1 %v5139_v58 }
 0x322   : > { %2841 = vmatprep.subr.bf16.mxu1 %v5147_v13  ;;  %2368 = vmatpush1.bf16.msra.mxu0 %v5148_v61 }
 0x323   : > { %2369 = vmatprep.subr.bf16.mxu0 %v5156_v5 }
 0x325   : > { %2842 = vmatpush1.bf16.msra.mxu1 %v5145_v59 }
 0x326   : > { %2843 = vmatprep.subr.bf16.mxu1 %v5153_v29  ;;  %2370 = vmatpush1.bf16.msra.mxu0 %v5154_v7 }
 0x327   : > { %2371 = vmatprep.subr.bf16.mxu0 %v5162_v10 }
 0x329   : > { %2844 = vmatpush1.bf16.msra.mxu1 %v5151_v2 }
 0x32a   : > { %2845 = vmatprep.subr.bf16.mxu1 %v5159_v6  ;;  %2372 = vmatpush1.bf16.msra.mxu0 %v5160_v15 }
 0x32b   : > { %2373 = vmatprep.subr.bf16.mxu0 %v5168_v17 }
 0x32d   : > { %2846 = vmatpush1.bf16.msra.mxu1 %v5157_v8 }
 0x32e   : > { %2847 = vmatprep.subr.bf16.mxu1 %v5165_v12  ;;  %2374 = vmatpush1.bf16.msra.mxu0 %v5166_v19 }
 0x32f   : > { %2375 = vmatprep.subr.bf16.mxu0 %v5174_v22 }
 0x331   : > { %2848 = vmatpush1.bf16.msra.mxu1 %v5163_v16  ;;  %v6189_v16 = vsub.s32 1, %v6058_v14  ;;  %v5306_v14 = vld [vmem:[#allocation8 + $0x7a4] ss:$8 sps:$4 sm:$0xff]  }
 0x332   : > { %2849 = vmatprep.subr.bf16.mxu1 %v5171_v18  ;;  %2376 = vmatpush1.bf16.msra.mxu0 %v5172_v21 }
 0x333   : > { %2484 = vmatprep.subr.bf16.mxu0 %v5180_v24  ;;  %v1247_v17 = vrot.slane %v1238_v28, %v6189_v16  ;;  %v1732_v18 = vrot.slane %v1723_v30, %v6189_v16 }
 0x335   : > { %2850 = vmatpush1.bf16.msra.mxu1 %v5169_v20 }
 0x336   : > { %2851 = vmatprep.subr.bf16.mxu1 %v5177_v34 }
 0x339   : > { %2852 = vmatpush1.bf16.msra.mxu1 %v5175_v23 }
 0x33a   : > { %2960 = vmatprep.subr.bf16.mxu1 %v5183_v25 }
 0x38f   : > { %v1225_v33 = vpop.f32.mrb[0].mxu1  ;;  %v1709_v35 = vpop.f32.mrb[12].mxu0 }
 0x390   : > { %v1250_v36 = vadd.f32 %v1243_v31, %v1225_v33  ;;  %v1735_v37 = vadd.f32 %v1728_v32, %v1709_v35  ;;  %v1227_v40 = vpop.f32.mrb[1].mxu1  ;;  %v1711_v41 = vpop.f32.mrb[13].mxu0 }
 0x391   : > { %v1229_v42 = vpop.f32.mrb[2].mxu1  ;;  %v1713_v43 = vpop.f32.mrb[14].mxu0  ;;  %v1251_v23 = vadd.f32 %v1247_v17, %v1227_v40 }
 0x392   : > { %v1254_v9 = vmax.f32 %v1250_v36, -30.0  ;;  %v1739_v46 = vmax.f32 %v1735_v37, -30.0  ;;  %v1252_v47 = vadd.f32 %v1243_v31, %v1229_v42  ;;  %v1737_v48 = vadd.f32 %v1728_v32, %v1713_v43  ;;  %v1231_v49 = vpop.f32.mrb[3].mxu1  ;;  %v1715_v50 = vpop.f32.mrb[15].mxu0 }
 0x393   : > { %v1736_v31 = vadd.f32 %v1732_v18, %v1711_v41  ;;  %v1253_v37 = vadd.f32 %v1247_v17, %v1231_v49  ;;  %v1738_v28 = vadd.f32 %v1732_v18, %v1715_v50  ;;  %v5184_v18 = vld [vmem:[#allocation8 + $0x490] ss:$8 sps:$4 sm:$0xff]  }
 0x394   : > { %v1256_v51 = vsub.f32 0.0, %v1254_v9  ;;  %v1741_v52 = vsub.f32 0.0, %v1739_v46  ;;  %v1255_v53 = vmax.f32 %v1252_v47, -30.0  ;;  %v1740_v54 = vmax.f32 %v1737_v48, -30.0 }
 0x396   : > { %v1258_v55 = vmul.f32 1.442695, %v1256_v51  ;;  %v1743_v56 = vmul.f32 1.442695, %v1741_v52  ;;  %v1257_v58 = vsub.f32 0.0, %v1255_v53  ;;  %v1742_v11 = vsub.f32 0.0, %v1740_v54 }
 0x398   : > { %5371 = vpow2.f32 %v1258_v55  ;;  %v1260_v13 = vmul.f32 1.442695, %v1257_v58  ;;  %v1745_v27 = vmul.f32 1.442695, %v1742_v11 }
 0x399   : > { %5373 = vpow2.f32 %v1743_v56 }
 0x39a   : > { %5375 = vpow2.f32 %v1260_v13 }
 0x39b   : > { %5377 = vpow2.f32 %v1745_v27 }
 0x3a2   : > { %v5372_v59 = vpop.eup %5371 }
 0x3a3   : > { %v5374_v60 = vpop.eup %5373  ;;  %v1264_v29 = vmul.f32 %v5372_v59, %v5372_v59  ;;  %v1262_v19 = vsub.f32 1.0, %v5372_v59 }
 0x3a4   : > { %v5376_v61 = vpop.eup %5375  ;;  %v1749_v2 = vmul.f32 %v5374_v60, %v5374_v60  ;;  %v1747_v21 = vsub.f32 1.0, %v5374_v60 }
 0x3a5   : > { %v5378_v5 = vpop.eup %5377  ;;  %v1266_v6 = vadd.f32 1.0, %v1264_v29  ;;  %v1265_v7 = vmul.f32 %v5376_v61, %v5376_v61  ;;  %v1263_v24 = vsub.f32 1.0, %v5376_v61  ;;  %v5178_v29 = vld [vmem:[#allocation8 + $0x480] ss:$8 sps:$4 sm:$0xff]  }
 0x3a6   : > { %v1751_v8 = vadd.f32 1.0, %v1749_v2  ;;  %v1750_v10 = vmul.f32 %v5378_v5, %v5378_v5  ;;  %v1748_v33 = vsub.f32 1.0, %v5378_v5 }
 0x3a7   : > { %5379 = vrcp.f32 %v1266_v6  ;;  %v1267_v12 = vadd.f32 1.0, %v1265_v7 }
 0x3a8   : > { %5381 = vrcp.f32 %v1751_v8  ;;  %v1752_v15 = vadd.f32 1.0, %v1750_v10 }
 0x3a9   : > { %5383 = vrcp.f32 %v1267_v12 }
 0x3aa   : > { %5385 = vrcp.f32 %v1752_v15  ;;  %v5189_v15 = vld [vmem:[#allocation8 + $0x614] ss:$8 sps:$4 sm:$0xff]  }
 0x3b1   : > { %v5380_v20 = vpop.eup %5379 }
 0x3b2   : > { %v5382_v22 = vpop.eup %5381  ;;  %v1269_v34 = vmul.f32 %v5380_v20, %v1262_v19  ;;  %v5187_v20 = vld [vmem:[#allocation8 + $0x610] ss:$8 sps:$4 sm:$0xff]  }
 0x3b3   : > { %v5384_v25 = vpop.eup %5383  ;;  %v1754_v32 = vmul.f32 %v5382_v22, %v1747_v21  ;;  %v5192_v21 = vld [vmem:[#allocation8 + $0x4a4] ss:$8 sps:$4 sm:$0xff]  }
 0x3b4   : > { %v5386_v35 = vpop.eup %5385  ;;  %v6193_v36 = vadd.f32 %v1269_v34, %v1251_v23  ;;  %v1271_v42 = vmul.f32 %v5384_v25, %v1263_v24  ;;  %v5195_v22 = vld [vmem:[#allocation8 + $0x624] ss:$8 sps:$4 sm:$0xff]   ;;  %v5190_v23 = vld [vmem:[#allocation8 + $0x4a0] ss:$8 sps:$4 sm:$0xff]   ;;  %v5198_v24 = vld [vmem:[#allocation8 + $0x4b4] ss:$8 sps:$4 sm:$0xff]  }
 0x3b5   : > { %v6195_v43 = vadd.f32 %v1754_v32, %v1736_v31  ;;  %v1756_v30 = vmul.f32 %v5386_v35, %v1748_v33  ;;  %v5193_v34 = vld [vmem:[#allocation8 + $0x620] ss:$8 sps:$4 sm:$0xff]   ;;  %v5201_v25 = vld [vmem:[#allocation8 + $0x634] ss:$8 sps:$4 sm:$0xff]   ;;  %v5196_v31 = vld [vmem:[#allocation8 + $0x4b0] ss:$8 sps:$4 sm:$0xff]  }
 0x3b6   : > { %v6197_v9 = vadd.f32 %v1271_v42, %v1253_v37  ;;  %v2257_v46 = vrot.slane %v6193_v36, 7  ;;  %v2527_v40 = vrot.slane %v6193_v36, 6  ;;  %v5199_v32 = vld [vmem:[#allocation8 + $0x630] ss:$8 sps:$4 sm:$0xff]   ;;  %v5204_v33 = vld [vmem:[#allocation8 + $0x4c4] ss:$8 sps:$4 sm:$0xff]  }
 0x3b7   : > { %v6201_v47 = vadd.f32 %v1756_v30, %v1738_v28  ;;  %v2733_v41 = vrot.slane %v6195_v43, 6  ;;  %v3003_v50 = vrot.slane %v6195_v43, 4  ;;  %v5207_v35 = vld [vmem:[#allocation8 + $0x644] ss:$8 sps:$4 sm:$0xff]   ;;  %v5202_v37 = vld [vmem:[#allocation8 + $0x4c0] ss:$8 sps:$4 sm:$0xff]  }
 0x3b8   : > { %v2256_v48 = vpack.c.bf16 %v6197_v9, %v6193_v36  ;;  %v2258_v49 = vrot.slane %v6197_v9, 7  ;;  %v2528_v51 = vrot.slane %v6197_v9, 6  ;;  %v5205_v42 = vld [vmem:[#allocation8 + $0x640] ss:$8 sps:$4 sm:$0xff]   ;;  %v5210_v28 = vld [vmem:[#allocation8 + $0x4d4] ss:$8 sps:$4 sm:$0xff]  }
 0x3b9   : > { %v2732_v52 = vpack.c.bf16 %v6201_v47, %v6195_v43  ;;  %v2734_v53 = vrot.slane %v6201_v47, 6  ;;  %v3004_v54 = vrot.slane %v6201_v47, 4  ;;  %v5213_v30 = vld [vmem:[#allocation8 + $0x654] ss:$8 sps:$4 sm:$0xff]   ;;  %v5241_v36 = vld [vmem:[#allocation8 + $0x720] ss:$8 sps:$4 sm:$0xff]  }
 0x3ba   : > { %v2259_v55 = vsel %vm442_vm10, %v2257_v46, %v2258_v49  ;;  %v2260_v56 = vsel %vm442_vm10, %v2258_v49, %v2257_v46  ;;  %v2529_v58 = vsel %vm667_vm4, %v2527_v40, %v2528_v51  ;;  %v2530_v11 = vsel %vm667_vm4, %v2528_v51, %v2527_v40  ;;  %v5208_v46 = vld [vmem:[#allocation8 + $0x4d0] ss:$8 sps:$4 sm:$0xff]   ;;  %v5219_v49 = vld [vmem:[#allocation8 + $0x664] ss:$8 sps:$4 sm:$0xff]   ;;  %v5214_v51 = vld [vmem:[#allocation8 + $0x4e0] ss:$8 sps:$4 sm:$0xff]  }
 0x3bb   : > { %v2261_v13 = vmul.f32 %v6090_v39, %v2260_v56  ;;  %v2262_v27 = vmul.f32 %v6088_v38, %v2259_v55  ;;  %v2735_v59 = vsel %vm667_vm4, %v2733_v41, %v2734_v53  ;;  %v2736_v60 = vsel %vm667_vm4, %v2734_v53, %v2733_v41  ;;  %v5181_v39 = vld [vmem:[#allocation8 + $0x600] ss:$8 sps:$4 sm:$0xff]   ;;  %v5186_v38 = vld [vmem:[#allocation8 + $0x494] ss:$8 sps:$4 sm:$0xff]   ;;  %v5211_v40 = vld [vmem:[#allocation8 + $0x650] ss:$8 sps:$4 sm:$0xff]  }
 0x3bc   : > { %v2737_v61 = vmul.f32 %v6096_v45, %v2736_v60  ;;  %v2738_v2 = vmul.f32 %v6094_v44, %v2735_v59  ;;  %v6230_v5 = vmul.f32 %v6096_v45, %v2530_v11  ;;  %v6233_v6 = vmul.f32 %v6094_v44, %v2529_v58  ;;  %v5216_v41 = vld [vmem:[#allocation8 + $0x4e4] ss:$8 sps:$4 sm:$0xff]   ;;  %v5222_v53 = vld [vmem:[#allocation8 + $0x4f4] ss:$8 sps:$4 sm:$0xff]   ;;  %v5220_v55 = vld [vmem:[#allocation8 + $0x4f0] ss:$8 sps:$4 sm:$0xff]  }
 0x3bd   : > { %v2280_v7 = vpack.c.bf16 %v2262_v27, %v2261_v13  ;;  %v3005_v8 = vsel %vm1562_vm11, %v3003_v50, %v3004_v54  ;;  %v3006_v10 = vsel %vm1562_vm11, %v3004_v54, %v3003_v50  ;;  %v5217_v50 = vld [vmem:[#allocation8 + $0x660] ss:$8 sps:$4 sm:$0xff]   ;;  %v5225_v54 = vld [vmem:[#allocation8 + $0x674] ss:$8 sps:$4 sm:$0xff]   ;;  %v5223_v56 = vld [vmem:[#allocation8 + $0x670] ss:$8 sps:$4 sm:$0xff]  }
 0x3be   : > { %v2756_v12 = vpack.c.bf16 %v2738_v2, %v2737_v61  ;;  %v2550_v17 = vpack.c.bf16 %v6233_v6, %v6230_v5  ;;  %v6242_v45 = vmul.f32 %v6127_v4, %v3006_v10  ;;  %v6245_v44 = vmul.f32 %v6125_v3, %v3005_v8  ;;  %v5228_v58 = vld [vmem:[#allocation8 + $0x584] ss:$8 sps:$4 sm:$0xff]   ;;  %v5226_v13 = vld [vmem:[#allocation8 + $0x580] ss:$8 sps:$4 sm:$0xff]   ;;  %v5234_v59 = vld [vmem:[#allocation8 + $0x594] ss:$8 sps:$4 sm:$0xff]  }
 0x3bf   : > { %2394 = vmatmul.mubr.bf16.vlgmr.msra.gmra.mrb[16].mxu0 %v2280_v7  ;;  %v5231_v11 = vld [vmem:[#allocation8 + $0x704] ss:$8 sps:$4 sm:$0xff]   ;;  %v5229_v27 = vld [vmem:[#allocation8 + $0x700] ss:$8 sps:$4 sm:$0xff]   ;;  %v5237_v60 = vld [vmem:[#allocation8 + $0x714] ss:$8 sps:$4 sm:$0xff]  }
 0x3c0   : > { %2485 = vmatpush1.bf16.msra.mxu0 %v5178_v29  ;;  %2870 = vmatmul.mubr.bf16.vlgmr.msra.gmra.mrb[8].mxu1 %v2756_v12  ;;  %v3026_v19 = vpack.c.bf16 %v6245_v44, %v6242_v45  ;;  %v5232_v29 = vld [vmem:[#allocation8 + $0x590] ss:$8 sps:$4 sm:$0xff]   ;;  %v5240_v2 = vld [vmem:[#allocation8 + $0x5a4] ss:$8 sps:$4 sm:$0xff]   ;;  %v5238_v7 = vld [vmem:[#allocation8 + $0x5a0] ss:$8 sps:$4 sm:$0xff]  }
 0x3c1   : > { %2961 = vmatpush1.bf16.msra.mxu1 %v5181_v39  ;;  %2486 = vmatprep.subr.bf16.mxu0 %v5186_v38  ;;  %v5235_v61 = vld [vmem:[#allocation8 + $0x710] ss:$8 sps:$4 sm:$0xff]   ;;  %v5243_v39 = vld [vmem:[#allocation8 + $0x724] ss:$8 sps:$4 sm:$0xff]   ;;  %v5246_v9 = vld [vmem:[#allocation8 + $0x5b4] ss:$8 sps:$4 sm:$0xff]  }
 0x3c2   : > { %2962 = vmatprep.subr.bf16.mxu1 %v5189_v15  ;;  %2516 = vmatprep.mubr.bf16.mxu0 %v5710_v0  ;;  %v5249_v43 = vld [vmem:[#allocation8 + $0x734] ss:$8 sps:$4 sm:$0xff]   ;;  %v5244_v47 = vld [vmem:[#allocation8 + $0x5b0] ss:$8 sps:$4 sm:$0xff]   ;;  %v6259_v38 = vld [vmem:[#allocation10 + $0x4] sm:$0x3] }
 0x3c3   : > { %2992 = vmatprep.mubr.bf16.mxu1 %v5710_v0  ;;  %v5255_v8 = vld [vmem:[#allocation8 + $0x744] ss:$8 sps:$4 sm:$0xff]   ;;  %v5250_v10 = vld [vmem:[#allocation8 + $0x5c0] ss:$8 sps:$4 sm:$0xff]   ;;  %v2208_v12 = vrot.slane %v6259_v38, %v6184_v26  ;;  %v5283_v44 = vld [vmem:[#allocation8 + $0x830] ss:$8 sps:$4 sm:$0xff]  }
 0x3c4   : > { %2487 = vmatpush1.bf16.msra.mxu0 %v5184_v18  ;;  %v5253_v15 = vld [vmem:[#allocation8 + $0x740] ss:$8 sps:$4 sm:$0xff]   ;;  %v5258_v18 = vld [vmem:[#allocation8 + $0x5d4] ss:$8 sps:$4 sm:$0xff]  }
 0x3c5   : > { %2963 = vmatpush1.bf16.msra.mxu1 %v5187_v20  ;;  %2488 = vmatprep.subr.bf16.mxu0 %v5192_v21  ;;  %v5261_v20 = vld [vmem:[#allocation8 + $0x754] ss:$8 sps:$4 sm:$0xff]  }
 0x3c6   : > { %2964 = vmatprep.subr.bf16.mxu1 %v5195_v22 }
 0x3c8   : > { %2489 = vmatpush1.bf16.msra.mxu0 %v5190_v23 }
 0x3c9   : > { %2965 = vmatpush1.bf16.msra.mxu1 %v5193_v34  ;;  %2490 = vmatprep.subr.bf16.mxu0 %v5198_v24  ;;  %v5256_v34 = vld [vmem:[#allocation8 + $0x5d0] ss:$8 sps:$4 sm:$0xff]  }
 0x3ca   : > { %2966 = vmatprep.subr.bf16.mxu1 %v5201_v25  ;;  %v5259_v25 = vld [vmem:[#allocation8 + $0x750] ss:$8 sps:$4 sm:$0xff]  }
 0x3cc   : > { %2491 = vmatpush1.bf16.msra.mxu0 %v5196_v31  ;;  %v5264_v31 = vld [vmem:[#allocation8 + $0x5e4] ss:$8 sps:$4 sm:$0xff]  }
 0x3cd   : > { %2967 = vmatpush1.bf16.msra.mxu1 %v5199_v32  ;;  %2492 = vmatprep.subr.bf16.mxu0 %v5204_v33 }
 0x3ce   : > { %2968 = vmatprep.subr.bf16.mxu1 %v5207_v35 }
 0x3d0   : > { %2493 = vmatpush1.bf16.msra.mxu0 %v5202_v37  ;;  %v5267_v37 = vld [vmem:[#allocation8 + $0x764] ss:$8 sps:$4 sm:$0xff]  }
 0x3d1   : > { %2969 = vmatpush1.bf16.msra.mxu1 %v5205_v42  ;;  %2494 = vmatprep.subr.bf16.mxu0 %v5210_v28 }
 0x3d2   : > { %2970 = vmatprep.subr.bf16.mxu1 %v5213_v30  ;;  %v5262_v30 = vld [vmem:[#allocation8 + $0x5e0] ss:$8 sps:$4 sm:$0xff]  }
 0x3d4   : > { %2495 = vmatpush1.bf16.msra.mxu0 %v5208_v46  ;;  %v5265_v46 = vld [vmem:[#allocation8 + $0x760] ss:$8 sps:$4 sm:$0xff]  }
 0x3d5   : > { %2971 = vmatpush1.bf16.msra.mxu1 %v5211_v40  ;;  %2496 = vmatprep.subr.bf16.mxu0 %v5216_v41  ;;  %v5270_v40 = vld [vmem:[#allocation8 + $0x5f4] ss:$8 sps:$4 sm:$0xff]  }
 0x3d6   : > { %2972 = vmatprep.subr.bf16.mxu1 %v5219_v49 }
 0x3d8   : > { %2497 = vmatpush1.bf16.msra.mxu0 %v5214_v51  ;;  %v5273_v51 = vld [vmem:[#allocation8 + $0x774] ss:$8 sps:$4 sm:$0xff]  }
 0x3d9   : > { %2973 = vmatpush1.bf16.msra.mxu1 %v5217_v50  ;;  %2498 = vmatprep.subr.bf16.mxu0 %v5222_v53  ;;  %v5268_v53 = vld [vmem:[#allocation8 + $0x5f0] ss:$8 sps:$4 sm:$0xff]  }
 0x3da   : > { %2974 = vmatprep.subr.bf16.mxu1 %v5225_v54  ;;  %v5271_v54 = vld [vmem:[#allocation8 + $0x770] ss:$8 sps:$4 sm:$0xff]  }
 0x3dc   : > { %2499 = vmatpush1.bf16.msra.mxu0 %v5220_v55  ;;  %v5276_v55 = vld [vmem:[#allocation8 + $0x804] ss:$8 sps:$4 sm:$0xff]  }
 0x3dd   : > { %2975 = vmatpush1.bf16.msra.mxu1 %v5223_v56  ;;  %2631 = vmatprep.subr.bf16.mxu0 %v5228_v58  ;;  %v5274_v56 = vld [vmem:[#allocation8 + $0x800] ss:$8 sps:$4 sm:$0xff]   ;;  %v5279_v58 = vld [vmem:[#allocation8 + $0x814] ss:$8 sps:$4 sm:$0xff]  }
 0x3de   : > { %3107 = vmatprep.subr.bf16.mxu1 %v5231_v11  ;;  %v5277_v11 = vld [vmem:[#allocation8 + $0x810] ss:$8 sps:$4 sm:$0xff]  }
 0x3df   : > { %2517 = vmatmul.mubr.bf16.vlgmr.msra.gmra.mrb[16].mxu0 %v2256_v48  ;;  %v5247_v48 = vld [vmem:[#allocation8 + $0x730] ss:$8 sps:$4 sm:$0xff]  }
 0x3e0   : > { %2993 = vmatmul.mubr.bf16.vlgmr.msra.gmra.mrb[8].mxu1 %v2732_v52  ;;  %2632 = vmatpush1.bf16.msra.mxu0 %v5226_v13  ;;  %v5252_v52 = vld [vmem:[#allocation8 + $0x5c4] ss:$8 sps:$4 sm:$0xff]  }
 0x3e1   : > { %3108 = vmatpush1.bf16.msra.mxu1 %v5229_v27  ;;  %2633 = vmatprep.subr.bf16.mxu0 %v5234_v59  ;;  %v5282_v13 = vld [vmem:[#allocation8 + $0x824] ss:$8 sps:$4 sm:$0xff]  }
 0x3e2   : > { %3109 = vmatprep.subr.bf16.mxu1 %v5237_v60  ;;  %2663 = vmatprep.mubr.bf16.mxu0 %v5710_v0 }
 0x3e3   : > { %3139 = vmatprep.mubr.bf16.mxu1 %v5710_v0 }
 0x3e4   : > { %2634 = vmatpush1.bf16.msra.mxu0 %v5232_v29  ;;  %v5280_v29 = vld [vmem:[#allocation8 + $0x820] ss:$8 sps:$4 sm:$0xff]  }
 0x3e5   : > { %3110 = vmatpush1.bf16.msra.mxu1 %v5235_v61  ;;  %2635 = vmatprep.subr.bf16.mxu0 %v5240_v2  ;;  %v5286_v61 = vld [vmem:[#allocation8 + $0x840] ss:$8 sps:$4 sm:$0xff]   ;;  %v5291_v2 = vld [vmem:[#allocation8 + $0x854] ss:$8 sps:$4 sm:$0xff]  }
 0x3e6   : > { %3111 = vmatprep.subr.bf16.mxu1 %v5243_v39  ;;  %v2212_v39 = vrot.slane %v6259_v38, %v6189_v16 }
 0x3e8   : > { %2636 = vmatpush1.bf16.msra.mxu0 %v5238_v7 }
 0x3e9   : > { %3112 = vmatpush1.bf16.msra.mxu1 %v5241_v36  ;;  %2637 = vmatprep.subr.bf16.mxu0 %v5246_v9  ;;  %v5289_v36 = vld [vmem:[#allocation8 + $0x850] ss:$8 sps:$4 sm:$0xff]  }
 0x3ea   : > { %3113 = vmatprep.subr.bf16.mxu1 %v5249_v43  ;;  %v5294_v43 = vld [vmem:[#allocation8 + $0x864] ss:$8 sps:$4 sm:$0xff]  }
 0x3ec   : > { %2638 = vmatpush1.bf16.msra.mxu0 %v5244_v47 }
 0x3ed   : > { %3114 = vmatpush1.bf16.msra.mxu1 %v5247_v48  ;;  %2639 = vmatprep.subr.bf16.mxu0 %v5252_v52 }
 0x3ee   : > { %3115 = vmatprep.subr.bf16.mxu1 %v5255_v8 }
 0x3ef   : > { %v2189_v21 = vpop.f32.mrb[4].mxu1 }
 0x3f0   : > { %v2215_v22 = vadd.f32 %v2208_v12, %v2189_v21  ;;  %2640 = vmatpush1.bf16.msra.mxu0 %v5250_v10  ;;  %v6263_v23 = vpop.f32.mrb[5].mxu1 }
 0x3f1   : > { %3116 = vmatpush1.bf16.msra.mxu1 %v5253_v15  ;;  %v2193_v24 = vpop.f32.mrb[6].mxu1  ;;  %2641 = vmatprep.subr.bf16.mxu0 %v5258_v18  ;;  %v2216_v47 = vadd.f32 %v2212_v39, %v6263_v23  ;;  %v5292_v18 = vld [vmem:[#allocation8 + $0x860] ss:$8 sps:$4 sm:$0xff]  }
 0x3f2   : > { %v2219_v32 = vmax.f32 %v2215_v22, -30.0  ;;  %v2217_v33 = vadd.f32 %v2208_v12, %v2193_v24  ;;  %v6265_v35 = vpop.f32.mrb[7].mxu1  ;;  %3117 = vmatprep.subr.bf16.mxu1 %v5261_v20  ;;  %v5297_v20 = vld [vmem:[#allocation8 + $0x874] ss:$8 sps:$4 sm:$0xff]  }
 0x3f3   : > { %v2218_v12 = vadd.f32 %v2212_v39, %v6265_v35  ;;  %v5348_v39 = vld [vmem:[#allocation11 + $0x10] sm:$0xff]  }
 0x3f4   : > { %v2221_v42 = vsub.f32 0.0, %v2219_v32  ;;  %v2220_v28 = vmax.f32 %v2217_v33, -30.0  ;;  %2642 = vmatpush1.bf16.msra.mxu0 %v5256_v34 }
 0x3f5   : > { %3118 = vmatpush1.bf16.msra.mxu1 %v5259_v25  ;;  %2643 = vmatprep.subr.bf16.mxu0 %v5264_v31  ;;  %v5295_v25 = vld [vmem:[#allocation8 + $0x870] ss:$8 sps:$4 sm:$0xff]   ;;  %v5300_v31 = vld [vmem:[#allocation8 + $0x784] ss:$8 sps:$4 sm:$0xff]  }
 0x3f6   : > { %v2223_v41 = vmul.f32 1.442695, %v2221_v42  ;;  %v2222_v49 = vsub.f32 0.0, %v2220_v28  ;;  %3119 = vmatprep.subr.bf16.mxu1 %v5267_v37  ;;  %v5303_v42 = vld [vmem:[#allocation8 + $0x794] ss:$8 sps:$4 sm:$0xff]  }
 0x3f7   : > { %v5301_v28 = vld [vmem:[#allocation8 + $0x790] ss:$8 sps:$4 sm:$0xff]  }
 0x3f8   : > { %5387 = vpow2.f32 %v2223_v41  ;;  %v2225_v50 = vmul.f32 1.442695, %v2222_v49  ;;  %2644 = vmatpush1.bf16.msra.mxu0 %v5262_v30  ;;  %v5304_v30 = vld [vmem:[#allocation8 + $0x7a0] ss:$8 sps:$4 sm:$0xff]   ;;  %v5315_v41 = vld [vmem:[#allocation8 + $0x7d4] ss:$8 sps:$4 sm:$0xff]  }
 0x3f9   : > { %3120 = vmatpush1.bf16.msra.mxu1 %v5265_v46  ;;  %2645 = vmatprep.subr.bf16.mxu0 %v5270_v40  ;;  %v5309_v46 = vld [vmem:[#allocation8 + $0x7b4] ss:$8 sps:$4 sm:$0xff]   ;;  %v5310_v40 = vld [vmem:[#allocation8 + $0x7c0] ss:$8 sps:$4 sm:$0xff]   ;;  %v5313_v49 = vld [vmem:[#allocation8 + $0x7d0] ss:$8 sps:$4 sm:$0xff]  }
 0x3fa   : > { %5389 = vpow2.f32 %v2225_v50  ;;  %3121 = vmatprep.subr.bf16.mxu1 %v5273_v51  ;;  %v5318_v51 = vld [vmem:[#allocation8 + $0x7e4] ss:$8 sps:$4 sm:$0xff]   ;;  %v5316_v50 = vld [vmem:[#allocation8 + $0x7e0] ss:$8 sps:$4 sm:$0xff]  }
 0x3fc   : > { %2646 = vmatpush1.bf16.msra.mxu0 %v5268_v53  ;;  %v5321_v53 = vld [vmem:[#allocation8 + $0x7f4] ss:$8 sps:$4 sm:$0xff]  }
 0x3fd   : > { %3122 = vmatpush1.bf16.msra.mxu1 %v5271_v54  ;;  %3313 = vmatprep.subr.bf16.mxu0 %v5276_v55  ;;  %v5319_v54 = vld [vmem:[#allocation8 + $0x7f0] ss:$8 sps:$4 sm:$0xff]   ;;  %v5324_v55 = vld [vmem:[#allocation8 + $0x884] ss:$8 sps:$4 sm:$0xff]  }
 0x3fe   : > { %4631 = vmatprep.subr.bf16.mxu1 %v5711_v1 }
 0x3ff   : > { %2664 = vmatmul.mubr.bf16.vlgmr.msra.gmra.mrb[16].mxu0 %v2550_v17  ;;  %v5285_v17 = vld [vmem:[#allocation8 + $0x834] ss:$8 sps:$4 sm:$0xff]  }
 0x400   : > { %3140 = vmatmul.mubr.bf16.vlgmr.msra.gmra.mrb[8].mxu1 %v3026_v19  ;;  %3314 = vmatpush1.bf16.msra.mxu0 %v5274_v56  ;;  %v5288_v19 = vld [vmem:[#allocation8 + $0x844] ss:$8 sps:$4 sm:$0xff]   ;;  %v5322_v56 = vld [vmem:[#allocation8 + $0x880] ss:$8 sps:$4 sm:$0xff]  }
 0x401   : > { %3315 = vmatprep.subr.bf16.mxu0 %v5279_v58  ;;  %3345 = vmatprep.mubr.bf16.mxu0 %v5710_v0  ;;  %v5327_v58 = vld [vmem:[#allocation8 + $0x894] ss:$8 sps:$4 sm:$0xff]  }
 0x402   : > { %v5388_v27 = vpop.eup %5387  ;;  %4647 = vmatprep.mubr.msk.bf16.mxu1 %vm5712_vm5, %v5711_v1 }
 0x403   : > { %v2229_v59 = vmul.f32 %v5388_v27, %v5388_v27  ;;  %v2227_v7 = vsub.f32 1.0, %v5388_v27  ;;  %v5328_v27 = vld [vmem:[#allocation8 + $0x8a0] ss:$8 sps:$4 sm:$0xff]  }
 0x404   : > { %v5390_v60 = vpop.eup %5389  ;;  %3316 = vmatpush1.bf16.msra.mxu0 %v5277_v11  ;;  %v5325_v11 = vld [vmem:[#allocation8 + $0x890] ss:$8 sps:$4 sm:$0xff]  }
 0x405   : > { %v2231_v5 = vadd.f32 1.0, %v2229_v59  ;;  %v2230_v6 = vmul.f32 %v5390_v60, %v5390_v60  ;;  %3317 = vmatprep.subr.bf16.mxu0 %v5282_v13  ;;  %v2228_v52 = vsub.f32 1.0, %v5390_v60  ;;  %v5330_v13 = vld [vmem:[#allocation8 + $0x8a4] ss:$8 sps:$4 sm:$0xff]   ;;  %v5333_v59 = vld [vmem:[#allocation8 + $0x8b4] ss:$8 sps:$4 sm:$0xff]  }
 0x406   : > { %v5331_v60 = vld [vmem:[#allocation8 + $0x8b0] ss:$8 sps:$4 sm:$0xff]  }
 0x407   : > { %5391 = vrcp.f32 %v2231_v5  ;;  %v2232_v45 = vadd.f32 1.0, %v2230_v6  ;;  %v5334_v5 = vld [vmem:[#allocation8 + $0x8c0] ss:$8 sps:$4 sm:$0xff]   ;;  %v5339_v6 = vld [vmem:[#allocation8 + $0x8d4] ss:$8 sps:$4 sm:$0xff]  }
 0x408   : > { %3318 = vmatpush1.bf16.msra.mxu0 %v5280_v29  ;;  %v5336_v29 = vld [vmem:[#allocation8 + $0x8c4] ss:$8 sps:$4 sm:$0xff]  }
 0x409   : > { %5393 = vrcp.f32 %v2232_v45  ;;  %3319 = vmatprep.subr.bf16.mxu0 %v5285_v17  ;;  %v5337_v17 = vld [vmem:[#allocation8 + $0x8d0] ss:$8 sps:$4 sm:$0xff]   ;;  %v5342_v45 = vld [vmem:[#allocation8 + $0x8e4] ss:$8 sps:$4 sm:$0xff]  }
 0x40c   : > { %3320 = vmatpush1.bf16.msra.mxu0 %v5283_v44  ;;  %v5345_v44 = vld [vmem:[#allocation8 + $0x8f4] ss:$8 sps:$4 sm:$0xff]  }
 0x40d   : > { %3321 = vmatprep.subr.bf16.mxu0 %v5288_v19  ;;  %v5343_v19 = vld [vmem:[#allocation8 + $0x8f0] ss:$8 sps:$4 sm:$0xff]  }
 0x410   : > { %3322 = vmatpush1.bf16.msra.mxu0 %v5286_v61  ;;  %v5346_v61 = vld [vmem:[#allocation11] sm:$0xff]  }
 0x411   : > { %v5392_v9 = vpop.eup %5391  ;;  %3323 = vmatprep.subr.bf16.mxu0 %v5291_v2  ;;  %4632 = vmatpush3.bf16.msra.mxu1 %v5346_v61  ;;  %v5347_v2 = vld [vmem:[#allocation11 + $0x8] sm:$0xff]  }
 0x412   : > { %v2234_v48 = vmul.f32 %v5392_v9, %v2227_v7  ;;  %4633 = vmatprep.subr.bf16.mxu1 %v5711_v1  ;;  %v5349_v7 = vld [vmem:[#allocation11 + $0x18] sm:$0xff]   ;;  %v5351_v9 = vld [vmem:[#allocation11 + $0x28] sm:$0xff]  }
 0x413   : > { %v5394_v8 = vpop.eup %5393 }
 0x414   : > { %v2237_v10 = vadd.f32 %v2234_v48, %v2216_v47  ;;  %v2236_v15 = vmul.f32 %v5394_v8, %v2228_v52  ;;  %3324 = vmatpush1.bf16.msra.mxu0 %v5289_v36  ;;  %v5350_v36 = vld [vmem:[#allocation11 + $0x20] sm:$0xff]   ;;  %v5353_v47 = vld [vmem:[#allocation11 + $0x38] sm:$0xff]  }
 0x415   : > { %3325 = vmatprep.subr.bf16.mxu0 %v5294_v43  ;;  %4634 = vmatpush3.bf16.msra.mxu1 %v5347_v2  ;;  %v5352_v43 = vld [vmem:[#allocation11 + $0x30] sm:$0xff]   ;;  %v2679_v48 = vld [vmem:[#allocation10 + $0x6] sm:$0x3]  ;;  %v3155_v52 = vld [vmem:[#allocation10 + $0x8] sm:$0x3] }
 0x416   : > { %v2238_v38 = vadd.f32 %v2236_v15, %v2218_v12  ;;  %v3209_v21 = vrot.slane %v2237_v10, 4  ;;  %v6283_v22 = vmul.f32 %v4888_v62, %v2237_v10  ;;  %4635 = vmatprep.subr.bf16.mxu1 %v5711_v1  ;;  %v2684_v8 = vrot.slane %v2679_v48, %v6184_v26 }
 0x418   : > { %v3208_v34 = vpack.c.bf16 %v2238_v38, %v2237_v10  ;;  %v3210_v24 = vrot.slane %v2238_v38, 4  ;;  %v6287_v23 = vmul.f32 %v4887_v63, %v2238_v38  ;;  %3326 = vmatpush1.bf16.msra.mxu0 %v5292_v18  ;;  %v3160_v10 = vrot.slane %v3155_v52, %v6184_v26 }
 0x419   : > { %3327 = vmatprep.subr.bf16.mxu0 %v5297_v20  ;;  %4636 = vmatpush3.bf16.msra.mxu1 %v5348_v39 }
 0x41a   : > { %v3211_v32 = vsel %vm1562_vm11, %v3209_v21, %v3210_v24  ;;  %v3212_v33 = vsel %vm1562_vm11, %v3210_v24, %v3209_v21  ;;  %v3498_v62 = vpack.c.bf16 %v6283_v22, %v6287_v23  ;;  %4637 = vmatprep.subr.bf16.mxu1 %v5711_v1 }
 0x41b   : > { %v3213_v35 = vmul.f32 %v6127_v4, %v3212_v33  ;;  %v3214_v37 = vmul.f32 %v6125_v3, %v3211_v32  ;;  %v5307_v4 = vld [vmem:[#allocation8 + $0x7b0] ss:$8 sps:$4 sm:$0xff]   ;;  %v5312_v3 = vld [vmem:[#allocation8 + $0x7c4] ss:$8 sps:$4 sm:$0xff]  }
 0x41c   : > { %3328 = vmatpush1.bf16.msra.mxu0 %v5295_v25 }
 0x41d   : > { %3436 = vmatprep.subr.bf16.mxu0 %v5300_v31  ;;  %v3232_v63 = vpack.c.bf16 %v3214_v37, %v3213_v35  ;;  %4638 = vmatpush3.bf16.msra.mxu1 %v5349_v7 }
 0x41e   : > { %4639 = vmatprep.subr.bf16.mxu1 %v5711_v1 }
 0x41f   : > { %3346 = vmatmul.mubr.bf16.vlgmr.msra.gmra.mrb[20].mxu0 %v3232_v63 }
 0x420   : > { %3437 = vmatpush1.bf16.msra.mxu0 %v5298_v57  ;;  %3468 = vmatprep.mubr.bf16.mxu0 %v5710_v0 }
 0x421   : > { %3438 = vmatprep.subr.bf16.mxu0 %v5303_v42  ;;  %4640 = vmatpush3.bf16.msra.mxu1 %v5350_v36 }
 0x422   : > { %4641 = vmatprep.subr.bf16.mxu1 %v5711_v1 }
 0x424   : > { %3439 = vmatpush1.bf16.msra.mxu0 %v5301_v28 }
 0x425   : > { %3440 = vmatprep.subr.bf16.mxu0 %v5306_v14  ;;  %4642 = vmatpush3.bf16.msra.mxu1 %v5351_v9 }
 0x426   : > { %4643 = vmatprep.subr.bf16.mxu1 %v5711_v1 }
 0x428   : > { %3441 = vmatpush1.bf16.msra.mxu0 %v5304_v30 }
 0x429   : > { %3442 = vmatprep.subr.bf16.mxu0 %v5309_v46  ;;  %4644 = vmatpush3.bf16.msra.mxu1 %v5352_v43 }
 0x42a   : > { %4645 = vmatprep.subr.bf16.mxu1 %v5711_v1 }
 0x42c   : > { %3443 = vmatpush1.bf16.msra.mxu0 %v5307_v4 }
 0x42d   : > { %3444 = vmatprep.subr.bf16.mxu0 %v5312_v3  ;;  %4646 = vmatpush3.bf16.msra.mxu1 %v5353_v47 }
 0x42e   : > { %4651 = vmatprep.subr.bf16.mxu1 %v5711_v1 }
 0x430   : > { %3445 = vmatpush1.bf16.msra.mxu0 %v5310_v40 }
 0x431   : > { %3446 = vmatprep.subr.bf16.mxu0 %v5315_v41 }
 0x434   : > { %3447 = vmatpush1.bf16.msra.mxu0 %v5313_v49 }
 0x435   : > { %3448 = vmatprep.subr.bf16.mxu0 %v5318_v51 }
 0x438   : > { %3449 = vmatpush1.bf16.msra.mxu0 %v5316_v50 }
 0x439   : > { %3450 = vmatprep.subr.bf16.mxu0 %v5321_v53 }
 0x43c   : > { %3451 = vmatpush1.bf16.msra.mxu0 %v5319_v54 }
 0x43d   : > { %3579 = vmatprep.subr.bf16.mxu0 %v5324_v55 }
 0x43f   : > { %3469 = vmatmul.mubr.bf16.vlgmr.msra.gmra.mrb[20].mxu0 %v3208_v34 }
 0x440   : > { %3580 = vmatpush1.bf16.msra.mxu0 %v5322_v56  ;;  %3611 = vmatprep.mubr.bf16.mxu0 %v5710_v0  ;;  %v5340_v0 = vld [vmem:[#allocation8 + $0x8e0] ss:$8 sps:$4 sm:$0xff]  }
 0x441   : > { %3581 = vmatprep.subr.bf16.mxu0 %v5327_v58 }
 0x444   : > { %3582 = vmatpush1.bf16.msra.mxu0 %v5325_v11  ;;  %v2688_v11 = vrot.slane %v2679_v48, %v6189_v16 }
 0x445   : > { %3583 = vmatprep.subr.bf16.mxu0 %v5330_v13  ;;  %v3164_v13 = vrot.slane %v3155_v52, %v6189_v16  ;;  %v5354_v52 = vld [vmem:[#allocation11 + $0x40] sm:$0xff]  }
 0x448   : > { %3584 = vmatpush1.bf16.msra.mxu0 %v5328_v27 }
 0x449   : > { %3585 = vmatprep.subr.bf16.mxu0 %v5333_v59 }
 0x44c   : > { %3586 = vmatpush1.bf16.msra.mxu0 %v5331_v60 }
 0x44d   : > { %3587 = vmatprep.subr.bf16.mxu0 %v5336_v29 }
 0x450   : > { %3588 = vmatpush1.bf16.msra.mxu0 %v5334_v5 }
 0x451   : > { %3589 = vmatprep.subr.bf16.mxu0 %v5339_v6 }
 0x454   : > { %3590 = vmatpush1.bf16.msra.mxu0 %v5337_v17 }
 0x455   : > { %3591 = vmatprep.subr.bf16.mxu0 %v5342_v45 }
 0x458   : > { %3592 = vmatpush1.bf16.msra.mxu0 %v5340_v0 }
 0x459   : > { %3593 = vmatprep.subr.bf16.mxu0 %v5345_v44 }
 0x45c   : > { %3594 = vmatpush1.bf16.msra.mxu0 %v5343_v19 }
 0x45f   : > { %3612 = vmatmul.mubr.bf16.vlgmr.msra.gmra.mrb[20].mxu0 %v3498_v62 }
 0x4d2   : > { %v2665_v12 = vpop.f32.mrb[16].mxu0 }
 0x4d3   : > { %v2691_v15 = vadd.f32 %v2684_v8, %v2665_v12  ;;  %v3141_v18 = vpop.f32.mrb[8].mxu1  ;;  %v2667_v20 = vpop.f32.mrb[17].mxu0  ;;  %v5355_v12 = vld [vmem:[#allocation11 + $0x48] sm:$0xff]  }
 0x4d4   : > { %v3167_v38 = vadd.f32 %v3160_v10, %v3141_v18  ;;  %v3143_v21 = vpop.f32.mrb[9].mxu1  ;;  %v2669_v22 = vpop.f32.mrb[18].mxu0  ;;  %v2692_v5 = vadd.f32 %v2688_v11, %v2667_v20  ;;  %v5357_v18 = vld [vmem:[#allocation11 + $0x58] sm:$0xff]   ;;  %v5358_v20 = vld [vmem:[#allocation11 + $0x60] sm:$0xff]  }
 0x4d5   : > { %v2695_v34 = vmax.f32 %v2691_v15, -30.0  ;;  %v2693_v24 = vadd.f32 %v2684_v8, %v2669_v22  ;;  %v3145_v23 = vpop.f32.mrb[10].mxu1  ;;  %v2671_v25 = vpop.f32.mrb[19].mxu0  ;;  %v3168_v0 = vadd.f32 %v3164_v13, %v3143_v21  ;;  %v5356_v15 = vld [vmem:[#allocation11 + $0x50] sm:$0xff]   ;;  %v5361_v22 = vld [vmem:[#allocation11 + $0x78] sm:$0xff]  }
 0x4d6   : > { %v3171_v31 = vmax.f32 %v3167_v38, -30.0  ;;  %v3169_v32 = vadd.f32 %v3160_v10, %v3145_v23  ;;  %v3147_v33 = vpop.f32.mrb[11].mxu1  ;;  %v2694_v39 = vadd.f32 %v2688_v11, %v2671_v25  ;;  %v5359_v38 = vld [vmem:[#allocation11 + $0x68] sm:$0xff]   ;;  %v5360_v21 = vld [vmem:[#allocation11 + $0x70] sm:$0xff]   ;;  %v5365_v25 = vld [vmem:[#allocation11 + $0x98] sm:$0xff]  }
 0x4d7   : > { %v2697_v62 = vsub.f32 0.0, %v2695_v34  ;;  %v2696_v35 = vmax.f32 %v2693_v24, -30.0  ;;  %v3170_v9 = vadd.f32 %v3164_v13, %v3147_v33  ;;  %v5362_v34 = vld [vmem:[#allocation11 + $0x80] sm:$0xff]   ;;  %v5363_v24 = vld [vmem:[#allocation11 + $0x88] sm:$0xff]   ;;  %v5364_v23 = vld [vmem:[#allocation11 + $0x90] sm:$0xff]  }
 0x4d8   : > { %v3173_v37 = vsub.f32 0.0, %v3171_v31  ;;  %v3172_v57 = vmax.f32 %v3169_v32, -30.0  ;;  %v5366_v31 = vld [vmem:[#allocation11 + $0xa0] sm:$0xff]   ;;  %v3627_v32 = vld [vmem:[#allocation10 + $0xa] sm:$0x3]  ;;  %v5367_v33 = vld [vmem:[#allocation11 + $0xa8] sm:$0xff]  }
 0x4d9   : > { %v2699_v63 = vmul.f32 1.442695, %v2697_v62  ;;  %v2698_v42 = vsub.f32 0.0, %v2696_v35  ;;  %v3632_v62 = vrot.slane %v3627_v32, %v6184_v26 }
 0x4da   : > { %v3175_v28 = vmul.f32 1.442695, %v3173_v37  ;;  %v3174_v14 = vsub.f32 0.0, %v3172_v57  ;;  %v5368_v37 = vld [vmem:[#allocation11 + $0xb0] sm:$0xff]  }
 0x4db   : > { %5395 = vpow2.f32 %v2699_v63  ;;  %v2701_v30 = vmul.f32 1.442695, %v2698_v42 }
 0x4dc   : > { %5397 = vpow2.f32 %v3175_v28  ;;  %v3177_v46 = vmul.f32 1.442695, %v3174_v14 }
 0x4dd   : > { %5399 = vpow2.f32 %v2701_v30 }
 0x4de   : > { %5401 = vpow2.f32 %v3177_v46  ;;  %v5369_v46 = vld [vmem:[#allocation11 + $0xb8] sm:$0xff]  }
 0x4e5   : > { %v5396_v4 = vpop.eup %5395 }
 0x4e6   : > { %v5398_v3 = vpop.eup %5397  ;;  %v2705_v40 = vmul.f32 %v5396_v4, %v5396_v4  ;;  %v2703_v27 = vsub.f32 1.0, %v5396_v4 }
 0x4e7   : > { %v5400_v41 = vpop.eup %5399  ;;  %v3181_v49 = vmul.f32 %v5398_v3, %v5398_v3  ;;  %v3179_v60 = vsub.f32 1.0, %v5398_v3 }
 0x4e8   : > { %v5402_v51 = vpop.eup %5401  ;;  %v2707_v50 = vadd.f32 1.0, %v2705_v40  ;;  %v2706_v53 = vmul.f32 %v5400_v41, %v5400_v41  ;;  %v2704_v17 = vsub.f32 1.0, %v5400_v41 }
 0x4e9   : > { %v3183_v54 = vadd.f32 1.0, %v3181_v49  ;;  %v3182_v55 = vmul.f32 %v5402_v51, %v5402_v51  ;;  %v3180_v19 = vsub.f32 1.0, %v5402_v51 }
 0x4ea   : > { %5403 = vrcp.f32 %v2707_v50  ;;  %v2708_v56 = vadd.f32 1.0, %v2706_v53 }
 0x4eb   : > { %5405 = vrcp.f32 %v3183_v54  ;;  %v3184_v58 = vadd.f32 1.0, %v3182_v55 }
 0x4ec   : > { %5407 = vrcp.f32 %v2708_v56  ;;  %v3636_v56 = vrot.slane %v3627_v32, %v6189_v16 }
 0x4ed   : > { %5409 = vrcp.f32 %v3184_v58 }
 0x4f4   : > { %v5404_v59 = vpop.eup %5403 }
 0x4f5   : > { %v5406_v29 = vpop.eup %5405  ;;  %v2710_v6 = vmul.f32 %v5404_v59, %v2703_v27 }
 0x4f6   : > { %v5408_v45 = vpop.eup %5407  ;;  %v3186_v44 = vmul.f32 %v5406_v29, %v3179_v60 }
 0x4f7   : > { %v5410_v61 = vpop.eup %5409  ;;  %v2713_v2 = vadd.f32 %v2710_v6, %v2692_v5  ;;  %v2712_v7 = vmul.f32 %v5408_v45, %v2704_v17  ;;  %v4493_v45 = vld [vmem:[#allocation13] ss:$0 sm:$0xff] }
 0x4f8   : > { %v3189_v36 = vadd.f32 %v3186_v44, %v3168_v0  ;;  %v3188_v43 = vmul.f32 %v5410_v61, %v3180_v19 }
 0x4f9   : > { %v2714_v47 = vadd.f32 %v2712_v7, %v2694_v39 }
 0x4fa   : > { %v3190_v48 = vadd.f32 %v3188_v43, %v3170_v9 }
 0x4fb   : > { %v3680_v8 = vpack.c.bf16 %v2714_v47, %v2713_v2 }
 0x4fc   : > { %v3795_v10 = vpack.c.bf16 %v3190_v48, %v3189_v36 }
 0x4fd   : > { %4648 = vmatmul.mubr.bf16.vlgmr.msra.gmra.mrb[12].mxu1 %v3680_v8 }
 0x4fe   : > { %4652 = vmatpush3.bf16.msra.mxu1 %v5354_v52  ;;  %4667 = vmatprep.mubr.msk.bf16.mxu1 %vm5712_vm5, %v5711_v1 }
 0x4ff   : > { %4653 = vmatprep.subr.bf16.mxu1 %v5711_v1 }
 0x502   : > { %4654 = vmatpush3.bf16.msra.mxu1 %v5355_v12 }
 0x503   : > { %4655 = vmatprep.subr.bf16.mxu1 %v5711_v1 }
 0x506   : > { %4656 = vmatpush3.bf16.msra.mxu1 %v5356_v15 }
 0x507   : > { %4657 = vmatprep.subr.bf16.mxu1 %v5711_v1 }
 0x50a   : > { %4658 = vmatpush3.bf16.msra.mxu1 %v5357_v18 }
 0x50b   : > { %4659 = vmatprep.subr.bf16.mxu1 %v5711_v1 }
 0x50e   : > { %4660 = vmatpush3.bf16.msra.mxu1 %v5358_v20 }
 0x50f   : > { %4661 = vmatprep.subr.bf16.mxu1 %v5711_v1 }
 0x512   : > { %4662 = vmatpush3.bf16.msra.mxu1 %v5359_v38 }
 0x513   : > { %4663 = vmatprep.subr.bf16.mxu1 %v5711_v1 }
 0x516   : > { %4664 = vmatpush3.bf16.msra.mxu1 %v5360_v21 }
 0x517   : > { %4665 = vmatprep.subr.bf16.mxu1 %v5711_v1 }
 0x51a   : > { %4666 = vmatpush3.bf16.msra.mxu1 %v5361_v22 }
 0x51b   : > { %4671 = vmatprep.subr.bf16.mxu1 %v5711_v1 }
 0x51d   : > { %4668 = vmatmul.mubr.bf16.vlgmr.msra.gmra.mrb[12].mxu1 %v3795_v10 }
 0x51e   : > { %4672 = vmatpush3.bf16.msra.mxu1 %v5362_v34  ;;  %4687 = vmatprep.mubr.msk.bf16.mxu1 %vm5712_vm5, %v5711_v1 }
 0x51f   : > { %4673 = vmatprep.subr.bf16.mxu1 %v5711_v1 }
 0x522   : > { %4674 = vmatpush3.bf16.msra.mxu1 %v5363_v24 }
 0x523   : > { %4675 = vmatprep.subr.bf16.mxu1 %v5711_v1 }
 0x526   : > { %4676 = vmatpush3.bf16.msra.mxu1 %v5364_v23 }
 0x527   : > { %4677 = vmatprep.subr.bf16.mxu1 %v5711_v1 }
 0x52a   : > { %4678 = vmatpush3.bf16.msra.mxu1 %v5365_v25 }
 0x52b   : > { %4679 = vmatprep.subr.bf16.mxu1 %v5711_v1 }
 0x52e   : > { %4680 = vmatpush3.bf16.msra.mxu1 %v5366_v31 }
 0x52f   : > { %4681 = vmatprep.subr.bf16.mxu1 %v5711_v1 }
 0x532   : > { %v3613_v35 = vpop.f32.mrb[20].mxu0  ;;  %4682 = vmatpush3.bf16.msra.mxu1 %v5367_v33 }
 0x533   : > { %v3639_v57 = vadd.f32 %v3632_v62, %v3613_v35  ;;  %v3615_v63 = vpop.f32.mrb[21].mxu0  ;;  %4683 = vmatprep.subr.bf16.mxu1 %v5711_v1 }
 0x534   : > { %v3617_v42 = vpop.f32.mrb[22].mxu0  ;;  %v3640_v11 = vadd.f32 %v3636_v56, %v3615_v63 }
 0x535   : > { %v3643_v28 = vmax.f32 %v3639_v57, -30.0  ;;  %v3641_v14 = vadd.f32 %v3632_v62, %v3617_v42  ;;  %v3619_v30 = vpop.f32.mrb[23].mxu0 }
 0x536   : > { %4684 = vmatpush3.bf16.msra.mxu1 %v5368_v37  ;;  %v3642_v29 = vadd.f32 %v3636_v56, %v3619_v30 }
 0x537   : > { %v3645_v4 = vsub.f32 0.0, %v3643_v28  ;;  %v3644_v3 = vmax.f32 %v3641_v14, -30.0  ;;  %4685 = vmatprep.subr.bf16.mxu1 %v5711_v1 }
 0x539   : > { %v3647_v26 = vmul.f32 1.442695, %v3645_v4  ;;  %v3646_v40 = vsub.f32 0.0, %v3644_v3 }
 0x53a   : > { %4686 = vmatpush3.bf16.msra.mxu1 %v5369_v46 }
 0x53b   : > { %5411 = vpow2.f32 %v3647_v26  ;;  %v3649_v41 = vmul.f32 1.442695, %v3646_v40 }
 0x53d   : > { %5413 = vpow2.f32 %v3649_v41 }
 0x545   : > { %v5412_v49 = vpop.eup %5411 }
 0x546   : > { %v3653_v51 = vmul.f32 %v5412_v49, %v5412_v49  ;;  %v3651_v58 = vsub.f32 1.0, %v5412_v49 }
 0x547   : > { %v5414_v50 = vpop.eup %5413 }
 0x548   : > { %v3655_v53 = vadd.f32 1.0, %v3653_v51  ;;  %v3654_v54 = vmul.f32 %v5414_v50, %v5414_v50  ;;  %v3652_v27 = vsub.f32 1.0, %v5414_v50 }
 0x54a   : > { %5415 = vrcp.f32 %v3655_v53  ;;  %v3656_v55 = vadd.f32 1.0, %v3654_v54 }
 0x54c   : > { %5417 = vrcp.f32 %v3656_v55 }
 0x554   : > { %v5416_v1 = vpop.eup %5415 }
 0x555   : > { %v3658_v13 = vmul.f32 %v5416_v1, %v3651_v58 }
 0x556   : > { %v5418_v59 = vpop.eup %5417 }
 0x557   : > { %v3661_v60 = vadd.f32 %v3658_v13, %v3640_v11  ;;  %v3660_v5 = vmul.f32 %v5418_v59, %v3652_v27 }
 0x559   : > { %v3662_v6 = vadd.f32 %v3660_v5, %v3642_v29 }
 0x55b   : > { %v3904_v17 = vpack.c.bf16 %v3662_v6, %v3661_v60 }
 0x55d   : > { %4688 = vmatmul.mubr.bf16.vlgmr.msra.gmra.mrb[12].mxu1 %v3904_v17 }
 0x630   : > { %v3987_v16 = vpop.f32.mrb[12].mxu1 }
 0x631   : > { %v4691_v0 = vadd.f32 %v4493_v45, %v3987_v16  ;;  %v4689_v44 = vpop.f32.mrb[13].mxu1 }
 0x632   : > { %v3990_v19 = vpop.f32.mrb[14].mxu1 }
 0x633   : > { %3996 = vst [vmem:[%s406_s13] sm:$0xff] %v4691_v0  ;;  %v4692_v61 = vadd.f32 %v4493_v45, %v3990_v19  ;;  %v4690_v2 = vpop.f32.mrb[15].mxu1 }
 0x635   : > { %3997 = vst [vmem:[%s406_s13 + $0x8] sm:$0xff] %v4692_v61 }
 0x636   : > { %5630 = shalt.err (!%p5627_p8)
}
 0x637   : > { %s5631_s24 = scalar_lea.hbm %s6342_s18, 256  ;;  %s5635_s13 = scalar_lea.hbm %s6394_s8, 512 }
 0x638   : > { %p5632_p7 = scmp.ne.s32.totalorder %s6342_s18, %s5631_s24  ;;  %p5636_p3 = scmp.lt.u32.totalorder %s6342_s18, %s6394_s8 }
 0x639   : > { %p5637_p0 = scmp.lt.u32.totalorder %s5635_s13, %s5631_s24  ;;  %p5639_p6 = scmp.lt.u32.totalorder %s5631_s24, %s6342_s18 }
 0x63a   : > { %p5633_p9 = pnand %p5632_p7, %p6421_p5 }
 0x63b   : > { %p5638_p2 = por %p5637_p0, %p5636_p3 }
 0x63c   : > { %p5634_p4 = pneg %p5633_p9 }
 0x63d   : > { %p5640_p10 = por %p5639_p6, %p5638_p2 }
 0x63f   : > { %p5641_p1 = pnand %p5640_p10, %p5634_p4 }
 0x641   : > { %5644 = shalt.err (!%p5641_p1)
}
 0x642   : > { %s5714_s22 = smov 128   ;;  %s5715_s11 = smov 8  }
 0x643   : > { %4775 = dma.vmem_to_hbm [thread:$0]  (%p6421_p5), %s6337_s21, 256, %s6342_s18, %s3999_s26, %s5714_s22, %s5714_s22, %s5715_s11  }
 0x644 PF: > { %s4027_s9 = sand.u32 1, %s5683_s27   ;;  %p6422_p11 = scmp.ne.s32.totalorder %s6411_s19, 0 }
 0x645   : > { %p6423_p12 = scmp.ge.s32.totalorder %s5695_s30, 2  ;;  %s4028_s12 = scalar_lea.sflag [#allocation4], %s4027_s9 }
 0x647   : > { %p4801_p13 = pnand %p6423_p12, %p6422_p11 }
 0x649   : > { %5678 = dma.done.wait (!%p4801_p13), %s4028_s12, 256  }
 0x64a   : > { %5680 = vsyncadd (!%p4801_p13), %s4028_s12, 4294967040  ;;  %p24_p8 = scmp.ge.s32.totalorder %s5939_s15, 4   ;;  %s6424_s27 = smov %s5687_s28 }
 0x64b   : > { %s6425_s28 = smov %s5691_s29  ;;  %s6426_s29 = smov %s5950_s2 }
 0x64c   : > { %s6427_s30 = smov %s5939_s15  ;;  %26 = sbr.rel (!%p24_p8) target bundleno = 10 (0xa), region = 147 }
 0x653   :  { %4033 = vsyncpa [#allocation3], 1 }
 0x654   :  { %4035 = vsyncpa [#allocation3 + $0x1], 1 }
 0x655   :  { %4036 = vsyncpa [#allocation6], 1 }
 0x656   :  { %4037 = vsyncpa [#allocation9], 1 }
 0x657   :  { %4038 = vsyncpa [#allocation12], 1 }
 0x658   :  { %4039 = vsyncpa [#allocation4], 1 }
 0x659   :  { %4041 = vsyncpa [#allocation4 + $0x1], 1 }

</bundles_post_ra>
